<compile_context>
chip_gen: v7x
topology: tpu7x:2x2x1
jax: 0.10.0
libtpu: 0.0.40
codegen_flags: <defaults>
</compile_context>

<pallas_src>
import jax
import jax.numpy as jnp
from jax.experimental import pallas as pl
from jax.experimental.pallas import tpu as pltpu

_BN_EPS = 1e-5


def _sigmoid(z):
    # tanh goes to the EUP (otherwise idle here) instead of a VPU divide.
    return 0.5 * (jnp.tanh(0.5 * z) + 1.0)


def _pick_tile(total, target, mult):
    """Largest divisor of `total` that is <= target and a multiple of `mult`;
    falls back to the full extent (always legal as a block dim)."""
    if total <= target:
        return total
    d = (target // mult) * mult
    while d >= mult:
        if total % d == 0:
            return d
        d -= mult
    return total


# ---------------- K1: per-(n, c) spatial avg + max (single pass) -------------
def _pool_rows_kernel(x_ref, avg_ref, max_ref):
    x = x_ref[...]                                   # (TR, HW)
    avg_ref[...] = jnp.mean(x, axis=1, keepdims=True)
    max_ref[...] = jnp.max(x, axis=1, keepdims=True)


# ---------------- K2: shared MLP + sigmoid -> channel gate -------------------
def _channel_mlp_kernel(avg_ref, max_ref, w1_ref, b1_ref, w2_ref, b2_ref,
                        scale_ref):
    def mlp(p):
        h = jnp.dot(p, w1_ref[...], preferred_element_type=jnp.float32)
        h = jnp.maximum(h + b1_ref[...], 0.0)
        return jnp.dot(h, w2_ref[...], preferred_element_type=jnp.float32) + b2_ref[...]

    scale_ref[...] = _sigmoid(mlp(avg_ref[...]) + mlp(max_ref[...]))


# -------- K3: fused channel-gate apply + channel max/mean pool ---------------
def _gate_compress_kernel(x_ref, cg_ref, max_ref, mean_ref):
    xg = x_ref[...] * cg_ref[...]                    # (1, C, TS) * (1, C, 1)
    max_ref[...] = jnp.max(xg, axis=1, keepdims=True)
    mean_ref[...] = jnp.mean(xg, axis=1, keepdims=True)


# ---------------- K4: 7x7 conv, 2 -> 1 channel, pad 3, no bias ---------------
def _spatial_conv_kernel(w_ref, xp_ref, y_ref):
    # w_ref: SMEM (98,) f32 laid out as [c][ky][kx]
    # xp_ref: VMEM (1, 2, H+6, W+6) zero-padded input; y_ref: (1, H, W)
    _, H, W = y_ref.shape
    acc = jnp.zeros((H, W), jnp.float32)
    for c in range(2):
        for ky in range(7):
            for kx in range(7):
                wv = w_ref[c * 49 + ky * 7 + kx]
                acc = acc + wv * xp_ref[0, c, ky:ky + H, kx:kx + W]
    y_ref[0] = acc


# ---------------- K5: fused channel-gate * spatial-gate apply ----------------
def _apply_gates_kernel(ab_ref, x_ref, cg_ref, y_ref, o_ref):
    a = ab_ref[0]                                    # gamma / sqrt(var + eps)
    b = ab_ref[1]                                    # beta - mean * a
    sp = _sigmoid(y_ref[...] * a + b)                # (1, 1, TS)
    o_ref[...] = x_ref[...] * cg_ref[...] * sp       # (1, C, TS)


def cbam_forward(x, params):
    """x: f32[N, C, H, W] -> f32[N, C, H, W] (CBAM forward, batch-stat BN)."""
    N, C, H, W = x.shape
    HW = H * W
    f32 = jnp.float32
    x3 = x.astype(f32).reshape(N, C, HW)             # lane-dense last dim
    x2d = x3.reshape(N * C, HW)

    # ---- K1: pooling for the channel gate ----
    NC = N * C
    TR = _pick_tile(NC, 1024, 8)
    avg2d, max2d = pl.pallas_call(
        _pool_rows_kernel,
        out_shape=(jax.ShapeDtypeStruct((NC, 1), f32),
                   jax.ShapeDtypeStruct((NC, 1), f32)),
        grid=(NC // TR,),
        in_specs=[pl.BlockSpec((TR, HW), lambda i: (i, 0))],
        out_specs=(pl.BlockSpec((TR, 1), lambda i: (i, 0)),
                   pl.BlockSpec((TR, 1), lambda i: (i, 0))),
        compiler_params=pltpu.CompilerParams(dimension_semantics=("parallel",)),
    )(x2d)

    # ---- K2: shared MLP + sigmoid (tiny, single block) ----
    cg = pl.pallas_call(
        _channel_mlp_kernel,
        out_shape=jax.ShapeDtypeStruct((N, C), f32),
    )(avg2d.reshape(N, C), max2d.reshape(N, C),
      params["w1"], params["b1"], params["w2"], params["b2"])
    cg3 = cg.reshape(N, C, 1)

    # ---- K3: apply channel gate (in registers) + channel max/mean pool ----
    TS = _pick_tile(HW, 2048, 128)
    grid_sp = (N, HW // TS)
    par2 = pltpu.CompilerParams(dimension_semantics=("parallel", "parallel"))
    cmax, cmean = pl.pallas_call(
        _gate_compress_kernel,
        out_shape=(jax.ShapeDtypeStruct((N, 1, HW), f32),
                   jax.ShapeDtypeStruct((N, 1, HW), f32)),
        grid=grid_sp,
        in_specs=[pl.BlockSpec((1, C, TS), lambda n, t: (n, 0, t)),
                  pl.BlockSpec((1, C, 1), lambda n, t: (n, 0, 0))],
        out_specs=(pl.BlockSpec((1, 1, TS), lambda n, t: (n, 0, t)),
                   pl.BlockSpec((1, 1, TS), lambda n, t: (n, 0, t))),
        compiler_params=par2,
    )(x3, cg3)

    # ---- K4: 7x7 spatial conv ----
    comp = jnp.concatenate([cmax, cmean], axis=1).reshape(N, 2, H, W)
    comp_pad = jnp.pad(comp, ((0, 0), (0, 0), (3, 3), (3, 3)))
    Hp, Wp = H + 6, W + 6
    w_flat = params["conv_w"].astype(f32).reshape(-1)         # (98,)
    y = pl.pallas_call(
        _spatial_conv_kernel,
        out_shape=jax.ShapeDtypeStruct((N, H, W), f32),
        grid=(N,),
        in_specs=[pl.BlockSpec(memory_space=pltpu.MemorySpace.SMEM),
                  pl.BlockSpec((1, 2, Hp, Wp), lambda n: (n, 0, 0, 0))],
        out_specs=pl.BlockSpec((1, H, W), lambda n: (n, 0, 0)),
        compiler_params=pltpu.CompilerParams(dimension_semantics=("parallel",)),
    )(w_flat, comp_pad)

    # BatchNorm2d(1) training-mode batch stats over (N, H, W); fold gamma/beta
    # into two scalars.  The stats reduction is over the tiny 1-channel conv
    # map, so it stays as plain XLA glue.
    # TODO(synk): running_mean/running_var momentum updates of nn.BatchNorm2d
    # are a training side effect and are not reproduced here.
    mean = jnp.mean(y)
    var = jnp.mean(jnp.square(y - mean))                      # biased var
    a = params["bn_gamma"] * jax.lax.rsqrt(var + _BN_EPS)
    b = params["bn_beta"] - mean * a
    ab = jnp.stack([a, b]).astype(f32)                        # (2,) SMEM scalars
    y3 = y.reshape(N, 1, HW)

    # ---- K5: out = x * channel_gate * spatial_gate ----
    out3 = pl.pallas_call(
        _apply_gates_kernel,
        out_shape=jax.ShapeDtypeStruct((N, C, HW), f32),
        grid=grid_sp,
        in_specs=[pl.BlockSpec(memory_space=pltpu.MemorySpace.SMEM),
                  pl.BlockSpec((1, C, TS), lambda n, t: (n, 0, t)),
                  pl.BlockSpec((1, C, 1), lambda n, t: (n, 0, 0)),
                  pl.BlockSpec((1, 1, TS), lambda n, t: (n, 0, t))],
        out_specs=pl.BlockSpec((1, C, TS), lambda n, t: (n, 0, t)),
        compiler_params=par2,
    )(ab, x3, cg3, y3)

    return out3.reshape(N, C, H, W)


# ------------------------------ pure-JAX reference ---------------------------
def _reference(x, params):
    f32 = jnp.float32
    x = x.astype(f32)
    avg = jnp.mean(x, axis=(2, 3))
    mx = jnp.max(x, axis=(2, 3))

    def mlp(p):
        h = jnp.maximum(p @ params["w1"] + params["b1"], 0.0)
        return h @ params["w2"] + params["b2"]

    cg = jax.nn.sigmoid(mlp(avg) + mlp(mx))[:, :, None, None]
    xg = x * cg
    comp = jnp.concatenate(
        [jnp.max(xg, axis=1, keepdims=True), jnp.mean(xg, axis=1, keepdims=True)],
        axis=1)
    y = jax.lax.conv_general_dilated(
        comp, params["conv_w"].astype(f32), window_strides=(1, 1),
        padding=[(3, 3), (3, 3)],
        dimension_numbers=("NCHW", "OIHW", "NCHW"))
    mean = jnp.mean(y)
    var = jnp.mean(jnp.square(y - mean))
    yn = (y - mean) * jax.lax.rsqrt(var + _BN_EPS) * params["bn_gamma"] + params["bn_beta"]
    return xg * jax.nn.sigmoid(yn)


if __name__ == "__main__":
    key = jax.random.PRNGKey(0)
    k = jax.random.split(key, 6)

    # gate_channels=32, reduction_ratio=16 (so the MLP hidden dim is 2),
    # batch=2, spatial 16x16  ->  H*W = 256 (lane-dense).
    N, C, H, W = 2, 32, 16, 16
    hid = C // 16
    x = jax.random.normal(k[0], (N, C, H, W), dtype=jnp.float32)

    params = {
        # ChannelGate MLP: Linear(C, C//16) -> ReLU -> Linear(C//16, C)
        "w1": jax.random.normal(k[1], (C, hid), jnp.float32) * 0.2,
        "b1": jax.random.normal(k[2], (1, hid), jnp.float32) * 0.1,
        "w2": jax.random.normal(k[3], (hid, C), jnp.float32) * 0.2,
        "b2": jax.random.normal(k[4], (1, C), jnp.float32) * 0.1,
        # SpatialGate: Conv2d(2, 1, 7, padding=3, bias=False) + BN(1) defaults
        "conv_w": jax.random.normal(k[5], (1, 2, 7, 7), jnp.float32) * 0.1,
        "bn_gamma": jnp.float32(1.0),
        "bn_beta": jnp.float32(0.0),
    }

    out = jax.jit(cbam_forward)(x, params)
    out = jax.block_until_ready(out)

    ref = _reference(x, params)
    err = float(jnp.max(jnp.abs(out - ref)))
    assert out.shape == x.shape
    assert err < 1e-4, f"max abs error {err}"
    print("KERNEL_OK")
</pallas_src>

<mosaic_0001>
module attributes {stable_mosaic.version = 11 : i64} {
  func.func @_pool_rows_kernel(%arg0: i32, %arg1: memref<64x256xf32, #tpu.memory_space<vmem>>, %arg2: memref<64x1xf32, #tpu.memory_space<vmem>>, %arg3: memref<64x1xf32, #tpu.memory_space<vmem>>) attributes {dimension_semantics = [#tpu.dimension_semantics<parallel>], iteration_bounds = array<i64: 1>, scalar_prefetch = 0 : i64, scratch_operands = 0 : i64, tpu.core_type = #tpu.core_type<tc>, window_params = [{transform_indices = @transform_0, window_bounds = array<i64: 64, 256>}, {transform_indices = @transform_1, window_bounds = array<i64: 64, 1>}, {transform_indices = @transform_2, window_bounds = array<i64: 64, 1>}]} {
    %c0 = arith.constant 0 : index
    %c0_0 = arith.constant 0 : index
    %0 = vector.load %arg1[%c0, %c0_0] : memref<64x256xf32, #tpu.memory_space<vmem>>, vector<64x256xf32>
    %cst = arith.constant dense<0.000000e+00> : vector<64xf32>
    %1 = vector.multi_reduction <add>, %0, %cst [1] : vector<64x256xf32> to vector<64xf32>
    %2 = vector.shape_cast %1 : vector<64xf32> to vector<64x1xf32>
    %cst_1 = arith.constant 2.560000e+02 : f32
    %3 = vector.broadcast %cst_1 : f32 to vector<64x1xf32>
    %4 = arith.divf %2, %3 : vector<64x1xf32>
    %c0_2 = arith.constant 0 : index
    %c0_3 = arith.constant 0 : index
    %5 = vector.load %arg2[%c0_2, %c0_3] : memref<64x1xf32, #tpu.memory_space<vmem>>, vector<64x1xf32>
    tpu.vector_store %arg2[%c0_2, %c0_3], %4 {strides = array<i32>} : memref<64x1xf32, #tpu.memory_space<vmem>>, vector<64x1xf32>,
    %cst_4 = arith.constant dense<0xFF800000> : vector<64xf32>
    %6 = vector.multi_reduction <maximumf>, %0, %cst_4 [1] : vector<64x256xf32> to vector<64xf32>
    %7 = vector.shape_cast %6 : vector<64xf32> to vector<64x1xf32>
    %c0_5 = arith.constant 0 : index
    %c0_6 = arith.constant 0 : index
    %8 = vector.load %arg3[%c0_5, %c0_6] : memref<64x1xf32, #tpu.memory_space<vmem>>, vector<64x1xf32>
    tpu.vector_store %arg3[%c0_5, %c0_6], %7 {strides = array<i32>} : memref<64x1xf32, #tpu.memory_space<vmem>>, vector<64x1xf32>,
    return
  }
  func.func @transform_0(%arg0: i32) -> (i32, i32) {
    %c0_i32 = arith.constant 0 : i32
    %c0_i32_0 = arith.constant 0 : i32
    return %arg0, %c0_i32 : i32, i32
  }
  func.func @transform_1(%arg0: i32) -> (i32, i32) {
    %c0_i32 = arith.constant 0 : i32
    %c0_i32_0 = arith.constant 0 : i32
    return %arg0, %c0_i32 : i32, i32
  }
  func.func @transform_2(%arg0: i32) -> (i32, i32) {
    %c0_i32 = arith.constant 0 : i32
    %c0_i32_0 = arith.constant 0 : i32
    return %arg0, %c0_i32 : i32, i32
  }
}

module attributes {stable_mosaic.version = 11 : i64} {
  func.func @_channel_mlp_kernel(%arg0: memref<2x32xf32, #tpu.memory_space<vmem>>, %arg1: memref<2x32xf32, #tpu.memory_space<vmem>>, %arg2: memref<32x2xf32, #tpu.memory_space<vmem>>, %arg3: memref<1x2xf32, #tpu.memory_space<vmem>>, %arg4: memref<2x32xf32, #tpu.memory_space<vmem>>, %arg5: memref<1x32xf32, #tpu.memory_space<vmem>>, %arg6: memref<2x32xf32, #tpu.memory_space<vmem>>) attributes {dimension_semantics = [], scalar_prefetch = 0 : i64, scratch_operands = 0 : i64, tpu.core_type = #tpu.core_type<tc>} {
    %c0 = arith.constant 0 : index
    %c0_0 = arith.constant 0 : index
    %0 = vector.load %arg0[%c0, %c0_0] : memref<2x32xf32, #tpu.memory_space<vmem>>, vector<2x32xf32>
    %c0_1 = arith.constant 0 : index
    %c0_2 = arith.constant 0 : index
    %1 = vector.load %arg2[%c0_1, %c0_2] : memref<32x2xf32, #tpu.memory_space<vmem>>, vector<32x2xf32>
    %cst = arith.constant dense<0.000000e+00> : vector<2x2xf32>
    %2 = tpu.matmul %0, %1, %cst {dimension_numbers = #tpu.dot_dimension_numbers<[1], [0], [0], [1], [0, 0, 1, 1], [], []>} : vector<2x32xf32>, vector<32x2xf32>, vector<2x2xf32> -> vector<2x2xf32>
    %c0_3 = arith.constant 0 : index
    %c0_4 = arith.constant 0 : index
    %3 = vector.load %arg3[%c0_3, %c0_4] : memref<1x2xf32, #tpu.memory_space<vmem>>, vector<1x2xf32>
    %4 = vector.broadcast %3 : vector<1x2xf32> to vector<2x2xf32>
    %5 = arith.addf %2, %4 : vector<2x2xf32>
    %cst_5 = arith.constant 0.000000e+00 : f32
    %6 = vector.broadcast %cst_5 : f32 to vector<2x2xf32>
    %7 = arith.maximumf %5, %6 : vector<2x2xf32>
    %c0_6 = arith.constant 0 : index
    %c0_7 = arith.constant 0 : index
    %8 = vector.load %arg4[%c0_6, %c0_7] : memref<2x32xf32, #tpu.memory_space<vmem>>, vector<2x32xf32>
    %cst_8 = arith.constant dense<0.000000e+00> : vector<2x32xf32>
    %9 = tpu.matmul %7, %8, %cst_8 {dimension_numbers = #tpu.dot_dimension_numbers<[1], [0], [0], [1], [0, 0, 1, 1], [], []>} : vector<2x2xf32>, vector<2x32xf32>, vector<2x32xf32> -> vector<2x32xf32>
    %c0_9 = arith.constant 0 : index
    %c0_10 = arith.constant 0 : index
    %10 = vector.load %arg5[%c0_9, %c0_10] : memref<1x32xf32, #tpu.memory_space<vmem>>, vector<1x32xf32>
    %11 = vector.broadcast %10 : vector<1x32xf32> to vector<2x32xf32>
    %12 = arith.addf %9, %11 : vector<2x32xf32>
    %c0_11 = arith.constant 0 : index
    %c0_12 = arith.constant 0 : index
    %13 = vector.load %arg1[%c0_11, %c0_12] : memref<2x32xf32, #tpu.memory_space<vmem>>, vector<2x32xf32>
    %c0_13 = arith.constant 0 : index
    %c0_14 = arith.constant 0 : index
    %14 = vector.load %arg2[%c0_13, %c0_14] : memref<32x2xf32, #tpu.memory_space<vmem>>, vector<32x2xf32>
    %cst_15 = arith.constant dense<0.000000e+00> : vector<2x2xf32>
    %15 = tpu.matmul %13, %14, %cst_15 {dimension_numbers = #tpu.dot_dimension_numbers<[1], [0], [0], [1], [0, 0, 1, 1], [], []>} : vector<2x32xf32>, vector<32x2xf32>, vector<2x2xf32> -> vector<2x2xf32>
    %c0_16 = arith.constant 0 : index
    %c0_17 = arith.constant 0 : index
    %16 = vector.load %arg3[%c0_16, %c0_17] : memref<1x2xf32, #tpu.memory_space<vmem>>, vector<1x2xf32>
    %17 = vector.broadcast %16 : vector<1x2xf32> to vector<2x2xf32>
    %18 = arith.addf %15, %17 : vector<2x2xf32>
    %cst_18 = arith.constant 0.000000e+00 : f32
    %19 = vector.broadcast %cst_18 : f32 to vector<2x2xf32>
    %20 = arith.maximumf %18, %19 : vector<2x2xf32>
    %c0_19 = arith.constant 0 : index
    %c0_20 = arith.constant 0 : index
    %21 = vector.load %arg4[%c0_19, %c0_20] : memref<2x32xf32, #tpu.memory_space<vmem>>, vector<2x32xf32>
    %cst_21 = arith.constant dense<0.000000e+00> : vector<2x32xf32>
    %22 = tpu.matmul %20, %21, %cst_21 {dimension_numbers = #tpu.dot_dimension_numbers<[1], [0], [0], [1], [0, 0, 1, 1], [], []>} : vector<2x2xf32>, vector<2x32xf32>, vector<2x32xf32> -> vector<2x32xf32>
    %c0_22 = arith.constant 0 : index
    %c0_23 = arith.constant 0 : index
    %23 = vector.load %arg5[%c0_22, %c0_23] : memref<1x32xf32, #tpu.memory_space<vmem>>, vector<1x32xf32>
    %24 = vector.broadcast %23 : vector<1x32xf32> to vector<2x32xf32>
    %25 = arith.addf %22, %24 : vector<2x32xf32>
    %26 = arith.addf %12, %25 : vector<2x32xf32>
    %cst_24 = arith.constant 5.000000e-01 : f32
    %27 = vector.broadcast %cst_24 : f32 to vector<2x32xf32>
    %28 = arith.mulf %27, %26 : vector<2x32xf32>
    %29 = math.tanh %28 : vector<2x32xf32>
    %cst_25 = arith.constant 1.000000e+00 : f32
    %30 = vector.broadcast %cst_25 : f32 to vector<2x32xf32>
    %31 = arith.addf %29, %30 : vector<2x32xf32>
    %cst_26 = arith.constant 5.000000e-01 : f32
    %32 = vector.broadcast %cst_26 : f32 to vector<2x32xf32>
    %33 = arith.mulf %32, %31 : vector<2x32xf32>
    %c0_27 = arith.constant 0 : index
    %c0_28 = arith.constant 0 : index
    %34 = vector.load %arg6[%c0_27, %c0_28] : memref<2x32xf32, #tpu.memory_space<vmem>>, vector<2x32xf32>
    tpu.vector_store %arg6[%c0_27, %c0_28], %33 {strides = array<i32>} : memref<2x32xf32, #tpu.memory_space<vmem>>, vector<2x32xf32>,
    return
  }
}

module attributes {stable_mosaic.version = 11 : i64} {
  func.func @_gate_compress_kernel(%arg0: i32, %arg1: i32, %arg2: memref<1x32x256xf32, #tpu.memory_space<vmem>>, %arg3: memref<1x32x1xf32, #tpu.memory_space<vmem>>, %arg4: memref<1x1x256xf32, #tpu.memory_space<vmem>>, %arg5: memref<1x1x256xf32, #tpu.memory_space<vmem>>) attributes {dimension_semantics = [#tpu.dimension_semantics<parallel>, #tpu.dimension_semantics<parallel>], iteration_bounds = array<i64: 2, 1>, scalar_prefetch = 0 : i64, scratch_operands = 0 : i64, tpu.core_type = #tpu.core_type<tc>, window_params = [{transform_indices = @transform_0, window_bounds = array<i64: 1, 32, 256>}, {transform_indices = @transform_1, window_bounds = array<i64: 1, 32, 1>}, {transform_indices = @transform_2, window_bounds = array<i64: 1, 1, 256>}, {transform_indices = @transform_3, window_bounds = array<i64: 1, 1, 256>}]} {
    %c0 = arith.constant 0 : index
    %c0_0 = arith.constant 0 : index
    %c0_1 = arith.constant 0 : index
    %0 = vector.load %arg2[%c0, %c0_0, %c0_1] : memref<1x32x256xf32, #tpu.memory_space<vmem>>, vector<1x32x256xf32>
    %c0_2 = arith.constant 0 : index
    %c0_3 = arith.constant 0 : index
    %c0_4 = arith.constant 0 : index
    %1 = vector.load %arg3[%c0_2, %c0_3, %c0_4] : memref<1x32x1xf32, #tpu.memory_space<vmem>>, vector<1x32x1xf32>
    %2 = vector.broadcast %1 : vector<1x32x1xf32> to vector<1x32x256xf32>
    %3 = arith.mulf %0, %2 : vector<1x32x256xf32>
    %cst = arith.constant dense<0xFF800000> : vector<1x256xf32>
    %4 = vector.multi_reduction <maximumf>, %3, %cst [1] : vector<1x32x256xf32> to vector<1x256xf32>
    %5 = vector.shape_cast %4 : vector<1x256xf32> to vector<1x1x256xf32>
    %c0_5 = arith.constant 0 : index
    %c0_6 = arith.constant 0 : index
    %c0_7 = arith.constant 0 : index
    %6 = vector.load %arg4[%c0_5, %c0_6, %c0_7] : memref<1x1x256xf32, #tpu.memory_space<vmem>>, vector<1x1x256xf32>
    tpu.vector_store %arg4[%c0_5, %c0_6, %c0_7], %5 {strides = array<i32>} : memref<1x1x256xf32, #tpu.memory_space<vmem>>, vector<1x1x256xf32>,
    %cst_8 = arith.constant dense<0.000000e+00> : vector<1x256xf32>
    %7 = vector.multi_reduction <add>, %3, %cst_8 [1] : vector<1x32x256xf32> to vector<1x256xf32>
    %8 = vector.shape_cast %7 : vector<1x256xf32> to vector<1x1x256xf32>
    %cst_9 = arith.constant 3.200000e+01 : f32
    %9 = vector.broadcast %cst_9 : f32 to vector<1x1x256xf32>
    %10 = arith.divf %8, %9 : vector<1x1x256xf32>
    %c0_10 = arith.constant 0 : index
    %c0_11 = arith.constant 0 : index
    %c0_12 = arith.constant 0 : index
    %11 = vector.load %arg5[%c0_10, %c0_11, %c0_12] : memref<1x1x256xf32, #tpu.memory_space<vmem>>, vector<1x1x256xf32>
    tpu.vector_store %arg5[%c0_10, %c0_11, %c0_12], %10 {strides = array<i32>} : memref<1x1x256xf32, #tpu.memory_space<vmem>>, vector<1x1x256xf32>,
    return
  }
  func.func @transform_0(%arg0: i32, %arg1: i32) -> (i32, i32, i32) {
    %c0_i32 = arith.constant 0 : i32
    %c0_i32_0 = arith.constant 0 : i32
    return %arg0, %c0_i32, %arg1 : i32, i32, i32
  }
  func.func @transform_1(%arg0: i32, %arg1: i32) -> (i32, i32, i32) {
    %c0_i32 = arith.constant 0 : i32
    %c0_i32_0 = arith.constant 0 : i32
    %c0_i32_1 = arith.constant 0 : i32
    return %arg0, %c0_i32, %c0_i32_0 : i32, i32, i32
  }
  func.func @transform_2(%arg0: i32, %arg1: i32) -> (i32, i32, i32) {
    %c0_i32 = arith.constant 0 : i32
    %c0_i32_0 = arith.constant 0 : i32
    return %arg0, %c0_i32, %arg1 : i32, i32, i32
  }
  func.func @transform_3(%arg0: i32, %arg1: i32) -> (i32, i32, i32) {
    %c0_i32 = arith.constant 0 : i32
    %c0_i32_0 = arith.constant 0 : i32
    return %arg0, %c0_i32, %arg1 : i32, i32, i32
  }
}

module attributes {stable_mosaic.version = 11 : i64} {
  func.func @_apply_gates_kernel(%arg0: i32, %arg1: i32, %arg2: memref<2xf32, #tpu.memory_space<smem>>, %arg3: memref<1x32x256xf32, #tpu.memory_space<vmem>>, %arg4: memref<1x32x1xf32, #tpu.memory_space<vmem>>, %arg5: memref<1x1x256xf32, #tpu.memory_space<vmem>>, %arg6: memref<1x32x256xf32, #tpu.memory_space<vmem>>) attributes {dimension_semantics = [#tpu.dimension_semantics<parallel>, #tpu.dimension_semantics<parallel>], iteration_bounds = array<i64: 2, 1>, scalar_prefetch = 0 : i64, scratch_operands = 0 : i64, tpu.core_type = #tpu.core_type<tc>, window_params = [{transform_indices = @transform_0, window_bounds = array<i64: 2>}, {transform_indices = @transform_1, window_bounds = array<i64: 1, 32, 256>}, {transform_indices = @transform_2, window_bounds = array<i64: 1, 32, 1>}, {transform_indices = @transform_3, window_bounds = array<i64: 1, 1, 256>}, {transform_indices = @transform_4, window_bounds = array<i64: 1, 32, 256>}]} {
    %c0 = arith.constant 0 : index
    %0 = memref.load %arg2[%c0] : memref<2xf32, #tpu.memory_space<smem>>
    %c1 = arith.constant 1 : index
    %1 = memref.load %arg2[%c1] : memref<2xf32, #tpu.memory_space<smem>>
    %c0_0 = arith.constant 0 : index
    %c0_1 = arith.constant 0 : index
    %c0_2 = arith.constant 0 : index
    %2 = vector.load %arg5[%c0_0, %c0_1, %c0_2] : memref<1x1x256xf32, #tpu.memory_space<vmem>>, vector<1x1x256xf32>
    %3 = vector.broadcast %0 : f32 to vector<1x1x256xf32>
    %4 = arith.mulf %2, %3 : vector<1x1x256xf32>
    %5 = vector.broadcast %1 : f32 to vector<1x1x256xf32>
    %6 = arith.addf %4, %5 : vector<1x1x256xf32>
    %cst = arith.constant 5.000000e-01 : f32
    %7 = vector.broadcast %cst : f32 to vector<1x1x256xf32>
    %8 = arith.mulf %7, %6 : vector<1x1x256xf32>
    %9 = math.tanh %8 : vector<1x1x256xf32>
    %cst_3 = arith.constant 1.000000e+00 : f32
    %10 = vector.broadcast %cst_3 : f32 to vector<1x1x256xf32>
    %11 = arith.addf %9, %10 : vector<1x1x256xf32>
    %cst_4 = arith.constant 5.000000e-01 : f32
    %12 = vector.broadcast %cst_4 : f32 to vector<1x1x256xf32>
    %13 = arith.mulf %12, %11 : vector<1x1x256xf32>
    %c0_5 = arith.constant 0 : index
    %c0_6 = arith.constant 0 : index
    %c0_7 = arith.constant 0 : index
    %14 = vector.load %arg3[%c0_5, %c0_6, %c0_7] : memref<1x32x256xf32, #tpu.memory_space<vmem>>, vector<1x32x256xf32>
    %c0_8 = arith.constant 0 : index
    %c0_9 = arith.constant 0 : index
    %c0_10 = arith.constant 0 : index
    %15 = vector.load %arg4[%c0_8, %c0_9, %c0_10] : memref<1x32x1xf32, #tpu.memory_space<vmem>>, vector<1x32x1xf32>
    %16 = vector.broadcast %15 : vector<1x32x1xf32> to vector<1x32x256xf32>
    %17 = arith.mulf %14, %16 : vector<1x32x256xf32>
    %18 = vector.broadcast %13 : vector<1x1x256xf32> to vector<1x32x256xf32>
    %19 = arith.mulf %17, %18 : vector<1x32x256xf32>
    %c0_11 = arith.constant 0 : index
    %c0_12 = arith.constant 0 : index
    %c0_13 = arith.constant 0 : index
    %20 = vector.load %arg6[%c0_11, %c0_12, %c0_13] : memref<1x32x256xf32, #tpu.memory_space<vmem>>, vector<1x32x256xf32>
    tpu.vector_store %arg6[%c0_11, %c0_12, %c0_13], %19 {strides = array<i32>} : memref<1x32x256xf32, #tpu.memory_space<vmem>>, vector<1x32x256xf32>,
    return
  }
  func.func @transform_0(%arg0: i32, %arg1: i32) -> i32 {
    %c0_i32 = arith.constant 0 : i32
    %c0_i32_0 = arith.constant 0 : i32
    return %c0_i32 : i32
  }
  func.func @transform_1(%arg0: i32, %arg1: i32) -> (i32, i32, i32) {
    %c0_i32 = arith.constant 0 : i32
    %c0_i32_0 = arith.constant 0 : i32
    return %arg0, %c0_i32, %arg1 : i32, i32, i32
  }
  func.func @transform_2(%arg0: i32, %arg1: i32) -> (i32, i32, i32) {
    %c0_i32 = arith.constant 0 : i32
    %c0_i32_0 = arith.constant 0 : i32
    %c0_i32_1 = arith.constant 0 : i32
    return %arg0, %c0_i32, %c0_i32_0 : i32, i32, i32
  }
  func.func @transform_3(%arg0: i32, %arg1: i32) -> (i32, i32, i32) {
    %c0_i32 = arith.constant 0 : i32
    %c0_i32_0 = arith.constant 0 : i32
    return %arg0, %c0_i32, %arg1 : i32, i32, i32
  }
  func.func @transform_4(%arg0: i32, %arg1: i32) -> (i32, i32, i32) {
    %c0_i32 = arith.constant 0 : i32
    %c0_i32_0 = arith.constant 0 : i32
    return %arg0, %c0_i32, %arg1 : i32, i32, i32
  }
}

module attributes {stable_mosaic.version = 11 : i64} {
  func.func @_spatial_conv_kernel(%arg0: i32, %arg1: memref<98xf32, #tpu.memory_space<smem>>, %arg2: memref<1x2x22x22xf32, #tpu.memory_space<vmem>>, %arg3: memref<1x16x16xf32, #tpu.memory_space<vmem>>) attributes {dimension_semantics = [#tpu.dimension_semantics<parallel>], iteration_bounds = array<i64: 2>, scalar_prefetch = 0 : i64, scratch_operands = 0 : i64, tpu.core_type = #tpu.core_type<tc>, window_params = [{transform_indices = @transform_0, window_bounds = array<i64: 98>}, {transform_indices = @transform_1, window_bounds = array<i64: 1, 2, 22, 22>}, {transform_indices = @transform_2, window_bounds = array<i64: 1, 16, 16>}]} {
    %cst = arith.constant 0.000000e+00 : f32
    %0 = vector.broadcast %cst : f32 to vector<16x16xf32>
    %c0 = arith.constant 0 : index
    %1 = memref.load %arg1[%c0] : memref<98xf32, #tpu.memory_space<smem>>
    %c0_0 = arith.constant 0 : index
    %c0_1 = arith.constant 0 : index
    %c0_2 = arith.constant 0 : index
    %c0_3 = arith.constant 0 : index
    %2 = vector.load %arg2[%c0_0, %c0_1, %c0_2, %c0_3] : memref<1x2x22x22xf32, #tpu.memory_space<vmem>>, vector<1x1x16x16xf32>
    %3 = vector.shape_cast %2 : vector<1x1x16x16xf32> to vector<16x16xf32>
    %4 = vector.broadcast %1 : f32 to vector<16x16xf32>
    %5 = arith.mulf %4, %3 : vector<16x16xf32>
    %6 = arith.addf %0, %5 : vector<16x16xf32>
    %c1 = arith.constant 1 : index
    %7 = memref.load %arg1[%c1] : memref<98xf32, #tpu.memory_space<smem>>
    %c0_4 = arith.constant 0 : index
    %c0_5 = arith.constant 0 : index
    %c0_6 = arith.constant 0 : index
    %c1_7 = arith.constant 1 : index
    %8 = vector.load %arg2[%c0_4, %c0_5, %c0_6, %c1_7] : memref<1x2x22x22xf32, #tpu.memory_space<vmem>>, vector<1x1x16x16xf32>
    %9 = vector.shape_cast %8 : vector<1x1x16x16xf32> to vector<16x16xf32>
    %10 = vector.broadcast %7 : f32 to vector<16x16xf32>
    %11 = arith.mulf %10, %9 : vector<16x16xf32>
    %12 = arith.addf %6, %11 : vector<16x16xf32>
    %c2 = arith.constant 2 : index
    %13 = memref.load %arg1[%c2] : memref<98xf32, #tpu.memory_space<smem>>
    %c0_8 = arith.constant 0 : index
    %c0_9 = arith.constant 0 : index
    %c0_10 = arith.constant 0 : index
    %c2_11 = arith.constant 2 : index
    %14 = vector.load %arg2[%c0_8, %c0_9, %c0_10, %c2_11] : memref<1x2x22x22xf32, #tpu.memory_space<vmem>>, vector<1x1x16x16xf32>
    %15 = vector.shape_cast %14 : vector<1x1x16x16xf32> to vector<16x16xf32>
    %16 = vector.broadcast %13 : f32 to vector<16x16xf32>
    %17 = arith.mulf %16, %15 : vector<16x16xf32>
    %18 = arith.addf %12, %17 : vector<16x16xf32>
    %c3 = arith.constant 3 : index
    %19 = memref.load %arg1[%c3] : memref<98xf32, #tpu.memory_space<smem>>
    %c0_12 = arith.constant 0 : index
    %c0_13 = arith.constant 0 : index
    %c0_14 = arith.constant 0 : index
    %c3_15 = arith.constant 3 : index
    %20 = vector.load %arg2[%c0_12, %c0_13, %c0_14, %c3_15] : memref<1x2x22x22xf32, #tpu.memory_space<vmem>>, vector<1x1x16x16xf32>
    %21 = vector.shape_cast %20 : vector<1x1x16x16xf32> to vector<16x16xf32>
    %22 = vector.broadcast %19 : f32 to vector<16x16xf32>
    %23 = arith.mulf %22, %21 : vector<16x16xf32>
    %24 = arith.addf %18, %23 : vector<16x16xf32>
    %c4 = arith.constant 4 : index
    %25 = memref.load %arg1[%c4] : memref<98xf32, #tpu.memory_space<smem>>
    %c0_16 = arith.constant 0 : index
    %c0_17 = arith.constant 0 : index
    %c0_18 = arith.constant 0 : index
    %c4_19 = arith.constant 4 : index
    %26 = vector.load %arg2[%c0_16, %c0_17, %c0_18, %c4_19] : memref<1x2x22x22xf32, #tpu.memory_space<vmem>>, vector<1x1x16x16xf32>
    %27 = vector.shape_cast %26 : vector<1x1x16x16xf32> to vector<16x16xf32>
    %28 = vector.broadcast %25 : f32 to vector<16x16xf32>
    %29 = arith.mulf %28, %27 : vector<16x16xf32>
    %30 = arith.addf %24, %29 : vector<16x16xf32>
    %c5 = arith.constant 5 : index
    %31 = memref.load %arg1[%c5] : memref<98xf32, #tpu.memory_space<smem>>
    %c0_20 = arith.constant 0 : index
    %c0_21 = arith.constant 0 : index
    %c0_22 = arith.constant 0 : index
    %c5_23 = arith.constant 5 : index
    %32 = vector.load %arg2[%c0_20, %c0_21, %c0_22, %c5_23] : memref<1x2x22x22xf32, #tpu.memory_space<vmem>>, vector<1x1x16x16xf32>
    %33 = vector.shape_cast %32 : vector<1x1x16x16xf32> to vector<16x16xf32>
    %34 = vector.broadcast %31 : f32 to vector<16x16xf32>
    %35 = arith.mulf %34, %33 : vector<16x16xf32>
    %36 = arith.addf %30, %35 : vector<16x16xf32>
    %c6 = arith.constant 6 : index
    %37 = memref.load %arg1[%c6] : memref<98xf32, #tpu.memory_space<smem>>
    %c0_24 = arith.constant 0 : index
    %c0_25 = arith.constant 0 : index
    %c0_26 = arith.constant 0 : index
    %c6_27 = arith.constant 6 : index
    %38 = vector.load %arg2[%c0_24, %c0_25, %c0_26, %c6_27] : memref<1x2x22x22xf32, #tpu.memory_space<vmem>>, vector<1x1x16x16xf32>
    %39 = vector.shape_cast %38 : vector<1x1x16x16xf32> to vector<16x16xf32>
    %40 = vector.broadcast %37 : f32 to vector<16x16xf32>
    %41 = arith.mulf %40, %39 : vector<16x16xf32>
    %42 = arith.addf %36, %41 : vector<16x16xf32>
    %c7 = arith.constant 7 : index
    %43 = memref.load %arg1[%c7] : memref<98xf32, #tpu.memory_space<smem>>
    %c0_28 = arith.constant 0 : index
    %c0_29 = arith.constant 0 : index
    %c1_30 = arith.constant 1 : index
    %c0_31 = arith.constant 0 : index
    %44 = vector.load %arg2[%c0_28, %c0_29, %c1_30, %c0_31] : memref<1x2x22x22xf32, #tpu.memory_space<vmem>>, vector<1x1x16x16xf32>
    %45 = vector.shape_cast %44 : vector<1x1x16x16xf32> to vector<16x16xf32>
    %46 = vector.broadcast %43 : f32 to vector<16x16xf32>
    %47 = arith.mulf %46, %45 : vector<16x16xf32>
    %48 = arith.addf %42, %47 : vector<16x16xf32>
    %c8 = arith.constant 8 : index
    %49 = memref.load %arg1[%c8] : memref<98xf32, #tpu.memory_space<smem>>
    %c0_32 = arith.constant 0 : index
    %c0_33 = arith.constant 0 : index
    %c1_34 = arith.constant 1 : index
    %c1_35 = arith.constant 1 : index
    %50 = vector.load %arg2[%c0_32, %c0_33, %c1_34, %c1_35] : memref<1x2x22x22xf32, #tpu.memory_space<vmem>>, vector<1x1x16x16xf32>
    %51 = vector.shape_cast %50 : vector<1x1x16x16xf32> to vector<16x16xf32>
    %52 = vector.broadcast %49 : f32 to vector<16x16xf32>
    %53 = arith.mulf %52, %51 : vector<16x16xf32>
    %54 = arith.addf %48, %53 : vector<16x16xf32>
    %c9 = arith.constant 9 : index
    %55 = memref.load %arg1[%c9] : memref<98xf32, #tpu.memory_space<smem>>
    %c0_36 = arith.constant 0 : index
    %c0_37 = arith.constant 0 : index
    %c1_38 = arith.constant 1 : index
    %c2_39 = arith.constant 2 : index
    %56 = vector.load %arg2[%c0_36, %c0_37, %c1_38, %c2_39] : memref<1x2x22x22xf32, #tpu.memory_space<vmem>>, vector<1x1x16x16xf32>
    %57 = vector.shape_cast %56 : vector<1x1x16x16xf32> to vector<16x16xf32>
    %58 = vector.broadcast %55 : f32 to vector<16x16xf32>
    %59 = arith.mulf %58, %57 : vector<16x16xf32>
    %60 = arith.addf %54, %59 : vector<16x16xf32>
    %c10 = arith.constant 10 : index
    %61 = memref.load %arg1[%c10] : memref<98xf32, #tpu.memory_space<smem>>
    %c0_40 = arith.constant 0 : index
    %c0_41 = arith.constant 0 : index
    %c1_42 = arith.constant 1 : index
    %c3_43 = arith.constant 3 : index
    %62 = vector.load %arg2[%c0_40, %c0_41, %c1_42, %c3_43] : memref<1x2x22x22xf32, #tpu.memory_space<vmem>>, vector<1x1x16x16xf32>
    %63 = vector.shape_cast %62 : vector<1x1x16x16xf32> to vector<16x16xf32>
    %64 = vector.broadcast %61 : f32 to vector<16x16xf32>
    %65 = arith.mulf %64, %63 : vector<16x16xf32>
    %66 = arith.addf %60, %65 : vector<16x16xf32>
    %c11 = arith.constant 11 : index
    %67 = memref.load %arg1[%c11] : memref<98xf32, #tpu.memory_space<smem>>
    %c0_44 = arith.constant 0 : index
    %c0_45 = arith.constant 0 : index
    %c1_46 = arith.constant 1 : index
    %c4_47 = arith.constant 4 : index
    %68 = vector.load %arg2[%c0_44, %c0_45, %c1_46, %c4_47] : memref<1x2x22x22xf32, #tpu.memory_space<vmem>>, vector<1x1x16x16xf32>
    %69 = vector.shape_cast %68 : vector<1x1x16x16xf32> to vector<16x16xf32>
    %70 = vector.broadcast %67 : f32 to vector<16x16xf32>
    %71 = arith.mulf %70, %69 : vector<16x16xf32>
    %72 = arith.addf %66, %71 : vector<16x16xf32>
    %c12 = arith.constant 12 : index
    %73 = memref.load %arg1[%c12] : memref<98xf32, #tpu.memory_space<smem>>
    %c0_48 = arith.constant 0 : index
    %c0_49 = arith.constant 0 : index
    %c1_50 = arith.constant 1 : index
    %c5_51 = arith.constant 5 : index
    %74 = vector.load %arg2[%c0_48, %c0_49, %c1_50, %c5_51] : memref<1x2x22x22xf32, #tpu.memory_space<vmem>>, vector<1x1x16x16xf32>
    %75 = vector.shape_cast %74 : vector<1x1x16x16xf32> to vector<16x16xf32>
    %76 = vector.broadcast %73 : f32 to vector<16x16xf32>
    %77 = arith.mulf %76, %75 : vector<16x16xf32>
    %78 = arith.addf %72, %77 : vector<16x16xf32>
    %c13 = arith.constant 13 : index
    %79 = memref.load %arg1[%c13] : memref<98xf32, #tpu.memory_space<smem>>
    %c0_52 = arith.constant 0 : index
    %c0_53 = arith.constant 0 : index
    %c1_54 = arith.constant 1 : index
    %c6_55 = arith.constant 6 : index
    %80 = vector.load %arg2[%c0_52, %c0_53, %c1_54, %c6_55] : memref<1x2x22x22xf32, #tpu.memory_space<vmem>>, vector<1x1x16x16xf32>
    %81 = vector.shape_cast %80 : vector<1x1x16x16xf32> to vector<16x16xf32>
    %82 = vector.broadcast %79 : f32 to vector<16x16xf32>
    %83 = arith.mulf %82, %81 : vector<16x16xf32>
    %84 = arith.addf %78, %83 : vector<16x16xf32>
    %c14 = arith.constant 14 : index
    %85 = memref.load %arg1[%c14] : memref<98xf32, #tpu.memory_space<smem>>
    %c0_56 = arith.constant 0 : index
    %c0_57 = arith.constant 0 : index
    %c2_58 = arith.constant 2 : index
    %c0_59 = arith.constant 0 : index
    %86 = vector.load %arg2[%c0_56, %c0_57, %c2_58, %c0_59] : memref<1x2x22x22xf32, #tpu.memory_space<vmem>>, vector<1x1x16x16xf32>
    %87 = vector.shape_cast %86 : vector<1x1x16x16xf32> to vector<16x16xf32>
    %88 = vector.broadcast %85 : f32 to vector<16x16xf32>
    %89 = arith.mulf %88, %87 : vector<16x16xf32>
    %90 = arith.addf %84, %89 : vector<16x16xf32>
    %c15 = arith.constant 15 : index
    %91 = memref.load %arg1[%c15] : memref<98xf32, #tpu.memory_space<smem>>
    %c0_60 = arith.constant 0 : index
    %c0_61 = arith.constant 0 : index
    %c2_62 = arith.constant 2 : index
    %c1_63 = arith.constant 1 : index
    %92 = vector.load %arg2[%c0_60, %c0_61, %c2_62, %c1_63] : memref<1x2x22x22xf32, #tpu.memory_space<vmem>>, vector<1x1x16x16xf32>
    %93 = vector.shape_cast %92 : vector<1x1x16x16xf32> to vector<16x16xf32>
    %94 = vector.broadcast %91 : f32 to vector<16x16xf32>
    %95 = arith.mulf %94, %93 : vector<16x16xf32>
    %96 = arith.addf %90, %95 : vector<16x16xf32>
    %c16 = arith.constant 16 : index
    %97 = memref.load %arg1[%c16] : memref<98xf32, #tpu.memory_space<smem>>
    %c0_64 = arith.constant 0 : index
    %c0_65 = arith.constant 0 : index
    %c2_66 = arith.constant 2 : index
    %c2_67 = arith.constant 2 : index
    %98 = vector.load %arg2[%c0_64, %c0_65, %c2_66, %c2_67] : memref<1x2x22x22xf32, #tpu.memory_space<vmem>>, vector<1x1x16x16xf32>
    %99 = vector.shape_cast %98 : vector<1x1x16x16xf32> to vector<16x16xf32>
    %100 = vector.broadcast %97 : f32 to vector<16x16xf32>
    %101 = arith.mulf %100, %99 : vector<16x16xf32>
    %102 = arith.addf %96, %101 : vector<16x16xf32>
    %c17 = arith.constant 17 : index
    %103 = memref.load %arg1[%c17] : memref<98xf32, #tpu.memory_space<smem>>
    %c0_68 = arith.constant 0 : index
    %c0_69 = arith.constant 0 : index
    %c2_70 = arith.constant 2 : index
    %c3_71 = arith.constant 3 : index
    %104 = vector.load %arg2[%c0_68, %c0_69, %c2_70, %c3_71] : memref<1x2x22x22xf32, #tpu.memory_space<vmem>>, vector<1x1x16x16xf32>
    %105 = vector.shape_cast %104 : vector<1x1x16x16xf32> to vector<16x16xf32>
    %106 = vector.broadcast %103 : f32 to vector<16x16xf32>
    %107 = arith.mulf %106, %105 : vector<16x16xf32>
    %108 = arith.addf %102, %107 : vector<16x16xf32>
    %c18 = arith.constant 18 : index
    %109 = memref.load %arg1[%c18] : memref<98xf32, #tpu.memory_space<smem>>
    %c0_72 = arith.constant 0 : index
    %c0_73 = arith.constant 0 : index
    %c2_74 = arith.constant 2 : index
    %c4_75 = arith.constant 4 : index
    %110 = vector.load %arg2[%c0_72, %c0_73, %c2_74, %c4_75] : memref<1x2x22x22xf32, #tpu.memory_space<vmem>>, vector<1x1x16x16xf32>
    %111 = vector.shape_cast %110 : vector<1x1x16x16xf32> to vector<16x16xf32>
    %112 = vector.broadcast %109 : f32 to vector<16x16xf32>
    %113 = arith.mulf %112, %111 : vector<16x16xf32>
    %114 = arith.addf %108, %113 : vector<16x16xf32>
    %c19 = arith.constant 19 : index
    %115 = memref.load %arg1[%c19] : memref<98xf32, #tpu.memory_space<smem>>
    %c0_76 = arith.constant 0 : index
    %c0_77 = arith.constant 0 : index
    %c2_78 = arith.constant 2 : index
    %c5_79 = arith.constant 5 : index
    %116 = vector.load %arg2[%c0_76, %c0_77, %c2_78, %c5_79] : memref<1x2x22x22xf32, #tpu.memory_space<vmem>>, vector<1x1x16x16xf32>
    %117 = vector.shape_cast %116 : vector<1x1x16x16xf32> to vector<16x16xf32>
    %118 = vector.broadcast %115 : f32 to vector<16x16xf32>
    %119 = arith.mulf %118, %117 : vector<16x16xf32>
    %120 = arith.addf %114, %119 : vector<16x16xf32>
    %c20 = arith.constant 20 : index
    %121 = memref.load %arg1[%c20] : memref<98xf32, #tpu.memory_space<smem>>
    %c0_80 = arith.constant 0 : index
    %c0_81 = arith.constant 0 : index
    %c2_82 = arith.constant 2 : index
    %c6_83 = arith.constant 6 : index
    %122 = vector.load %arg2[%c0_80, %c0_81, %c2_82, %c6_83] : memref<1x2x22x22xf32, #tpu.memory_space<vmem>>, vector<1x1x16x16xf32>
    %123 = vector.shape_cast %122 : vector<1x1x16x16xf32> to vector<16x16xf32>
    %124 = vector.broadcast %121 : f32 to vector<16x16xf32>
    %125 = arith.mulf %124, %123 : vector<16x16xf32>
    %126 = arith.addf %120, %125 : vector<16x16xf32>
    %c21 = arith.constant 21 : index
    %127 = memref.load %arg1[%c21] : memref<98xf32, #tpu.memory_space<smem>>
    %c0_84 = arith.constant 0 : index
    %c0_85 = arith.constant 0 : index
    %c3_86 = arith.constant 3 : index
    %c0_87 = arith.constant 0 : index
    %128 = vector.load %arg2[%c0_84, %c0_85, %c3_86, %c0_87] : memref<1x2x22x22xf32, #tpu.memory_space<vmem>>, vector<1x1x16x16xf32>
    %129 = vector.shape_cast %128 : vector<1x1x16x16xf32> to vector<16x16xf32>
    %130 = vector.broadcast %127 : f32 to vector<16x16xf32>
    %131 = arith.mulf %130, %129 : vector<16x16xf32>
    %132 = arith.addf %126, %131 : vector<16x16xf32>
    %c22 = arith.constant 22 : index
    %133 = memref.load %arg1[%c22] : memref<98xf32, #tpu.memory_space<smem>>
    %c0_88 = arith.constant 0 : index
    %c0_89 = arith.constant 0 : index
    %c3_90 = arith.constant 3 : index
    %c1_91 = arith.constant 1 : index
    %134 = vector.load %arg2[%c0_88, %c0_89, %c3_90, %c1_91] : memref<1x2x22x22xf32, #tpu.memory_space<vmem>>, vector<1x1x16x16xf32>
    %135 = vector.shape_cast %134 : vector<1x1x16x16xf32> to vector<16x16xf32>
    %136 = vector.broadcast %133 : f32 to vector<16x16xf32>
    %137 = arith.mulf %136, %135 : vector<16x16xf32>
    %138 = arith.addf %132, %137 : vector<16x16xf32>
    %c23 = arith.constant 23 : index
    %139 = memref.load %arg1[%c23] : memref<98xf32, #tpu.memory_space<smem>>
    %c0_92 = arith.constant 0 : index
    %c0_93 = arith.constant 0 : index
    %c3_94 = arith.constant 3 : index
    %c2_95 = arith.constant 2 : index
    %140 = vector.load %arg2[%c0_92, %c0_93, %c3_94, %c2_95] : memref<1x2x22x22xf32, #tpu.memory_space<vmem>>, vector<1x1x16x16xf32>
    %141 = vector.shape_cast %140 : vector<1x1x16x16xf32> to vector<16x16xf32>
    %142 = vector.broadcast %139 : f32 to vector<16x16xf32>
    %143 = arith.mulf %142, %141 : vector<16x16xf32>
    %144 = arith.addf %138, %143 : vector<16x16xf32>
    %c24 = arith.constant 24 : index
    %145 = memref.load %arg1[%c24] : memref<98xf32, #tpu.memory_space<smem>>
    %c0_96 = arith.constant 0 : index
    %c0_97 = arith.constant 0 : index
    %c3_98 = arith.constant 3 : index
    %c3_99 = arith.constant 3 : index
    %146 = vector.load %arg2[%c0_96, %c0_97, %c3_98, %c3_99] : memref<1x2x22x22xf32, #tpu.memory_space<vmem>>, vector<1x1x16x16xf32>
    %147 = vector.shape_cast %146 : vector<1x1x16x16xf32> to vector<16x16xf32>
    %148 = vector.broadcast %145 : f32 to vector<16x16xf32>
    %149 = arith.mulf %148, %147 : vector<16x16xf32>
    %150 = arith.addf %144, %149 : vector<16x16xf32>
    %c25 = arith.constant 25 : index
    %151 = memref.load %arg1[%c25] : memref<98xf32, #tpu.memory_space<smem>>
    %c0_100 = arith.constant 0 : index
    %c0_101 = arith.constant 0 : index
    %c3_102 = arith.constant 3 : index
    %c4_103 = arith.constant 4 : index
    %152 = vector.load %arg2[%c0_100, %c0_101, %c3_102, %c4_103] : memref<1x2x22x22xf32, #tpu.memory_space<vmem>>, vector<1x1x16x16xf32>
    %153 = vector.shape_cast %152 : vector<1x1x16x16xf32> to vector<16x16xf32>
    %154 = vector.broadcast %151 : f32 to vector<16x16xf32>
    %155 = arith.mulf %154, %153 : vector<16x16xf32>
    %156 = arith.addf %150, %155 : vector<16x16xf32>
    %c26 = arith.constant 26 : index
    %157 = memref.load %arg1[%c26] : memref<98xf32, #tpu.memory_space<smem>>
    %c0_104 = arith.constant 0 : index
    %c0_105 = arith.constant 0 : index
    %c3_106 = arith.constant 3 : index
    %c5_107 = arith.constant 5 : index
    %158 = vector.load %arg2[%c0_104, %c0_105, %c3_106, %c5_107] : memref<1x2x22x22xf32, #tpu.memory_space<vmem>>, vector<1x1x16x16xf32>
    %159 = vector.shape_cast %158 : vector<1x1x16x16xf32> to vector<16x16xf32>
    %160 = vector.broadcast %157 : f32 to vector<16x16xf32>
    %161 = arith.mulf %160, %159 : vector<16x16xf32>
    %162 = arith.addf %156, %161 : vector<16x16xf32>
    %c27 = arith.constant 27 : index
    %163 = memref.load %arg1[%c27] : memref<98xf32, #tpu.memory_space<smem>>
    %c0_108 = arith.constant 0 : index
    %c0_109 = arith.constant 0 : index
    %c3_110 = arith.constant 3 : index
    %c6_111 = arith.constant 6 : index
    %164 = vector.load %arg2[%c0_108, %c0_109, %c3_110, %c6_111] : memref<1x2x22x22xf32, #tpu.memory_space<vmem>>, vector<1x1x16x16xf32>
    %165 = vector.shape_cast %164 : vector<1x1x16x16xf32> to vector<16x16xf32>
    %166 = vector.broadcast %163 : f32 to vector<16x16xf32>
    %167 = arith.mulf %166, %165 : vector<16x16xf32>
    %168 = arith.addf %162, %167 : vector<16x16xf32>
    %c28 = arith.constant 28 : index
    %169 = memref.load %arg1[%c28] : memref<98xf32, #tpu.memory_space<smem>>
    %c0_112 = arith.constant 0 : index
    %c0_113 = arith.constant 0 : index
    %c4_114 = arith.constant 4 : index
    %c0_115 = arith.constant 0 : index
    %170 = vector.load %arg2[%c0_112, %c0_113, %c4_114, %c0_115] : memref<1x2x22x22xf32, #tpu.memory_space<vmem>>, vector<1x1x16x16xf32>
    %171 = vector.shape_cast %170 : vector<1x1x16x16xf32> to vector<16x16xf32>
    %172 = vector.broadcast %169 : f32 to vector<16x16xf32>
    %173 = arith.mulf %172, %171 : vector<16x16xf32>
    %174 = arith.addf %168, %173 : vector<16x16xf32>
    %c29 = arith.constant 29 : index
    %175 = memref.load %arg1[%c29] : memref<98xf32, #tpu.memory_space<smem>>
    %c0_116 = arith.constant 0 : index
    %c0_117 = arith.constant 0 : index
    %c4_118 = arith.constant 4 : index
    %c1_119 = arith.constant 1 : index
    %176 = vector.load %arg2[%c0_116, %c0_117, %c4_118, %c1_119] : memref<1x2x22x22xf32, #tpu.memory_space<vmem>>, vector<1x1x16x16xf32>
    %177 = vector.shape_cast %176 : vector<1x1x16x16xf32> to vector<16x16xf32>
    %178 = vector.broadcast %175 : f32 to vector<16x16xf32>
    %179 = arith.mulf %178, %177 : vector<16x16xf32>
    %180 = arith.addf %174, %179 : vector<16x16xf32>
    %c30 = arith.constant 30 : index
    %181 = memref.load %arg1[%c30] : memref<98xf32, #tpu.memory_space<smem>>
    %c0_120 = arith.constant 0 : index
    %c0_121 = arith.constant 0 : index
    %c4_122 = arith.constant 4 : index
    %c2_123 = arith.constant 2 : index
    %182 = vector.load %arg2[%c0_120, %c0_121, %c4_122, %c2_123] : memref<1x2x22x22xf32, #tpu.memory_space<vmem>>, vector<1x1x16x16xf32>
    %183 = vector.shape_cast %182 : vector<1x1x16x16xf32> to vector<16x16xf32>
    %184 = vector.broadcast %181 : f32 to vector<16x16xf32>
    %185 = arith.mulf %184, %183 : vector<16x16xf32>
    %186 = arith.addf %180, %185 : vector<16x16xf32>
    %c31 = arith.constant 31 : index
    %187 = memref.load %arg1[%c31] : memref<98xf32, #tpu.memory_space<smem>>
    %c0_124 = arith.constant 0 : index
    %c0_125 = arith.constant 0 : index
    %c4_126 = arith.constant 4 : index
    %c3_127 = arith.constant 3 : index
    %188 = vector.load %arg2[%c0_124, %c0_125, %c4_126, %c3_127] : memref<1x2x22x22xf32, #tpu.memory_space<vmem>>, vector<1x1x16x16xf32>
    %189 = vector.shape_cast %188 : vector<1x1x16x16xf32> to vector<16x16xf32>
    %190 = vector.broadcast %187 : f32 to vector<16x16xf32>
    %191 = arith.mulf %190, %189 : vector<16x16xf32>
    %192 = arith.addf %186, %191 : vector<16x16xf32>
    %c32 = arith.constant 32 : index
    %193 = memref.load %arg1[%c32] : memref<98xf32, #tpu.memory_space<smem>>
    %c0_128 = arith.constant 0 : index
    %c0_129 = arith.constant 0 : index
    %c4_130 = arith.constant 4 : index
    %c4_131 = arith.constant 4 : index
    %194 = vector.load %arg2[%c0_128, %c0_129, %c4_130, %c4_131] : memref<1x2x22x22xf32, #tpu.memory_space<vmem>>, vector<1x1x16x16xf32>
    %195 = vector.shape_cast %194 : vector<1x1x16x16xf32> to vector<16x16xf32>
    %196 = vector.broadcast %193 : f32 to vector<16x16xf32>
    %197 = arith.mulf %196, %195 : vector<16x16xf32>
    %198 = arith.addf %192, %197 : vector<16x16xf32>
    %c33 = arith.constant 33 : index
    %199 = memref.load %arg1[%c33] : memref<98xf32, #tpu.memory_space<smem>>
    %c0_132 = arith.constant 0 : index
    %c0_133 = arith.constant 0 : index
    %c4_134 = arith.constant 4 : index
    %c5_135 = arith.constant 5 : index
    %200 = vector.load %arg2[%c0_132, %c0_133, %c4_134, %c5_135] : memref<1x2x22x22xf32, #tpu.memory_space<vmem>>, vector<1x1x16x16xf32>
    %201 = vector.shape_cast %200 : vector<1x1x16x16xf32> to vector<16x16xf32>
    %202 = vector.broadcast %199 : f32 to vector<16x16xf32>
    %203 = arith.mulf %202, %201 : vector<16x16xf32>
    %204 = arith.addf %198, %203 : vector<16x16xf32>
    %c34 = arith.constant 34 : index
    %205 = memref.load %arg1[%c34] : memref<98xf32, #tpu.memory_space<smem>>
    %c0_136 = arith.constant 0 : index
    %c0_137 = arith.constant 0 : index
    %c4_138 = arith.constant 4 : index
    %c6_139 = arith.constant 6 : index
    %206 = vector.load %arg2[%c0_136, %c0_137, %c4_138, %c6_139] : memref<1x2x22x22xf32, #tpu.memory_space<vmem>>, vector<1x1x16x16xf32>
    %207 = vector.shape_cast %206 : vector<1x1x16x16xf32> to vector<16x16xf32>
    %208 = vector.broadcast %205 : f32 to vector<16x16xf32>
    %209 = arith.mulf %208, %207 : vector<16x16xf32>
    %210 = arith.addf %204, %209 : vector<16x16xf32>
    %c35 = arith.constant 35 : index
    %211 = memref.load %arg1[%c35] : memref<98xf32, #tpu.memory_space<smem>>
    %c0_140 = arith.constant 0 : index
    %c0_141 = arith.constant 0 : index
    %c5_142 = arith.constant 5 : index
    %c0_143 = arith.constant 0 : index
    %212 = vector.load %arg2[%c0_140, %c0_141, %c5_142, %c0_143] : memref<1x2x22x22xf32, #tpu.memory_space<vmem>>, vector<1x1x16x16xf32>
    %213 = vector.shape_cast %212 : vector<1x1x16x16xf32> to vector<16x16xf32>
    %214 = vector.broadcast %211 : f32 to vector<16x16xf32>
    %215 = arith.mulf %214, %213 : vector<16x16xf32>
    %216 = arith.addf %210, %215 : vector<16x16xf32>
    %c36 = arith.constant 36 : index
    %217 = memref.load %arg1[%c36] : memref<98xf32, #tpu.memory_space<smem>>
    %c0_144 = arith.constant 0 : index
    %c0_145 = arith.constant 0 : index
    %c5_146 = arith.constant 5 : index
    %c1_147 = arith.constant 1 : index
    %218 = vector.load %arg2[%c0_144, %c0_145, %c5_146, %c1_147] : memref<1x2x22x22xf32, #tpu.memory_space<vmem>>, vector<1x1x16x16xf32>
    %219 = vector.shape_cast %218 : vector<1x1x16x16xf32> to vector<16x16xf32>
    %220 = vector.broadcast %217 : f32 to vector<16x16xf32>
    %221 = arith.mulf %220, %219 : vector<16x16xf32>
    %222 = arith.addf %216, %221 : vector<16x16xf32>
    %c37 = arith.constant 37 : index
    %223 = memref.load %arg1[%c37] : memref<98xf32, #tpu.memory_space<smem>>
    %c0_148 = arith.constant 0 : index
    %c0_149 = arith.constant 0 : index
    %c5_150 = arith.constant 5 : index
    %c2_151 = arith.constant 2 : index
    %224 = vector.load %arg2[%c0_148, %c0_149, %c5_150, %c2_151] : memref<1x2x22x22xf32, #tpu.memory_space<vmem>>, vector<1x1x16x16xf32>
    %225 = vector.shape_cast %224 : vector<1x1x16x16xf32> to vector<16x16xf32>
    %226 = vector.broadcast %223 : f32 to vector<16x16xf32>
    %227 = arith.mulf %226, %225 : vector<16x16xf32>
    %228 = arith.addf %222, %227 : vector<16x16xf32>
    %c38 = arith.constant 38 : index
    %229 = memref.load %arg1[%c38] : memref<98xf32, #tpu.memory_space<smem>>
    %c0_152 = arith.constant 0 : index
    %c0_153 = arith.constant 0 : index
    %c5_154 = arith.constant 5 : index
    %c3_155 = arith.constant 3 : index
    %230 = vector.load %arg2[%c0_152, %c0_153, %c5_154, %c3_155] : memref<1x2x22x22xf32, #tpu.memory_space<vmem>>, vector<1x1x16x16xf32>
    %231 = vector.shape_cast %230 : vector<1x1x16x16xf32> to vector<16x16xf32>
    %232 = vector.broadcast %229 : f32 to vector<16x16xf32>
    %233 = arith.mulf %232, %231 : vector<16x16xf32>
    %234 = arith.addf %228, %233 : vector<16x16xf32>
    %c39 = arith.constant 39 : index
    %235 = memref.load %arg1[%c39] : memref<98xf32, #tpu.memory_space<smem>>
    %c0_156 = arith.constant 0 : index
    %c0_157 = arith.constant 0 : index
    %c5_158 = arith.constant 5 : index
    %c4_159 = arith.constant 4 : index
    %236 = vector.load %arg2[%c0_156, %c0_157, %c5_158, %c4_159] : memref<1x2x22x22xf32, #tpu.memory_space<vmem>>, vector<1x1x16x16xf32>
    %237 = vector.shape_cast %236 : vector<1x1x16x16xf32> to vector<16x16xf32>
    %238 = vector.broadcast %235 : f32 to vector<16x16xf32>
    %239 = arith.mulf %238, %237 : vector<16x16xf32>
    %240 = arith.addf %234, %239 : vector<16x16xf32>
    %c40 = arith.constant 40 : index
    %241 = memref.load %arg1[%c40] : memref<98xf32, #tpu.memory_space<smem>>
    %c0_160 = arith.constant 0 : index
    %c0_161 = arith.constant 0 : index
    %c5_162 = arith.constant 5 : index
    %c5_163 = arith.constant 5 : index
    %242 = vector.load %arg2[%c0_160, %c0_161, %c5_162, %c5_163] : memref<1x2x22x22xf32, #tpu.memory_space<vmem>>, vector<1x1x16x16xf32>
    %243 = vector.shape_cast %242 : vector<1x1x16x16xf32> to vector<16x16xf32>
    %244 = vector.broadcast %241 : f32 to vector<16x16xf32>
    %245 = arith.mulf %244, %243 : vector<16x16xf32>
    %246 = arith.addf %240, %245 : vector<16x16xf32>
    %c41 = arith.constant 41 : index
    %247 = memref.load %arg1[%c41] : memref<98xf32, #tpu.memory_space<smem>>
    %c0_164 = arith.constant 0 : index
    %c0_165 = arith.constant 0 : index
    %c5_166 = arith.constant 5 : index
    %c6_167 = arith.constant 6 : index
    %248 = vector.load %arg2[%c0_164, %c0_165, %c5_166, %c6_167] : memref<1x2x22x22xf32, #tpu.memory_space<vmem>>, vector<1x1x16x16xf32>
    %249 = vector.shape_cast %248 : vector<1x1x16x16xf32> to vector<16x16xf32>
    %250 = vector.broadcast %247 : f32 to vector<16x16xf32>
    %251 = arith.mulf %250, %249 : vector<16x16xf32>
    %252 = arith.addf %246, %251 : vector<16x16xf32>
    %c42 = arith.constant 42 : index
    %253 = memref.load %arg1[%c42] : memref<98xf32, #tpu.memory_space<smem>>
    %c0_168 = arith.constant 0 : index
    %c0_169 = arith.constant 0 : index
    %c6_170 = arith.constant 6 : index
    %c0_171 = arith.constant 0 : index
    %254 = vector.load %arg2[%c0_168, %c0_169, %c6_170, %c0_171] : memref<1x2x22x22xf32, #tpu.memory_space<vmem>>, vector<1x1x16x16xf32>
    %255 = vector.shape_cast %254 : vector<1x1x16x16xf32> to vector<16x16xf32>
    %256 = vector.broadcast %253 : f32 to vector<16x16xf32>
    %257 = arith.mulf %256, %255 : vector<16x16xf32>
    %258 = arith.addf %252, %257 : vector<16x16xf32>
    %c43 = arith.constant 43 : index
    %259 = memref.load %arg1[%c43] : memref<98xf32, #tpu.memory_space<smem>>
    %c0_172 = arith.constant 0 : index
    %c0_173 = arith.constant 0 : index
    %c6_174 = arith.constant 6 : index
    %c1_175 = arith.constant 1 : index
    %260 = vector.load %arg2[%c0_172, %c0_173, %c6_174, %c1_175] : memref<1x2x22x22xf32, #tpu.memory_space<vmem>>, vector<1x1x16x16xf32>
    %261 = vector.shape_cast %260 : vector<1x1x16x16xf32> to vector<16x16xf32>
    %262 = vector.broadcast %259 : f32 to vector<16x16xf32>
    %263 = arith.mulf %262, %261 : vector<16x16xf32>
    %264 = arith.addf %258, %263 : vector<16x16xf32>
    %c44 = arith.constant 44 : index
    %265 = memref.load %arg1[%c44] : memref<98xf32, #tpu.memory_space<smem>>
    %c0_176 = arith.constant 0 : index
    %c0_177 = arith.constant 0 : index
    %c6_178 = arith.constant 6 : index
    %c2_179 = arith.constant 2 : index
    %266 = vector.load %arg2[%c0_176, %c0_177, %c6_178, %c2_179] : memref<1x2x22x22xf32, #tpu.memory_space<vmem>>, vector<1x1x16x16xf32>
    %267 = vector.shape_cast %266 : vector<1x1x16x16xf32> to vector<16x16xf32>
    %268 = vector.broadcast %265 : f32 to vector<16x16xf32>
    %269 = arith.mulf %268, %267 : vector<16x16xf32>
    %270 = arith.addf %264, %269 : vector<16x16xf32>
    %c45 = arith.constant 45 : index
    %271 = memref.load %arg1[%c45] : memref<98xf32, #tpu.memory_space<smem>>
    %c0_180 = arith.constant 0 : index
    %c0_181 = arith.constant 0 : index
    %c6_182 = arith.constant 6 : index
    %c3_183 = arith.constant 3 : index
    %272 = vector.load %arg2[%c0_180, %c0_181, %c6_182, %c3_183] : memref<1x2x22x22xf32, #tpu.memory_space<vmem>>, vector<1x1x16x16xf32>
    %273 = vector.shape_cast %272 : vector<1x1x16x16xf32> to vector<16x16xf32>
    %274 = vector.broadcast %271 : f32 to vector<16x16xf32>
    %275 = arith.mulf %274, %273 : vector<16x16xf32>
    %276 = arith.addf %270, %275 : vector<16x16xf32>
    %c46 = arith.constant 46 : index
    %277 = memref.load %arg1[%c46] : memref<98xf32, #tpu.memory_space<smem>>
    %c0_184 = arith.constant 0 : index
    %c0_185 = arith.constant 0 : index
    %c6_186 = arith.constant 6 : index
    %c4_187 = arith.constant 4 : index
    %278 = vector.load %arg2[%c0_184, %c0_185, %c6_186, %c4_187] : memref<1x2x22x22xf32, #tpu.memory_space<vmem>>, vector<1x1x16x16xf32>
    %279 = vector.shape_cast %278 : vector<1x1x16x16xf32> to vector<16x16xf32>
    %280 = vector.broadcast %277 : f32 to vector<16x16xf32>
    %281 = arith.mulf %280, %279 : vector<16x16xf32>
    %282 = arith.addf %276, %281 : vector<16x16xf32>
    %c47 = arith.constant 47 : index
    %283 = memref.load %arg1[%c47] : memref<98xf32, #tpu.memory_space<smem>>
    %c0_188 = arith.constant 0 : index
    %c0_189 = arith.constant 0 : index
    %c6_190 = arith.constant 6 : index
    %c5_191 = arith.constant 5 : index
    %284 = vector.load %arg2[%c0_188, %c0_189, %c6_190, %c5_191] : memref<1x2x22x22xf32, #tpu.memory_space<vmem>>, vector<1x1x16x16xf32>
    %285 = vector.shape_cast %284 : vector<1x1x16x16xf32> to vector<16x16xf32>
    %286 = vector.broadcast %283 : f32 to vector<16x16xf32>
    %287 = arith.mulf %286, %285 : vector<16x16xf32>
    %288 = arith.addf %282, %287 : vector<16x16xf32>
    %c48 = arith.constant 48 : index
    %289 = memref.load %arg1[%c48] : memref<98xf32, #tpu.memory_space<smem>>
    %c0_192 = arith.constant 0 : index
    %c0_193 = arith.constant 0 : index
    %c6_194 = arith.constant 6 : index
    %c6_195 = arith.constant 6 : index
    %290 = vector.load %arg2[%c0_192, %c0_193, %c6_194, %c6_195] : memref<1x2x22x22xf32, #tpu.memory_space<vmem>>, vector<1x1x16x16xf32>
    %291 = vector.shape_cast %290 : vector<1x1x16x16xf32> to vector<16x16xf32>
    %292 = vector.broadcast %289 : f32 to vector<16x16xf32>
    %293 = arith.mulf %292, %291 : vector<16x16xf32>
    %294 = arith.addf %288, %293 : vector<16x16xf32>
    %c49 = arith.constant 49 : index
    %295 = memref.load %arg1[%c49] : memref<98xf32, #tpu.memory_space<smem>>
    %c0_196 = arith.constant 0 : index
    %c1_197 = arith.constant 1 : index
    %c0_198 = arith.constant 0 : index
    %c0_199 = arith.constant 0 : index
    %296 = vector.load %arg2[%c0_196, %c1_197, %c0_198, %c0_199] : memref<1x2x22x22xf32, #tpu.memory_space<vmem>>, vector<1x1x16x16xf32>
    %297 = vector.shape_cast %296 : vector<1x1x16x16xf32> to vector<16x16xf32>
    %298 = vector.broadcast %295 : f32 to vector<16x16xf32>
    %299 = arith.mulf %298, %297 : vector<16x16xf32>
    %300 = arith.addf %294, %299 : vector<16x16xf32>
    %c50 = arith.constant 50 : index
    %301 = memref.load %arg1[%c50] : memref<98xf32, #tpu.memory_space<smem>>
    %c0_200 = arith.constant 0 : index
    %c1_201 = arith.constant 1 : index
    %c0_202 = arith.constant 0 : index
    %c1_203 = arith.constant 1 : index
    %302 = vector.load %arg2[%c0_200, %c1_201, %c0_202, %c1_203] : memref<1x2x22x22xf32, #tpu.memory_space<vmem>>, vector<1x1x16x16xf32>
    %303 = vector.shape_cast %302 : vector<1x1x16x16xf32> to vector<16x16xf32>
    %304 = vector.broadcast %301 : f32 to vector<16x16xf32>
    %305 = arith.mulf %304, %303 : vector<16x16xf32>
    %306 = arith.addf %300, %305 : vector<16x16xf32>
    %c51 = arith.constant 51 : index
    %307 = memref.load %arg1[%c51] : memref<98xf32, #tpu.memory_space<smem>>
    %c0_204 = arith.constant 0 : index
    %c1_205 = arith.constant 1 : index
    %c0_206 = arith.constant 0 : index
    %c2_207 = arith.constant 2 : index
    %308 = vector.load %arg2[%c0_204, %c1_205, %c0_206, %c2_207] : memref<1x2x22x22xf32, #tpu.memory_space<vmem>>, vector<1x1x16x16xf32>
    %309 = vector.shape_cast %308 : vector<1x1x16x16xf32> to vector<16x16xf32>
    %310 = vector.broadcast %307 : f32 to vector<16x16xf32>
    %311 = arith.mulf %310, %309 : vector<16x16xf32>
    %312 = arith.addf %306, %311 : vector<16x16xf32>
    %c52 = arith.constant 52 : index
    %313 = memref.load %arg1[%c52] : memref<98xf32, #tpu.memory_space<smem>>
    %c0_208 = arith.constant 0 : index
    %c1_209 = arith.constant 1 : index
    %c0_210 = arith.constant 0 : index
    %c3_211 = arith.constant 3 : index
    %314 = vector.load %arg2[%c0_208, %c1_209, %c0_210, %c3_211] : memref<1x2x22x22xf32, #tpu.memory_space<vmem>>, vector<1x1x16x16xf32>
    %315 = vector.shape_cast %314 : vector<1x1x16x16xf32> to vector<16x16xf32>
    %316 = vector.broadcast %313 : f32 to vector<16x16xf32>
    %317 = arith.mulf %316, %315 : vector<16x16xf32>
    %318 = arith.addf %312, %317 : vector<16x16xf32>
    %c53 = arith.constant 53 : index
    %319 = memref.load %arg1[%c53] : memref<98xf32, #tpu.memory_space<smem>>
    %c0_212 = arith.constant 0 : index
    %c1_213 = arith.constant 1 : index
    %c0_214 = arith.constant 0 : index
    %c4_215 = arith.constant 4 : index
    %320 = vector.load %arg2[%c0_212, %c1_213, %c0_214, %c4_215] : memref<1x2x22x22xf32, #tpu.memory_space<vmem>>, vector<1x1x16x16xf32>
    %321 = vector.shape_cast %320 : vector<1x1x16x16xf32> to vector<16x16xf32>
    %322 = vector.broadcast %319 : f32 to vector<16x16xf32>
    %323 = arith.mulf %322, %321 : vector<16x16xf32>
    %324 = arith.addf %318, %323 : vector<16x16xf32>
    %c54 = arith.constant 54 : index
    %325 = memref.load %arg1[%c54] : memref<98xf32, #tpu.memory_space<smem>>
    %c0_216 = arith.constant 0 : index
    %c1_217 = arith.constant 1 : index
    %c0_218 = arith.constant 0 : index
    %c5_219 = arith.constant 5 : index
    %326 = vector.load %arg2[%c0_216, %c1_217, %c0_218, %c5_219] : memref<1x2x22x22xf32, #tpu.memory_space<vmem>>, vector<1x1x16x16xf32>
    %327 = vector.shape_cast %326 : vector<1x1x16x16xf32> to vector<16x16xf32>
    %328 = vector.broadcast %325 : f32 to vector<16x16xf32>
    %329 = arith.mulf %328, %327 : vector<16x16xf32>
    %330 = arith.addf %324, %329 : vector<16x16xf32>
    %c55 = arith.constant 55 : index
    %331 = memref.load %arg1[%c55] : memref<98xf32, #tpu.memory_space<smem>>
    %c0_220 = arith.constant 0 : index
    %c1_221 = arith.constant 1 : index
    %c0_222 = arith.constant 0 : index
    %c6_223 = arith.constant 6 : index
    %332 = vector.load %arg2[%c0_220, %c1_221, %c0_222, %c6_223] : memref<1x2x22x22xf32, #tpu.memory_space<vmem>>, vector<1x1x16x16xf32>
    %333 = vector.shape_cast %332 : vector<1x1x16x16xf32> to vector<16x16xf32>
    %334 = vector.broadcast %331 : f32 to vector<16x16xf32>
    %335 = arith.mulf %334, %333 : vector<16x16xf32>
    %336 = arith.addf %330, %335 : vector<16x16xf32>
    %c56 = arith.constant 56 : index
    %337 = memref.load %arg1[%c56] : memref<98xf32, #tpu.memory_space<smem>>
    %c0_224 = arith.constant 0 : index
    %c1_225 = arith.constant 1 : index
    %c1_226 = arith.constant 1 : index
    %c0_227 = arith.constant 0 : index
    %338 = vector.load %arg2[%c0_224, %c1_225, %c1_226, %c0_227] : memref<1x2x22x22xf32, #tpu.memory_space<vmem>>, vector<1x1x16x16xf32>
    %339 = vector.shape_cast %338 : vector<1x1x16x16xf32> to vector<16x16xf32>
    %340 = vector.broadcast %337 : f32 to vector<16x16xf32>
    %341 = arith.mulf %340, %339 : vector<16x16xf32>
    %342 = arith.addf %336, %341 : vector<16x16xf32>
    %c57 = arith.constant 57 : index
    %343 = memref.load %arg1[%c57] : memref<98xf32, #tpu.memory_space<smem>>
    %c0_228 = arith.constant 0 : index
    %c1_229 = arith.constant 1 : index
    %c1_230 = arith.constant 1 : index
    %c1_231 = arith.constant 1 : index
    %344 = vector.load %arg2[%c0_228, %c1_229, %c1_230, %c1_231] : memref<1x2x22x22xf32, #tpu.memory_space<vmem>>, vector<1x1x16x16xf32>
    %345 = vector.shape_cast %344 : vector<1x1x16x16xf32> to vector<16x16xf32>
    %346 = vector.broadcast %343 : f32 to vector<16x16xf32>
    %347 = arith.mulf %346, %345 : vector<16x16xf32>
    %348 = arith.addf %342, %347 : vector<16x16xf32>
    %c58 = arith.constant 58 : index
    %349 = memref.load %arg1[%c58] : memref<98xf32, #tpu.memory_space<smem>>
    %c0_232 = arith.constant 0 : index
    %c1_233 = arith.constant 1 : index
    %c1_234 = arith.constant 1 : index
    %c2_235 = arith.constant 2 : index
    %350 = vector.load %arg2[%c0_232, %c1_233, %c1_234, %c2_235] : memref<1x2x22x22xf32, #tpu.memory_space<vmem>>, vector<1x1x16x16xf32>
    %351 = vector.shape_cast %350 : vector<1x1x16x16xf32> to vector<16x16xf32>
    %352 = vector.broadcast %349 : f32 to vector<16x16xf32>
    %353 = arith.mulf %352, %351 : vector<16x16xf32>
    %354 = arith.addf %348, %353 : vector<16x16xf32>
    %c59 = arith.constant 59 : index
    %355 = memref.load %arg1[%c59] : memref<98xf32, #tpu.memory_space<smem>>
    %c0_236 = arith.constant 0 : index
    %c1_237 = arith.constant 1 : index
    %c1_238 = arith.constant 1 : index
    %c3_239 = arith.constant 3 : index
    %356 = vector.load %arg2[%c0_236, %c1_237, %c1_238, %c3_239] : memref<1x2x22x22xf32, #tpu.memory_space<vmem>>, vector<1x1x16x16xf32>
    %357 = vector.shape_cast %356 : vector<1x1x16x16xf32> to vector<16x16xf32>
    %358 = vector.broadcast %355 : f32 to vector<16x16xf32>
    %359 = arith.mulf %358, %357 : vector<16x16xf32>
    %360 = arith.addf %354, %359 : vector<16x16xf32>
    %c60 = arith.constant 60 : index
    %361 = memref.load %arg1[%c60] : memref<98xf32, #tpu.memory_space<smem>>
    %c0_240 = arith.constant 0 : index
    %c1_241 = arith.constant 1 : index
    %c1_242 = arith.constant 1 : index
    %c4_243 = arith.constant 4 : index
    %362 = vector.load %arg2[%c0_240, %c1_241, %c1_242, %c4_243] : memref<1x2x22x22xf32, #tpu.memory_space<vmem>>, vector<1x1x16x16xf32>
    %363 = vector.shape_cast %362 : vector<1x1x16x16xf32> to vector<16x16xf32>
    %364 = vector.broadcast %361 : f32 to vector<16x16xf32>
    %365 = arith.mulf %364, %363 : vector<16x16xf32>
    %366 = arith.addf %360, %365 : vector<16x16xf32>
    %c61 = arith.constant 61 : index
    %367 = memref.load %arg1[%c61] : memref<98xf32, #tpu.memory_space<smem>>
    %c0_244 = arith.constant 0 : index
    %c1_245 = arith.constant 1 : index
    %c1_246 = arith.constant 1 : index
    %c5_247 = arith.constant 5 : index
    %368 = vector.load %arg2[%c0_244, %c1_245, %c1_246, %c5_247] : memref<1x2x22x22xf32, #tpu.memory_space<vmem>>, vector<1x1x16x16xf32>
    %369 = vector.shape_cast %368 : vector<1x1x16x16xf32> to vector<16x16xf32>
    %370 = vector.broadcast %367 : f32 to vector<16x16xf32>
    %371 = arith.mulf %370, %369 : vector<16x16xf32>
    %372 = arith.addf %366, %371 : vector<16x16xf32>
    %c62 = arith.constant 62 : index
    %373 = memref.load %arg1[%c62] : memref<98xf32, #tpu.memory_space<smem>>
    %c0_248 = arith.constant 0 : index
    %c1_249 = arith.constant 1 : index
    %c1_250 = arith.constant 1 : index
    %c6_251 = arith.constant 6 : index
    %374 = vector.load %arg2[%c0_248, %c1_249, %c1_250, %c6_251] : memref<1x2x22x22xf32, #tpu.memory_space<vmem>>, vector<1x1x16x16xf32>
    %375 = vector.shape_cast %374 : vector<1x1x16x16xf32> to vector<16x16xf32>
    %376 = vector.broadcast %373 : f32 to vector<16x16xf32>
    %377 = arith.mulf %376, %375 : vector<16x16xf32>
    %378 = arith.addf %372, %377 : vector<16x16xf32>
    %c63 = arith.constant 63 : index
    %379 = memref.load %arg1[%c63] : memref<98xf32, #tpu.memory_space<smem>>
    %c0_252 = arith.constant 0 : index
    %c1_253 = arith.constant 1 : index
    %c2_254 = arith.constant 2 : index
    %c0_255 = arith.constant 0 : index
    %380 = vector.load %arg2[%c0_252, %c1_253, %c2_254, %c0_255] : memref<1x2x22x22xf32, #tpu.memory_space<vmem>>, vector<1x1x16x16xf32>
    %381 = vector.shape_cast %380 : vector<1x1x16x16xf32> to vector<16x16xf32>
    %382 = vector.broadcast %379 : f32 to vector<16x16xf32>
    %383 = arith.mulf %382, %381 : vector<16x16xf32>
    %384 = arith.addf %378, %383 : vector<16x16xf32>
    %c64 = arith.constant 64 : index
    %385 = memref.load %arg1[%c64] : memref<98xf32, #tpu.memory_space<smem>>
    %c0_256 = arith.constant 0 : index
    %c1_257 = arith.constant 1 : index
    %c2_258 = arith.constant 2 : index
    %c1_259 = arith.constant 1 : index
    %386 = vector.load %arg2[%c0_256, %c1_257, %c2_258, %c1_259] : memref<1x2x22x22xf32, #tpu.memory_space<vmem>>, vector<1x1x16x16xf32>
    %387 = vector.shape_cast %386 : vector<1x1x16x16xf32> to vector<16x16xf32>
    %388 = vector.broadcast %385 : f32 to vector<16x16xf32>
    %389 = arith.mulf %388, %387 : vector<16x16xf32>
    %390 = arith.addf %384, %389 : vector<16x16xf32>
    %c65 = arith.constant 65 : index
    %391 = memref.load %arg1[%c65] : memref<98xf32, #tpu.memory_space<smem>>
    %c0_260 = arith.constant 0 : index
    %c1_261 = arith.constant 1 : index
    %c2_262 = arith.constant 2 : index
    %c2_263 = arith.constant 2 : index
    %392 = vector.load %arg2[%c0_260, %c1_261, %c2_262, %c2_263] : memref<1x2x22x22xf32, #tpu.memory_space<vmem>>, vector<1x1x16x16xf32>
    %393 = vector.shape_cast %392 : vector<1x1x16x16xf32> to vector<16x16xf32>
    %394 = vector.broadcast %391 : f32 to vector<16x16xf32>
    %395 = arith.mulf %394, %393 : vector<16x16xf32>
    %396 = arith.addf %390, %395 : vector<16x16xf32>
    %c66 = arith.constant 66 : index
    %397 = memref.load %arg1[%c66] : memref<98xf32, #tpu.memory_space<smem>>
    %c0_264 = arith.constant 0 : index
    %c1_265 = arith.constant 1 : index
    %c2_266 = arith.constant 2 : index
    %c3_267 = arith.constant 3 : index
    %398 = vector.load %arg2[%c0_264, %c1_265, %c2_266, %c3_267] : memref<1x2x22x22xf32, #tpu.memory_space<vmem>>, vector<1x1x16x16xf32>
    %399 = vector.shape_cast %398 : vector<1x1x16x16xf32> to vector<16x16xf32>
    %400 = vector.broadcast %397 : f32 to vector<16x16xf32>
    %401 = arith.mulf %400, %399 : vector<16x16xf32>
    %402 = arith.addf %396, %401 : vector<16x16xf32>
    %c67 = arith.constant 67 : index
    %403 = memref.load %arg1[%c67] : memref<98xf32, #tpu.memory_space<smem>>
    %c0_268 = arith.constant 0 : index
    %c1_269 = arith.constant 1 : index
    %c2_270 = arith.constant 2 : index
    %c4_271 = arith.constant 4 : index
    %404 = vector.load %arg2[%c0_268, %c1_269, %c2_270, %c4_271] : memref<1x2x22x22xf32, #tpu.memory_space<vmem>>, vector<1x1x16x16xf32>
    %405 = vector.shape_cast %404 : vector<1x1x16x16xf32> to vector<16x16xf32>
    %406 = vector.broadcast %403 : f32 to vector<16x16xf32>
    %407 = arith.mulf %406, %405 : vector<16x16xf32>
    %408 = arith.addf %402, %407 : vector<16x16xf32>
    %c68 = arith.constant 68 : index
    %409 = memref.load %arg1[%c68] : memref<98xf32, #tpu.memory_space<smem>>
    %c0_272 = arith.constant 0 : index
    %c1_273 = arith.constant 1 : index
    %c2_274 = arith.constant 2 : index
    %c5_275 = arith.constant 5 : index
    %410 = vector.load %arg2[%c0_272, %c1_273, %c2_274, %c5_275] : memref<1x2x22x22xf32, #tpu.memory_space<vmem>>, vector<1x1x16x16xf32>
    %411 = vector.shape_cast %410 : vector<1x1x16x16xf32> to vector<16x16xf32>
    %412 = vector.broadcast %409 : f32 to vector<16x16xf32>
    %413 = arith.mulf %412, %411 : vector<16x16xf32>
    %414 = arith.addf %408, %413 : vector<16x16xf32>
    %c69 = arith.constant 69 : index
    %415 = memref.load %arg1[%c69] : memref<98xf32, #tpu.memory_space<smem>>
    %c0_276 = arith.constant 0 : index
    %c1_277 = arith.constant 1 : index
    %c2_278 = arith.constant 2 : index
    %c6_279 = arith.constant 6 : index
    %416 = vector.load %arg2[%c0_276, %c1_277, %c2_278, %c6_279] : memref<1x2x22x22xf32, #tpu.memory_space<vmem>>, vector<1x1x16x16xf32>
    %417 = vector.shape_cast %416 : vector<1x1x16x16xf32> to vector<16x16xf32>
    %418 = vector.broadcast %415 : f32 to vector<16x16xf32>
    %419 = arith.mulf %418, %417 : vector<16x16xf32>
    %420 = arith.addf %414, %419 : vector<16x16xf32>
    %c70 = arith.constant 70 : index
    %421 = memref.load %arg1[%c70] : memref<98xf32, #tpu.memory_space<smem>>
    %c0_280 = arith.constant 0 : index
    %c1_281 = arith.constant 1 : index
    %c3_282 = arith.constant 3 : index
    %c0_283 = arith.constant 0 : index
    %422 = vector.load %arg2[%c0_280, %c1_281, %c3_282, %c0_283] : memref<1x2x22x22xf32, #tpu.memory_space<vmem>>, vector<1x1x16x16xf32>
    %423 = vector.shape_cast %422 : vector<1x1x16x16xf32> to vector<16x16xf32>
    %424 = vector.broadcast %421 : f32 to vector<16x16xf32>
    %425 = arith.mulf %424, %423 : vector<16x16xf32>
    %426 = arith.addf %420, %425 : vector<16x16xf32>
    %c71 = arith.constant 71 : index
    %427 = memref.load %arg1[%c71] : memref<98xf32, #tpu.memory_space<smem>>
    %c0_284 = arith.constant 0 : index
    %c1_285 = arith.constant 1 : index
    %c3_286 = arith.constant 3 : index
    %c1_287 = arith.constant 1 : index
    %428 = vector.load %arg2[%c0_284, %c1_285, %c3_286, %c1_287] : memref<1x2x22x22xf32, #tpu.memory_space<vmem>>, vector<1x1x16x16xf32>
    %429 = vector.shape_cast %428 : vector<1x1x16x16xf32> to vector<16x16xf32>
    %430 = vector.broadcast %427 : f32 to vector<16x16xf32>
    %431 = arith.mulf %430, %429 : vector<16x16xf32>
    %432 = arith.addf %426, %431 : vector<16x16xf32>
    %c72 = arith.constant 72 : index
    %433 = memref.load %arg1[%c72] : memref<98xf32, #tpu.memory_space<smem>>
    %c0_288 = arith.constant 0 : index
    %c1_289 = arith.constant 1 : index
    %c3_290 = arith.constant 3 : index
    %c2_291 = arith.constant 2 : index
    %434 = vector.load %arg2[%c0_288, %c1_289, %c3_290, %c2_291] : memref<1x2x22x22xf32, #tpu.memory_space<vmem>>, vector<1x1x16x16xf32>
    %435 = vector.shape_cast %434 : vector<1x1x16x16xf32> to vector<16x16xf32>
    %436 = vector.broadcast %433 : f32 to vector<16x16xf32>
    %437 = arith.mulf %436, %435 : vector<16x16xf32>
    %438 = arith.addf %432, %437 : vector<16x16xf32>
    %c73 = arith.constant 73 : index
    %439 = memref.load %arg1[%c73] : memref<98xf32, #tpu.memory_space<smem>>
    %c0_292 = arith.constant 0 : index
    %c1_293 = arith.constant 1 : index
    %c3_294 = arith.constant 3 : index
    %c3_295 = arith.constant 3 : index
    %440 = vector.load %arg2[%c0_292, %c1_293, %c3_294, %c3_295] : memref<1x2x22x22xf32, #tpu.memory_space<vmem>>, vector<1x1x16x16xf32>
    %441 = vector.shape_cast %440 : vector<1x1x16x16xf32> to vector<16x16xf32>
    %442 = vector.broadcast %439 : f32 to vector<16x16xf32>
    %443 = arith.mulf %442, %441 : vector<16x16xf32>
    %444 = arith.addf %438, %443 : vector<16x16xf32>
    %c74 = arith.constant 74 : index
    %445 = memref.load %arg1[%c74] : memref<98xf32, #tpu.memory_space<smem>>
    %c0_296 = arith.constant 0 : index
    %c1_297 = arith.constant 1 : index
    %c3_298 = arith.constant 3 : index
    %c4_299 = arith.constant 4 : index
    %446 = vector.load %arg2[%c0_296, %c1_297, %c3_298, %c4_299] : memref<1x2x22x22xf32, #tpu.memory_space<vmem>>, vector<1x1x16x16xf32>
    %447 = vector.shape_cast %446 : vector<1x1x16x16xf32> to vector<16x16xf32>
    %448 = vector.broadcast %445 : f32 to vector<16x16xf32>
    %449 = arith.mulf %448, %447 : vector<16x16xf32>
    %450 = arith.addf %444, %449 : vector<16x16xf32>
    %c75 = arith.constant 75 : index
    %451 = memref.load %arg1[%c75] : memref<98xf32, #tpu.memory_space<smem>>
    %c0_300 = arith.constant 0 : index
    %c1_301 = arith.constant 1 : index
    %c3_302 = arith.constant 3 : index
    %c5_303 = arith.constant 5 : index
    %452 = vector.load %arg2[%c0_300, %c1_301, %c3_302, %c5_303] : memref<1x2x22x22xf32, #tpu.memory_space<vmem>>, vector<1x1x16x16xf32>
    %453 = vector.shape_cast %452 : vector<1x1x16x16xf32> to vector<16x16xf32>
    %454 = vector.broadcast %451 : f32 to vector<16x16xf32>
    %455 = arith.mulf %454, %453 : vector<16x16xf32>
    %456 = arith.addf %450, %455 : vector<16x16xf32>
    %c76 = arith.constant 76 : index
    %457 = memref.load %arg1[%c76] : memref<98xf32, #tpu.memory_space<smem>>
    %c0_304 = arith.constant 0 : index
    %c1_305 = arith.constant 1 : index
    %c3_306 = arith.constant 3 : index
    %c6_307 = arith.constant 6 : index
    %458 = vector.load %arg2[%c0_304, %c1_305, %c3_306, %c6_307] : memref<1x2x22x22xf32, #tpu.memory_space<vmem>>, vector<1x1x16x16xf32>
    %459 = vector.shape_cast %458 : vector<1x1x16x16xf32> to vector<16x16xf32>
    %460 = vector.broadcast %457 : f32 to vector<16x16xf32>
    %461 = arith.mulf %460, %459 : vector<16x16xf32>
    %462 = arith.addf %456, %461 : vector<16x16xf32>
    %c77 = arith.constant 77 : index
    %463 = memref.load %arg1[%c77] : memref<98xf32, #tpu.memory_space<smem>>
    %c0_308 = arith.constant 0 : index
    %c1_309 = arith.constant 1 : index
    %c4_310 = arith.constant 4 : index
    %c0_311 = arith.constant 0 : index
    %464 = vector.load %arg2[%c0_308, %c1_309, %c4_310, %c0_311] : memref<1x2x22x22xf32, #tpu.memory_space<vmem>>, vector<1x1x16x16xf32>
    %465 = vector.shape_cast %464 : vector<1x1x16x16xf32> to vector<16x16xf32>
    %466 = vector.broadcast %463 : f32 to vector<16x16xf32>
    %467 = arith.mulf %466, %465 : vector<16x16xf32>
    %468 = arith.addf %462, %467 : vector<16x16xf32>
    %c78 = arith.constant 78 : index
    %469 = memref.load %arg1[%c78] : memref<98xf32, #tpu.memory_space<smem>>
    %c0_312 = arith.constant 0 : index
    %c1_313 = arith.constant 1 : index
    %c4_314 = arith.constant 4 : index
    %c1_315 = arith.constant 1 : index
    %470 = vector.load %arg2[%c0_312, %c1_313, %c4_314, %c1_315] : memref<1x2x22x22xf32, #tpu.memory_space<vmem>>, vector<1x1x16x16xf32>
    %471 = vector.shape_cast %470 : vector<1x1x16x16xf32> to vector<16x16xf32>
    %472 = vector.broadcast %469 : f32 to vector<16x16xf32>
    %473 = arith.mulf %472, %471 : vector<16x16xf32>
    %474 = arith.addf %468, %473 : vector<16x16xf32>
    %c79 = arith.constant 79 : index
    %475 = memref.load %arg1[%c79] : memref<98xf32, #tpu.memory_space<smem>>
    %c0_316 = arith.constant 0 : index
    %c1_317 = arith.constant 1 : index
    %c4_318 = arith.constant 4 : index
    %c2_319 = arith.constant 2 : index
    %476 = vector.load %arg2[%c0_316, %c1_317, %c4_318, %c2_319] : memref<1x2x22x22xf32, #tpu.memory_space<vmem>>, vector<1x1x16x16xf32>
    %477 = vector.shape_cast %476 : vector<1x1x16x16xf32> to vector<16x16xf32>
    %478 = vector.broadcast %475 : f32 to vector<16x16xf32>
    %479 = arith.mulf %478, %477 : vector<16x16xf32>
    %480 = arith.addf %474, %479 : vector<16x16xf32>
    %c80 = arith.constant 80 : index
    %481 = memref.load %arg1[%c80] : memref<98xf32, #tpu.memory_space<smem>>
    %c0_320 = arith.constant 0 : index
    %c1_321 = arith.constant 1 : index
    %c4_322 = arith.constant 4 : index
    %c3_323 = arith.constant 3 : index
    %482 = vector.load %arg2[%c0_320, %c1_321, %c4_322, %c3_323] : memref<1x2x22x22xf32, #tpu.memory_space<vmem>>, vector<1x1x16x16xf32>
    %483 = vector.shape_cast %482 : vector<1x1x16x16xf32> to vector<16x16xf32>
    %484 = vector.broadcast %481 : f32 to vector<16x16xf32>
    %485 = arith.mulf %484, %483 : vector<16x16xf32>
    %486 = arith.addf %480, %485 : vector<16x16xf32>
    %c81 = arith.constant 81 : index
    %487 = memref.load %arg1[%c81] : memref<98xf32, #tpu.memory_space<smem>>
    %c0_324 = arith.constant 0 : index
    %c1_325 = arith.constant 1 : index
    %c4_326 = arith.constant 4 : index
    %c4_327 = arith.constant 4 : index
    %488 = vector.load %arg2[%c0_324, %c1_325, %c4_326, %c4_327] : memref<1x2x22x22xf32, #tpu.memory_space<vmem>>, vector<1x1x16x16xf32>
    %489 = vector.shape_cast %488 : vector<1x1x16x16xf32> to vector<16x16xf32>
    %490 = vector.broadcast %487 : f32 to vector<16x16xf32>
    %491 = arith.mulf %490, %489 : vector<16x16xf32>
    %492 = arith.addf %486, %491 : vector<16x16xf32>
    %c82 = arith.constant 82 : index
    %493 = memref.load %arg1[%c82] : memref<98xf32, #tpu.memory_space<smem>>
    %c0_328 = arith.constant 0 : index
    %c1_329 = arith.constant 1 : index
    %c4_330 = arith.constant 4 : index
    %c5_331 = arith.constant 5 : index
    %494 = vector.load %arg2[%c0_328, %c1_329, %c4_330, %c5_331] : memref<1x2x22x22xf32, #tpu.memory_space<vmem>>, vector<1x1x16x16xf32>
    %495 = vector.shape_cast %494 : vector<1x1x16x16xf32> to vector<16x16xf32>
    %496 = vector.broadcast %493 : f32 to vector<16x16xf32>
    %497 = arith.mulf %496, %495 : vector<16x16xf32>
    %498 = arith.addf %492, %497 : vector<16x16xf32>
    %c83 = arith.constant 83 : index
    %499 = memref.load %arg1[%c83] : memref<98xf32, #tpu.memory_space<smem>>
    %c0_332 = arith.constant 0 : index
    %c1_333 = arith.constant 1 : index
    %c4_334 = arith.constant 4 : index
    %c6_335 = arith.constant 6 : index
    %500 = vector.load %arg2[%c0_332, %c1_333, %c4_334, %c6_335] : memref<1x2x22x22xf32, #tpu.memory_space<vmem>>, vector<1x1x16x16xf32>
    %501 = vector.shape_cast %500 : vector<1x1x16x16xf32> to vector<16x16xf32>
    %502 = vector.broadcast %499 : f32 to vector<16x16xf32>
    %503 = arith.mulf %502, %501 : vector<16x16xf32>
    %504 = arith.addf %498, %503 : vector<16x16xf32>
    %c84 = arith.constant 84 : index
    %505 = memref.load %arg1[%c84] : memref<98xf32, #tpu.memory_space<smem>>
    %c0_336 = arith.constant 0 : index
    %c1_337 = arith.constant 1 : index
    %c5_338 = arith.constant 5 : index
    %c0_339 = arith.constant 0 : index
    %506 = vector.load %arg2[%c0_336, %c1_337, %c5_338, %c0_339] : memref<1x2x22x22xf32, #tpu.memory_space<vmem>>, vector<1x1x16x16xf32>
    %507 = vector.shape_cast %506 : vector<1x1x16x16xf32> to vector<16x16xf32>
    %508 = vector.broadcast %505 : f32 to vector<16x16xf32>
    %509 = arith.mulf %508, %507 : vector<16x16xf32>
    %510 = arith.addf %504, %509 : vector<16x16xf32>
    %c85 = arith.constant 85 : index
    %511 = memref.load %arg1[%c85] : memref<98xf32, #tpu.memory_space<smem>>
    %c0_340 = arith.constant 0 : index
    %c1_341 = arith.constant 1 : index
    %c5_342 = arith.constant 5 : index
    %c1_343 = arith.constant 1 : index
    %512 = vector.load %arg2[%c0_340, %c1_341, %c5_342, %c1_343] : memref<1x2x22x22xf32, #tpu.memory_space<vmem>>, vector<1x1x16x16xf32>
    %513 = vector.shape_cast %512 : vector<1x1x16x16xf32> to vector<16x16xf32>
    %514 = vector.broadcast %511 : f32 to vector<16x16xf32>
    %515 = arith.mulf %514, %513 : vector<16x16xf32>
    %516 = arith.addf %510, %515 : vector<16x16xf32>
    %c86 = arith.constant 86 : index
    %517 = memref.load %arg1[%c86] : memref<98xf32, #tpu.memory_space<smem>>
    %c0_344 = arith.constant 0 : index
    %c1_345 = arith.constant 1 : index
    %c5_346 = arith.constant 5 : index
    %c2_347 = arith.constant 2 : index
    %518 = vector.load %arg2[%c0_344, %c1_345, %c5_346, %c2_347] : memref<1x2x22x22xf32, #tpu.memory_space<vmem>>, vector<1x1x16x16xf32>
    %519 = vector.shape_cast %518 : vector<1x1x16x16xf32> to vector<16x16xf32>
    %520 = vector.broadcast %517 : f32 to vector<16x16xf32>
    %521 = arith.mulf %520, %519 : vector<16x16xf32>
    %522 = arith.addf %516, %521 : vector<16x16xf32>
    %c87 = arith.constant 87 : index
    %523 = memref.load %arg1[%c87] : memref<98xf32, #tpu.memory_space<smem>>
    %c0_348 = arith.constant 0 : index
    %c1_349 = arith.constant 1 : index
    %c5_350 = arith.constant 5 : index
    %c3_351 = arith.constant 3 : index
    %524 = vector.load %arg2[%c0_348, %c1_349, %c5_350, %c3_351] : memref<1x2x22x22xf32, #tpu.memory_space<vmem>>, vector<1x1x16x16xf32>
    %525 = vector.shape_cast %524 : vector<1x1x16x16xf32> to vector<16x16xf32>
    %526 = vector.broadcast %523 : f32 to vector<16x16xf32>
    %527 = arith.mulf %526, %525 : vector<16x16xf32>
    %528 = arith.addf %522, %527 : vector<16x16xf32>
    %c88 = arith.constant 88 : index
    %529 = memref.load %arg1[%c88] : memref<98xf32, #tpu.memory_space<smem>>
    %c0_352 = arith.constant 0 : index
    %c1_353 = arith.constant 1 : index
    %c5_354 = arith.constant 5 : index
    %c4_355 = arith.constant 4 : index
    %530 = vector.load %arg2[%c0_352, %c1_353, %c5_354, %c4_355] : memref<1x2x22x22xf32, #tpu.memory_space<vmem>>, vector<1x1x16x16xf32>
    %531 = vector.shape_cast %530 : vector<1x1x16x16xf32> to vector<16x16xf32>
    %532 = vector.broadcast %529 : f32 to vector<16x16xf32>
    %533 = arith.mulf %532, %531 : vector<16x16xf32>
    %534 = arith.addf %528, %533 : vector<16x16xf32>
    %c89 = arith.constant 89 : index
    %535 = memref.load %arg1[%c89] : memref<98xf32, #tpu.memory_space<smem>>
    %c0_356 = arith.constant 0 : index
    %c1_357 = arith.constant 1 : index
    %c5_358 = arith.constant 5 : index
    %c5_359 = arith.constant 5 : index
    %536 = vector.load %arg2[%c0_356, %c1_357, %c5_358, %c5_359] : memref<1x2x22x22xf32, #tpu.memory_space<vmem>>, vector<1x1x16x16xf32>
    %537 = vector.shape_cast %536 : vector<1x1x16x16xf32> to vector<16x16xf32>
    %538 = vector.broadcast %535 : f32 to vector<16x16xf32>
    %539 = arith.mulf %538, %537 : vector<16x16xf32>
    %540 = arith.addf %534, %539 : vector<16x16xf32>
    %c90 = arith.constant 90 : index
    %541 = memref.load %arg1[%c90] : memref<98xf32, #tpu.memory_space<smem>>
    %c0_360 = arith.constant 0 : index
    %c1_361 = arith.constant 1 : index
    %c5_362 = arith.constant 5 : index
    %c6_363 = arith.constant 6 : index
    %542 = vector.load %arg2[%c0_360, %c1_361, %c5_362, %c6_363] : memref<1x2x22x22xf32, #tpu.memory_space<vmem>>, vector<1x1x16x16xf32>
    %543 = vector.shape_cast %542 : vector<1x1x16x16xf32> to vector<16x16xf32>
    %544 = vector.broadcast %541 : f32 to vector<16x16xf32>
    %545 = arith.mulf %544, %543 : vector<16x16xf32>
    %546 = arith.addf %540, %545 : vector<16x16xf32>
    %c91 = arith.constant 91 : index
    %547 = memref.load %arg1[%c91] : memref<98xf32, #tpu.memory_space<smem>>
    %c0_364 = arith.constant 0 : index
    %c1_365 = arith.constant 1 : index
    %c6_366 = arith.constant 6 : index
    %c0_367 = arith.constant 0 : index
    %548 = vector.load %arg2[%c0_364, %c1_365, %c6_366, %c0_367] : memref<1x2x22x22xf32, #tpu.memory_space<vmem>>, vector<1x1x16x16xf32>
    %549 = vector.shape_cast %548 : vector<1x1x16x16xf32> to vector<16x16xf32>
    %550 = vector.broadcast %547 : f32 to vector<16x16xf32>
    %551 = arith.mulf %550, %549 : vector<16x16xf32>
    %552 = arith.addf %546, %551 : vector<16x16xf32>
    %c92 = arith.constant 92 : index
    %553 = memref.load %arg1[%c92] : memref<98xf32, #tpu.memory_space<smem>>
    %c0_368 = arith.constant 0 : index
    %c1_369 = arith.constant 1 : index
    %c6_370 = arith.constant 6 : index
    %c1_371 = arith.constant 1 : index
    %554 = vector.load %arg2[%c0_368, %c1_369, %c6_370, %c1_371] : memref<1x2x22x22xf32, #tpu.memory_space<vmem>>, vector<1x1x16x16xf32>
    %555 = vector.shape_cast %554 : vector<1x1x16x16xf32> to vector<16x16xf32>
    %556 = vector.broadcast %553 : f32 to vector<16x16xf32>
    %557 = arith.mulf %556, %555 : vector<16x16xf32>
    %558 = arith.addf %552, %557 : vector<16x16xf32>
    %c93 = arith.constant 93 : index
    %559 = memref.load %arg1[%c93] : memref<98xf32, #tpu.memory_space<smem>>
    %c0_372 = arith.constant 0 : index
    %c1_373 = arith.constant 1 : index
    %c6_374 = arith.constant 6 : index
    %c2_375 = arith.constant 2 : index
    %560 = vector.load %arg2[%c0_372, %c1_373, %c6_374, %c2_375] : memref<1x2x22x22xf32, #tpu.memory_space<vmem>>, vector<1x1x16x16xf32>
    %561 = vector.shape_cast %560 : vector<1x1x16x16xf32> to vector<16x16xf32>
    %562 = vector.broadcast %559 : f32 to vector<16x16xf32>
    %563 = arith.mulf %562, %561 : vector<16x16xf32>
    %564 = arith.addf %558, %563 : vector<16x16xf32>
    %c94 = arith.constant 94 : index
    %565 = memref.load %arg1[%c94] : memref<98xf32, #tpu.memory_space<smem>>
    %c0_376 = arith.constant 0 : index
    %c1_377 = arith.constant 1 : index
    %c6_378 = arith.constant 6 : index
    %c3_379 = arith.constant 3 : index
    %566 = vector.load %arg2[%c0_376, %c1_377, %c6_378, %c3_379] : memref<1x2x22x22xf32, #tpu.memory_space<vmem>>, vector<1x1x16x16xf32>
    %567 = vector.shape_cast %566 : vector<1x1x16x16xf32> to vector<16x16xf32>
    %568 = vector.broadcast %565 : f32 to vector<16x16xf32>
    %569 = arith.mulf %568, %567 : vector<16x16xf32>
    %570 = arith.addf %564, %569 : vector<16x16xf32>
    %c95 = arith.constant 95 : index
    %571 = memref.load %arg1[%c95] : memref<98xf32, #tpu.memory_space<smem>>
    %c0_380 = arith.constant 0 : index
    %c1_381 = arith.constant 1 : index
    %c6_382 = arith.constant 6 : index
    %c4_383 = arith.constant 4 : index
    %572 = vector.load %arg2[%c0_380, %c1_381, %c6_382, %c4_383] : memref<1x2x22x22xf32, #tpu.memory_space<vmem>>, vector<1x1x16x16xf32>
    %573 = vector.shape_cast %572 : vector<1x1x16x16xf32> to vector<16x16xf32>
    %574 = vector.broadcast %571 : f32 to vector<16x16xf32>
    %575 = arith.mulf %574, %573 : vector<16x16xf32>
    %576 = arith.addf %570, %575 : vector<16x16xf32>
    %c96 = arith.constant 96 : index
    %577 = memref.load %arg1[%c96] : memref<98xf32, #tpu.memory_space<smem>>
    %c0_384 = arith.constant 0 : index
    %c1_385 = arith.constant 1 : index
    %c6_386 = arith.constant 6 : index
    %c5_387 = arith.constant 5 : index
    %578 = vector.load %arg2[%c0_384, %c1_385, %c6_386, %c5_387] : memref<1x2x22x22xf32, #tpu.memory_space<vmem>>, vector<1x1x16x16xf32>
    %579 = vector.shape_cast %578 : vector<1x1x16x16xf32> to vector<16x16xf32>
    %580 = vector.broadcast %577 : f32 to vector<16x16xf32>
    %581 = arith.mulf %580, %579 : vector<16x16xf32>
    %582 = arith.addf %576, %581 : vector<16x16xf32>
    %c97 = arith.constant 97 : index
    %583 = memref.load %arg1[%c97] : memref<98xf32, #tpu.memory_space<smem>>
    %c0_388 = arith.constant 0 : index
    %c1_389 = arith.constant 1 : index
    %c6_390 = arith.constant 6 : index
    %c6_391 = arith.constant 6 : index
    %584 = vector.load %arg2[%c0_388, %c1_389, %c6_390, %c6_391] : memref<1x2x22x22xf32, #tpu.memory_space<vmem>>, vector<1x1x16x16xf32>
    %585 = vector.shape_cast %584 : vector<1x1x16x16xf32> to vector<16x16xf32>
    %586 = vector.broadcast %583 : f32 to vector<16x16xf32>
    %587 = arith.mulf %586, %585 : vector<16x16xf32>
    %588 = arith.addf %582, %587 : vector<16x16xf32>
    %c0_392 = arith.constant 0 : index
    %c0_393 = arith.constant 0 : index
    %c0_394 = arith.constant 0 : index
    %589 = vector.load %arg3[%c0_392, %c0_393, %c0_394] : memref<1x16x16xf32, #tpu.memory_space<vmem>>, vector<1x16x16xf32>
    %590 = vector.shape_cast %589 : vector<1x16x16xf32> to vector<16x16xf32>
    %591 = vector.shape_cast %588 : vector<16x16xf32> to vector<1x16x16xf32>
    tpu.vector_store %arg3[%c0_392, %c0_393, %c0_394], %591 {strides = array<i32>} : memref<1x16x16xf32, #tpu.memory_space<vmem>>, vector<1x16x16xf32>,
    return
  }
  func.func @transform_0(%arg0: i32) -> i32 {
    %c0_i32 = arith.constant 0 : i32
    %c0_i32_0 = arith.constant 0 : i32
    return %c0_i32 : i32
  }
  func.func @transform_1(%arg0: i32) -> (i32, i32, i32, i32) {
    %c0_i32 = arith.constant 0 : i32
    %c0_i32_0 = arith.constant 0 : i32
    %c0_i32_1 = arith.constant 0 : i32
    %c0_i32_2 = arith.constant 0 : i32
    return %arg0, %c0_i32, %c0_i32_0, %c0_i32_1 : i32, i32, i32, i32
  }
  func.func @transform_2(%arg0: i32) -> (i32, i32, i32) {
    %c0_i32 = arith.constant 0 : i32
    %c0_i32_0 = arith.constant 0 : i32
    %c0_i32_1 = arith.constant 0 : i32
    return %arg0, %c0_i32, %c0_i32_0 : i32, i32, i32
  }
}

</mosaic_0001>

<bundles_post_ra>
// kernel: cbam_forward.5
= control target key start
LH: loop header
LB: loop body
LE: loop exit
PB: predicated region body
PF: predicated region fallthrough
CT: control target
= control target key end

     0   :  { %vm59_vm0 = vcmask 7168   ;;  %s235_s0 = inlined_call_operand.vmem [shape: f32[64,256], index: 0, kind: input, shape index: {}]   ;;  %s236_s1 = inlined_call_operand.vmem [shape: f32[64,1], index: 1, kind: output, shape index: {0}]   ;;  %s237_s2 = inlined_call_operand.vmem [shape: f32[64,1], index: 2, kind: output, shape index: {1}]  }
   0x1   :  { %v14_v0 = vld [vmem:[%s235_s0 + $0x20] sm:$0xff]  ;;  %v15_v1 = vld [vmem:[%s235_s0 + $0x28] sm:$0xff]  ;;  %v16_v5 = vld [vmem:[%s235_s0 + $0x30] sm:$0xff] }
   0x2   :  { %v10_v2 = vld [vmem:[%s235_s0] sm:$0xff]  ;;  %v32_v3 = vadd.f32 %v15_v1, %v14_v0  ;;  %v11_v4 = vld [vmem:[%s235_s0 + $0x8] sm:$0xff]  ;;  %v17_v6 = vld [vmem:[%s235_s0 + $0x38] sm:$0xff]  ;;  %v74_v27 = vmax.f32 %v14_v0, %v15_v1 }
   0x3   :  { %v26_v7 = vadd.f32 %v11_v4, %v10_v2  ;;  %v12_v8 = vld [vmem:[%s235_s0 + $0x10] sm:$0xff]  ;;  %v13_v9 = vld [vmem:[%s235_s0 + $0x18] sm:$0xff]  ;;  %v35_v10 = vadd.f32 %v17_v6, %v16_v5  ;;  %v18_v14 = vld [vmem:[%s235_s0 + $0x40] sm:$0xff]  ;;  %v68_v25 = vmax.f32 %v10_v2, %v11_v4  ;;  %v77_v26 = vmax.f32 %v16_v5, %v17_v6 }
   0x4   :  { %33 = vadd.xlane.f32.xlu1 %v32_v3  ;;  %v29_v11 = vadd.f32 %v13_v9, %v12_v8  ;;  %v20_v12 = vld [vmem:[%s235_s0 + $0x50] sm:$0xff]  ;;  %v21_v13 = vld [vmem:[%s235_s0 + $0x58] sm:$0xff]  ;;  %v19_v15 = vld [vmem:[%s235_s0 + $0x48] sm:$0xff]  ;;  %v71_v24 = vmax.f32 %v12_v8, %v13_v9 }
   0x5   :  { %27 = vadd.xlane.f32.xlu0 %v26_v7  ;;  %v41_v16 = vadd.f32 %v21_v13, %v20_v12  ;;  %v38_v17 = vadd.f32 %v19_v15, %v18_v14  ;;  %v24_v18 = vld [vmem:[%s235_s0 + $0x70] sm:$0xff]  ;;  %v25_v19 = vld [vmem:[%s235_s0 + $0x78] sm:$0xff]  ;;  %v22_v20 = vld [vmem:[%s235_s0 + $0x60] sm:$0xff]  ;;  %v83_v28 = vmax.f32 %v20_v12, %v21_v13  ;;  %v80_v29 = vmax.f32 %v18_v14, %v19_v15 }
   0x6   :  { %v23_v21 = vld [vmem:[%s235_s0 + $0x68] sm:$0xff]  ;;  %v47_v22 = vadd.f32 %v25_v19, %v24_v18  ;;  %v89_v30 = vmax.f32 %v24_v18, %v25_v19 }
   0x7   :  { %v44_v23 = vadd.f32 %v23_v21, %v22_v20  ;;  %v86_v31 = vmax.f32 %v22_v20, %v23_v21 }
   0x8   :  { %36 = vadd.xlane.f32.xlu1 %v35_v10 }
   0x9   :  { %30 = vadd.xlane.f32.xlu0 %v29_v11 }
   0xc   :  { %42 = vadd.xlane.f32.xlu1 %v41_v16 }
   0xd   :  { %39 = vadd.xlane.f32.xlu0 %v38_v17 }
  0x10   :  { %48 = vadd.xlane.f32.xlu1 %v47_v22 }
  0x11   :  { %45 = vadd.xlane.f32.xlu0 %v44_v23 }
  0x14   :  { %72 = vmax.xlane.f32.xlu1 %v71_v24 }
  0x15   :  { %69 = vmax.xlane.f32.xlu0 %v68_v25 }
  0x18   :  { %78 = vmax.xlane.f32.xlu1 %v77_v26 }
  0x19   :  { %75 = vmax.xlane.f32.xlu0 %v74_v27 }
  0x1c   :  { %84 = vmax.xlane.f32.xlu1 %v83_v28 }
  0x1d   :  { %81 = vmax.xlane.f32.xlu0 %v80_v29 }
  0x20   :  { %90 = vmax.xlane.f32.xlu1 %v89_v30 }
  0x21   :  { %87 = vmax.xlane.f32.xlu0 %v86_v31 }
  0x91   :  { %v34_v32 = vpop.xlane.xlu1 %33 }
  0x92   :  { %v53_v33 = vmul.f32 0.00390625, %v34_v32  ;;  %v28_v34 = vpop.xlane.xlu0 %27 }
  0x93   :  { %v51_v35 = vmul.f32 0.00390625, %v28_v34 }
  0x94   :  { %62 = vst.msk [vmem:[%s236_s1 + $0x10] sm:$0xff] %vm59_vm0, %v53_v33 }
  0x95   :  { %60 = vst.msk [vmem:[%s236_s1] sm:$0xff] %vm59_vm0, %v51_v35  ;;  %v37_v36 = vpop.xlane.xlu1 %36 }
  0x96   :  { %v54_v37 = vmul.f32 0.00390625, %v37_v36  ;;  %v31_v38 = vpop.xlane.xlu0 %30 }
  0x97   :  { %v52_v39 = vmul.f32 0.00390625, %v31_v38 }
  0x98   :  { %63 = vst.msk [vmem:[%s236_s1 + $0x18] sm:$0xff] %vm59_vm0, %v54_v37 }
  0x99   :  { %61 = vst.msk [vmem:[%s236_s1 + $0x8] sm:$0xff] %vm59_vm0, %v52_v39  ;;  %v43_v40 = vpop.xlane.xlu1 %42 }
  0x9a   :  { %v56_v41 = vmul.f32 0.00390625, %v43_v40  ;;  %v40_v42 = vpop.xlane.xlu0 %39 }
  0x9b   :  { %v55_v43 = vmul.f32 0.00390625, %v40_v42 }
  0x9c   :  { %65 = vst.msk [vmem:[%s236_s1 + $0x28] sm:$0xff] %vm59_vm0, %v56_v41 }
  0x9d   :  { %64 = vst.msk [vmem:[%s236_s1 + $0x20] sm:$0xff] %vm59_vm0, %v55_v43  ;;  %v49_v44 = vpop.xlane.xlu1 %48 }
  0x9e   :  { %v58_v45 = vmul.f32 0.00390625, %v49_v44  ;;  %v46_v46 = vpop.xlane.xlu0 %45 }
  0x9f   :  { %v57_v47 = vmul.f32 0.00390625, %v46_v46 }
  0xa0   :  { %67 = vst.msk [vmem:[%s236_s1 + $0x38] sm:$0xff] %vm59_vm0, %v58_v45 }
  0xa1   :  { %66 = vst.msk [vmem:[%s236_s1 + $0x30] sm:$0xff] %vm59_vm0, %v57_v47  ;;  %v73_v48 = vpop.xlane.xlu1 %72 }
  0xa2   :  { %93 = vst.msk [vmem:[%s237_s2 + $0x8] sm:$0xff] %vm59_vm0, %v73_v48  ;;  %v70_v49 = vpop.xlane.xlu0 %69 }
  0xa3   :  { %92 = vst.msk [vmem:[%s237_s2] sm:$0xff] %vm59_vm0, %v70_v49 }
  0xa5   :  { %v79_v50 = vpop.xlane.xlu1 %78 }
  0xa6   :  { %95 = vst.msk [vmem:[%s237_s2 + $0x18] sm:$0xff] %vm59_vm0, %v79_v50  ;;  %v76_v51 = vpop.xlane.xlu0 %75 }
  0xa7   :  { %94 = vst.msk [vmem:[%s237_s2 + $0x10] sm:$0xff] %vm59_vm0, %v76_v51 }
  0xa9   :  { %v85_v52 = vpop.xlane.xlu1 %84 }
  0xaa   :  { %97 = vst.msk [vmem:[%s237_s2 + $0x28] sm:$0xff] %vm59_vm0, %v85_v52  ;;  %v82_v53 = vpop.xlane.xlu0 %81 }
  0xab   :  { %96 = vst.msk [vmem:[%s237_s2 + $0x20] sm:$0xff] %vm59_vm0, %v82_v53 }
  0xad   :  { %v91_v54 = vpop.xlane.xlu1 %90 }
  0xae   :  { %99 = vst.msk [vmem:[%s237_s2 + $0x38] sm:$0xff] %vm59_vm0, %v91_v54  ;;  %v88_v55 = vpop.xlane.xlu0 %87 }
  0xaf   :  { %98 = vst.msk [vmem:[%s237_s2 + $0x30] sm:$0xff] %vm59_vm0, %v88_v55 }

// kernel: cbam_forward.7
= control target key start
LH: loop header
LB: loop body
LE: loop exit
PB: predicated region body
PF: predicated region fallthrough
CT: control target
= control target key end

     0   :  { %s597_s12 = smov 0   ;;  %s599_s13 = smov 0   ;;  %s641_s0 = inlined_call_operand.vmem [shape: f32[2,32,256], index: 0, kind: input, shape index: {}]   ;;  %s642_s1 = inlined_call_operand.vmem [shape: f32[2,32,1], index: 1, kind: input, shape index: {}]   ;;  %s643_s2 = inlined_call_operand.vmem [shape: f32[2,1,256], index: 2, kind: output, shape index: {0}]   ;;  %s644_s3 = inlined_call_operand.vmem [shape: f32[2,1,256], index: 3, kind: output, shape index: {1}]  }
   0x1   :  { %s601_s14 = smov 0  }
   0x2 LB: > { %s26_s15 = sadd.s32 1, %s569_s13  ;;  %p512_p0 = scmp.ge.s32.totalorder %s573_s14, 1  ;;  %s573_s14 = sphi %s601_s14, %s14_s14   ;;  %s569_s13 = sphi %s599_s13, %s646_s13   ;;  %s565_s12 = sphi %s597_s12, %s645_s12  }
   0x3   : > { %p28_p1 = scmp.ge.s32.totalorder %s26_s15, 2  ;;  %p173_p2 = scmp.lt.s32.totalorder %s573_s14, 3 }
   0x5   : > { %s648_s15 = smov (%p28_p1, %s26_s15), 0  ;;  %p174_p3 = pnand %p512_p0, %p173_p2 }
   0x6   : > { %p218_p4 = scmp.lt.s32.totalorder (!%p174_p3), %s565_s12, 1  ;;  %v575_v0 = vmov (!%p174_p3), 0   ;;  %v576_v39 = vmov (!%p174_p3), 1966171168   ;;  %v314_v41 = vlaneseq (!%p174_p3) }
   0x7   : > { %177 = sbr.rel (%p174_p3) target bundleno = 179 (0xb3), region = 28  ;;  %550 = vset.pattern.permute.xlu1 (!%p174_p3), %v575_v0  ;;  %549 = vset.pattern.permute.xlu0 (!%p174_p3), %v575_v0  ;;  %v312_v40 = vunpack.c.l.s4 (!%p174_p3), %v576_v39 }
   0x8   : > { %v315_v51 = vshrl.u32 (!%p174_p3), %v314_v41, 7  ;;  %vm328_vm0 = vcmp.lt.s32.totalorder (!%p174_p3), %v314_v41, 256 }
   0x9   : > { %v313_v50 = vunpack.c.0.s8 (!%p174_p3), %v312_v40 }
   0xb   : > { %v316_v60 = vsub.s32 (!%p174_p3), %v313_v50, %v315_v51 }
   0xe   : > { %s650_s12 = smov (!%p218_p4, %s565_s12), 1 }
   0xf   : > { %s522_s16 = sshll.u32 %s650_s12, 5  ;;  %s521_s20 = sshll.u32 %s650_s12, 6 }
  0x10   : > { %s231_s19 = scalar_lea.vmem %s642_s1, %s522_s16  ;;  %s225_s23 = scalar_lea.vmem %s641_s0, %s521_s20 }
  0x11   : > { %v260_v1 = vld [vmem:[%s231_s19 + $0x10] sm:$0xff]  ;;  %v258_v2 = vld [vmem:[%s231_s19] sm:$0xff]  ;;  %v261_v3 = vld [vmem:[%s231_s19 + $0x18] sm:$0xff]  ;;  %s517_s24 = sshll.u32 %s650_s12, 1 }
  0x12   : > { %274 = vperm.xlu1 %550, %v260_v1   ;;  %264 = vperm.xlu0 %549, %v258_v2   ;;  %v259_v4 = vld [vmem:[%s231_s19 + $0x8] sm:$0xff]  ;;  %v254_v5 = vld [vmem:[%s225_s23 + $0x20] sm:$0xff]  ;;  %v256_v11 = vld [vmem:[%s225_s23 + $0x30] sm:$0xff]  ;;  %s239_s27 = scalar_lea.vmem %s643_s2, %s517_s24  ;;  %s248_s30 = scalar_lea.vmem %s644_s3, %s517_s24 }
  0x13   : > { %v255_v6 = vld [vmem:[%s225_s23 + $0x28] sm:$0xff]  ;;  %v250_v7 = vld [vmem:[%s225_s23] sm:$0xff]  ;;  %v257_v16 = vld [vmem:[%s225_s23 + $0x38] sm:$0xff] }
  0x14   : > { %v251_v8 = vld [vmem:[%s225_s23 + $0x8] sm:$0xff]  ;;  %v252_v17 = vld [vmem:[%s225_s23 + $0x10] sm:$0xff]  ;;  %v253_v18 = vld [vmem:[%s225_s23 + $0x18] sm:$0xff] }
  0x16   : > { %279 = vperm.xlu1 %550, %v261_v3   ;;  %269 = vperm.xlu0 %549, %v259_v4  }
  0x91   : > { %v275_v9 = vpop.permute.xlu1 %274  ;;  %v265_v10 = vpop.permute.xlu0 %264 }
  0x92   : > { %v286_v12 = vmul.f32 %v275_v9, %v254_v5  ;;  %v287_v13 = vmul.f32 %v275_v9, %v255_v6  ;;  %v282_v14 = vmul.f32 %v265_v10, %v250_v7  ;;  %v283_v15 = vmul.f32 %v265_v10, %v251_v8 }
  0x94   : > { %v290_v25 = vmax.f32 %v282_v14, %v286_v12  ;;  %v299_v26 = vmax.f32 %v283_v15, %v287_v13 }
  0x95   : > { %v280_v19 = vpop.permute.xlu1 %279  ;;  %v270_v20 = vpop.permute.xlu0 %269 }
  0x96   : > { %v288_v21 = vmul.f32 %v280_v19, %v256_v11  ;;  %v289_v22 = vmul.f32 %v280_v19, %v257_v16  ;;  %v284_v23 = vmul.f32 %v270_v20, %v252_v17  ;;  %v285_v24 = vmul.f32 %v270_v20, %v253_v18 }
  0x98   : > { %v291_v27 = vmax.f32 %v284_v23, %v288_v21  ;;  %v300_v28 = vmax.f32 %v285_v24, %v289_v22  ;;  %v331_v29 = vadd.f32 %v284_v23, %v282_v14  ;;  %v340_v30 = vadd.f32 %v285_v24, %v283_v15 }
  0x9a   : > { %v292_v31 = vmax.f32 %v290_v25, %v291_v27  ;;  %v301_v32 = vmax.f32 %v299_v26, %v300_v28  ;;  %v332_v33 = vadd.f32 %v331_v29, %v286_v12  ;;  %v341_v34 = vadd.f32 %v340_v30, %v287_v13 }
  0x9c   : > { %v293_v35 = vrot.slane %v292_v31, 4  ;;  %v302_v36 = vrot.slane %v301_v32, 4  ;;  %v333_v37 = vadd.f32 %v332_v33, %v288_v21  ;;  %v342_v38 = vadd.f32 %v341_v34, %v289_v22 }
  0x9e   : > { %v294_v42 = vmax.f32 %v292_v31, %v293_v35  ;;  %v303_v43 = vmax.f32 %v301_v32, %v302_v36  ;;  %v334_v44 = vrot.slane %v333_v37, 4  ;;  %v343_v45 = vrot.slane %v342_v38, 4 }
  0xa0   : > { %v295_v46 = vrot.slane %v294_v42, 2  ;;  %v304_v47 = vrot.slane %v303_v43, 2  ;;  %v335_v48 = vadd.f32 %v334_v44, %v333_v37  ;;  %v344_v49 = vadd.f32 %v343_v45, %v342_v38 }
  0xa2   : > { %v296_v52 = vmax.f32 %v294_v42, %v295_v46  ;;  %v305_v53 = vmax.f32 %v303_v43, %v304_v47  ;;  %v336_v54 = vrot.slane %v335_v48, 2  ;;  %v345_v55 = vrot.slane %v344_v49, 2 }
  0xa4   : > { %v297_v56 = vrot.slane %v296_v52, 1  ;;  %v306_v57 = vrot.slane %v305_v53, 1  ;;  %v337_v58 = vadd.f32 %v336_v54, %v335_v48  ;;  %v346_v59 = vadd.f32 %v345_v55, %v344_v49 }
  0xa6   : > { %v298_v61 = vmax.f32 %v296_v52, %v297_v56  ;;  %v307_v62 = vmax.f32 %v305_v53, %v306_v57  ;;  %v338_v63 = vrot.slane %v337_v58, 1  ;;  %v347_v0 = vrot.slane %v346_v59, 1 }
  0xa8   : > { %v310_v1 = vcombine.low %v298_v61, %v307_v62  ;;  %v339_v2 = vadd.f32 %v338_v63, %v337_v58  ;;  %v348_v3 = vadd.f32 %v347_v0, %v346_v59 }
  0xaa   : > { %v317_v4 = vrot.slane %v310_v1, %v316_v60  ;;  %v350_v5 = vmul.f32 0.03125, %v339_v2  ;;  %v351_v6 = vmul.f32 0.03125, %v348_v3 }
  0xac   : > { %v324_v7 = vrot.slane %v317_v4, %v316_v60  ;;  %v354_v8 = vcombine.low %v350_v5, %v351_v6 }
  0xae   : > { %330 = vst.msk [vmem:[%s239_s27] sm:$0x3] %vm328_vm0, %v324_v7  ;;  %v361_v9 = vrot.slane %v354_v8, %v316_v60 }
  0xb0   : > { %v368_v10 = vrot.slane %v361_v9, %v316_v60 }
  0xb2   : > { %370 = vst.msk [vmem:[%s248_s30] sm:$0x3] %vm328_vm0, %v368_v10 }
  0xb3 PF: > { %s14_s14 = sadd.s32 1, %s573_s14   ;;  %s645_s12 = smov %s569_s13 }
  0xb4   : > { %p11_p5 = scmp.ge.s32.totalorder %s14_s14, 4   ;;  %s646_s13 = smov %s648_s15 }
  0xb6   :  { %13 = sbr.rel (!%p11_p5) target bundleno = 2 (0x2), region = 73 }

// kernel: cbam_forward.6
= control target key start
LH: loop header
LB: loop body
LE: loop exit
PB: predicated region body
PF: predicated region fallthrough
CT: control target
= control target key end

     0   :  { %v429_v0 = vmov 0.0|0.0   ;;  %vm430_vm0 = vmmov 0   ;;  %v431_v6 = vmov 0.0   ;;  %vm35_vm1 = vcmask 261120   ;;  %s501_s2 = inlined_call_operand.vmem [shape: f32[32,2], index: 2, kind: input, shape index: {}]   ;;  %s502_s0 = inlined_call_operand.vmem [shape: f32[2,32], index: 0, kind: input, shape index: {}]   ;;  %s503_s1 = inlined_call_operand.vmem [shape: f32[2,32], index: 1, kind: input, shape index: {}]   ;;  %s504_s4 = inlined_call_operand.vmem [shape: f32[2,32], index: 4, kind: input, shape index: {}]   ;;  %s505_s3 = inlined_call_operand.vmem [shape: f32[1,2], index: 3, kind: input, shape index: {}]   ;;  %s506_s5 = inlined_call_operand.vmem [shape: f32[1,32], index: 5, kind: input, shape index: {}]   ;;  %s507_s6 = inlined_call_operand.vmem [shape: f32[2,32], index: 6, kind: output, shape index: {}]  }
   0x1   :  { %409 = vmatprep.subr.bf16.mxu0 %v429_v0  ;;  %v24_v1 = vld [vmem:[%s501_s2] sm:$0xff]  ;;  %v25_v2 = vld [vmem:[%s501_s2 + $0x8] sm:$0xff]  ;;  %415 = vmatprep.subr.bf16.mxu1 %v429_v0  ;;  %v26_v3 = vld [vmem:[%s501_s2 + $0x10] sm:$0xff]  ;;  %vm122_vm2 = vcmask 1041408   ;;  %vm118_vm3 = vcmask 15360   ;;  %vm349_vm4 = vcmask 254976  }
   0x2   :  { %v410_v4 = vpack.c.bf16 %v25_v2, %v24_v1  ;;  %v27_v5 = vld [vmem:[%s501_s2 + $0x18] sm:$0xff]  ;;  %385 = vmatprep.mubr.msk.f32.mxu0 %vm430_vm0, %v431_v6  ;;  %401 = vmatprep.mubr.msk.f32.mxu1 %vm430_vm0, %v431_v6  ;;  %v23_v8 = vld [vmem:[%s502_s0] sm:$0x3] }
   0x3   :  { %v413_v7 = vpack.c.bf16 %v27_v5, %v26_v3  ;;  %v196_v9 = vld [vmem:[%s503_s1] sm:$0x3] }
   0x4   :  { %411 = vmatpush3.bf16.msra.mxu0 %v410_v4  ;;  %417 = vmatpush3.bf16.msra.mxu1 %v410_v4  ;;  %v110_v10 = vld [vmem:[%s504_s4] sm:$0x3] }
   0x5   :  { %412 = vmatprep.subr.bf16.mxu0 %v429_v0  ;;  %418 = vmatprep.subr.bf16.mxu1 %v429_v0  ;;  %v355_v11 = vld [vmem:[%s505_s3] ss:$0 sm:$0xff] }
   0x6   :  { %v357_v20 = vld [vmem:[%s506_s5] ss:$0 sm:$0xff] }
   0x7   :  { %v421_v21 = vadd.f32 %v357_v20, %v357_v20 }
   0x8   :  { %414 = vmatpush3.bf16.msra.mxu0 %v413_v7  ;;  %420 = vmatpush3.bf16.msra.mxu1 %v413_v7 }
   0x9   :  { %388 = vmatprep.subr.mxu0 %v431_v6  ;;  %404 = vmatprep.subr.mxu1 %v431_v6 }
   0xb   :  { %386 = vmatmul.mubr.msk.f32.vlgmr.msra.gmra.mrb[0].mxu0 %vm35_vm1, %v23_v8  ;;  %402 = vmatmul.mubr.msk.f32.vlgmr.msra.gmra.mrb[0].mxu1 %vm35_vm1, %v196_v9 }
   0xc   :  { %390 = vmatprep.mubr.msk.f32.mxu0 %vm430_vm0, %v431_v6  ;;  %406 = vmatprep.mubr.msk.f32.mxu1 %vm430_vm0, %v431_v6 }
   0xd   :  { %389 = vmatpush3.msk.msra.mxu0 %vm122_vm2, %v110_v10  ;;  %405 = vmatpush3.msk.msra.mxu1 %vm122_vm2, %v110_v10 }
  0xde   :  { %v105_v12 = vpop.f32.mrb[0].mxu0  ;;  %v266_v13 = vpop.f32.mrb[0].mxu1 }
  0xdf   :  { %v106_v14 = vadd.f32 %v355_v11, %v105_v12  ;;  %v387_v15 = vpop.f32.mrb[1].mxu0  ;;  %v267_v16 = vadd.f32 %v355_v11, %v266_v13  ;;  %v403_v17 = vpop.f32.mrb[1].mxu1 }
  0xe1   :  { %v109_v18 = vmax.f32 %v106_v14, 0.0  ;;  %v270_v19 = vmax.f32 %v267_v16, 0.0 }
  0xe3   :  { %391 = vmatmul.mubr.msk.f32.vlgmr.msra.gmra.mrb[2].mxu0 %vm118_vm3, %v109_v18  ;;  %407 = vmatmul.mubr.msk.f32.vlgmr.msra.gmra.mrb[2].mxu1 %vm118_vm3, %v270_v19 }
 0x1b6   :  { %v192_v22 = vpop.f32.mrb[2].mxu0  ;;  %v340_v23 = vpop.f32.mrb[2].mxu1 }
 0x1b7   :  { %v422_v24 = vadd.f32 %v421_v21, %v192_v22  ;;  %v392_v25 = vpop.f32.mrb[3].mxu0  ;;  %v408_v26 = vpop.f32.mrb[3].mxu1 }
 0x1b9   :  { %v423_v27 = vadd.f32 %v422_v24, %v340_v23 }
 0x1bb   :  { %v345_v28 = vmul.f32 0.5, %v423_v27 }
 0x1bd   :  { %427 = vtanh.f32 %v345_v28 }
 0x1c7   :  { %v428_v29 = vpop.eup %427 }
 0x1c8   :  { %v347_v30 = vadd.f32 1.0, %v428_v29 }
 0x1ca   :  { %v348_v31 = vmul.f32 0.5, %v347_v30 }
 0x1cc   :  { %350 = vst.msk [vmem:[%s507_s6] sm:$0x3] %vm349_vm4, %v348_v31 }

// kernel: cbam_forward.9
= control target key start
LH: loop header
LB: loop body
LE: loop exit
PB: predicated region body
PF: predicated region fallthrough
CT: control target
= control target key end

     0   :  { %9 = vsyncpa [#allocation3], 0  ;;  %s638_s15 = smov 0   ;;  %s640_s16 = smov 0   ;;  %s708_s0 = inlined_call_operand.vmem [shape: f32[2], index: 0, kind: input, shape index: {}]   ;;  %s709_s1 = inlined_call_operand.vmem [shape: f32[2,32,256], index: 1, kind: input, shape index: {}]   ;;  %s710_s2 = inlined_call_operand.vmem [shape: f32[2,32,1], index: 2, kind: input, shape index: {}]   ;;  %s711_s3 = inlined_call_operand.vmem [shape: f32[2,1,256], index: 3, kind: input, shape index: {}]   ;;  %s712_s4 = inlined_call_operand.vmem [shape: f32[2,32,256], index: 4, kind: output, shape index: {}]  }
   0x1   :  { %s642_s17 = smov 0  }
   0x2 LB: > { %s508_s18 = sadd.s32 4294967295, %s609_s17   ;;  %s27_s19 = sadd.s32 1, %s605_s16  ;;  %s609_s17 = sphi %s642_s17, %s15_s17   ;;  %s605_s16 = sphi %s640_s16, %s716_s16   ;;  %s601_s15 = sphi %s638_s15, %s715_s15  }
   0x3   : > { %p29_p0 = scmp.ge.s32.totalorder %s27_s19, 2  ;;  %p510_p1 = scmp.ge.s32.totalorder %s609_s17, 1 }
   0x4   : > { %p163_p2 = scmp.lt.s32.totalorder %s609_s17, 3  ;;  %p663_p4 = scmp.eq.s32.totalorder %s508_s18, 0 }
   0x5   : > { %s718_s19 = smov (%p29_p0, %s27_s19), 0  ;;  %s176_s24 = sshll.u32 %s708_s0, 4  ;;  %s177_s24 = int_to_ptr.vmem [resolvable:$true] %s176_s24 }
   0x6   : > { %p659_p3 = pnand %p510_p1, %p163_p2  ;;  %s568_s25 = scalar_lea.vmem %s177_s24, 16 }
   0x7   : > { %p569_p7 = scmp.ne.s32.totalorder %s177_s24, %s568_s25  ;;  %p576_p11 = scmp.lt.s32.totalorder %s177_s24, %s177_s24 }
   0x8   : > { %p532_p5 = pneg %p659_p3  ;;  %p577_p12 = scmp.lt.s32.totalorder %s568_s25, %s568_s25 }
   0xa   : > { %p533_p6 = pnand %p663_p4, %p532_p5  ;;  %p578_p13 = por %p577_p12, %p576_p11 }
   0xc   : > { %p570_p8 = pneg %p533_p6 }
   0xe   : > { %p571_p9 = pnand %p570_p8, %p569_p7 }
  0x10   : > { %p572_p10 = pneg %p571_p9 }
  0x12   : > { %p579_p0 = pnand %p578_p13, %p572_p10 }
  0x14   : > { %582 = shalt.err (!%p579_p0)
}
  0x15   : > { %s611_s26 = smov [#allocation2]   ;;  %222 = sbr.rel (%p659_p3) target bundleno = 175 (0xaf), region = 36 }
  0x16   : > { %535 = dma.vmem_to_smem (!%p533_p6), %s177_s24, 16, %s611_s26, [#allocation3]  }
  0x1c   : > { %596 = dma.done.wait (%p663_p4), [#allocation3], 16  }
  0x1d   : > { %598 = vsyncadd (%p663_p4), [#allocation3], 4294967280 }
  0x1e   : > { %228 = sfence }
  0x1f   : > { %p271_p1 = scmp.lt.s32.totalorder %s601_s15, 1  ;;  %v612_v0 = vmov 0   ;;  %s304_s5 = sld [smem:[#allocation2]]  ;;  %v356_v11 = vlaneseq }
  0x20   : > { %565 = vset.pattern.permute.xlu1 %v612_v0  ;;  %564 = vset.pattern.permute.xlu0 %v612_v0  ;;  %s522_s7 = sld [smem:[#allocation2 + $0x1]] }
  0x21   : > { %s720_s15 = smov (!%p271_p1, %s601_s15), 1  ;;  %v357_v14 = vshrl.u32 %v356_v11, 7 }
  0x22   : > { %s526_s27 = sshll.u32 %s720_s15, 5  ;;  %s519_s6 = sshll.u32 %s720_s15, 1 }
  0x23   : > { %s284_s30 = scalar_lea.vmem %s710_s2, %s526_s27  ;;  %s292_s10 = scalar_lea.vmem %s711_s3, %s519_s6  ;;  %v358_v16 = vsub.s32 0, %v357_v14  ;;  %v362_v17 = vsub.s32 1, %v357_v14 }
  0x24   : > { %v325_v1 = vld [vmem:[%s284_s30 + $0x10] sm:$0xff]  ;;  %v323_v2 = vld [vmem:[%s284_s30] sm:$0xff]  ;;  %v326_v3 = vld [vmem:[%s284_s30 + $0x18] sm:$0xff]  ;;  %s525_s11 = sshll.u32 %s720_s15, 6 }
  0x25   : > { %339 = vperm.xlu1 %565, %v325_v1   ;;  %329 = vperm.xlu0 %564, %v323_v2   ;;  %v324_v4 = vld [vmem:[%s284_s30 + $0x8] sm:$0xff]  ;;  %v306_v5 = vld [vmem:[%s292_s10] sm:$0x3]  ;;  %v307_v6 = vstv %s304_s5  ;;  %s278_s14 = scalar_lea.vmem %s709_s1, %s525_s11  ;;  %s302_s20 = scalar_lea.vmem %s712_s4, %s525_s11 }
  0x26   : > { %v308_v7 = vmul.f32 %v307_v6, %v306_v5  ;;  %v309_v8 = vstv %s522_s7  ;;  %v319_v18 = vld [vmem:[%s278_s14 + $0x20] sm:$0xff]  ;;  %v320_v19 = vld [vmem:[%s278_s14 + $0x28] sm:$0xff]  ;;  %v321_v30 = vld [vmem:[%s278_s14 + $0x30] sm:$0xff] }
  0x27   : > { %v315_v20 = vld [vmem:[%s278_s14] sm:$0xff]  ;;  %v316_v21 = vld [vmem:[%s278_s14 + $0x8] sm:$0xff]  ;;  %v322_v31 = vld [vmem:[%s278_s14 + $0x38] sm:$0xff] }
  0x28   : > { %v310_v9 = vadd.f32 %v309_v8, %v308_v7  ;;  %v317_v32 = vld [vmem:[%s278_s14 + $0x10] sm:$0xff]  ;;  %v318_v33 = vld [vmem:[%s278_s14 + $0x18] sm:$0xff] }
  0x29   : > { %344 = vperm.xlu1 %565, %v326_v3   ;;  %334 = vperm.xlu0 %564, %v324_v4  }
  0x2a   : > { %v311_v10 = vmul.f32 0.5, %v310_v9 }
  0x2c   : > { %566 = vtanh.f32 %v311_v10 }
  0x36   : > { %v567_v12 = vpop.eup %566 }
  0x37   : > { %v313_v13 = vadd.f32 1.0, %v567_v12 }
  0x39   : > { %v314_v15 = vmul.f32 0.5, %v313_v13 }
  0x3b   : > { %v359_v22 = vrot.slane %v314_v15, %v358_v16  ;;  %v363_v23 = vrot.slane %v314_v15, %v362_v17 }
  0xa4   : > { %v340_v24 = vpop.permute.xlu1 %339  ;;  %v330_v25 = vpop.permute.xlu0 %329 }
  0xa5   : > { %v351_v26 = vmul.f32 %v340_v24, %v319_v18  ;;  %v352_v27 = vmul.f32 %v340_v24, %v320_v19  ;;  %v347_v28 = vmul.f32 %v330_v25, %v315_v20  ;;  %v348_v29 = vmul.f32 %v330_v25, %v316_v21 }
  0xa7   : > { %v370_v34 = vmul.f32 %v359_v22, %v351_v26  ;;  %v371_v35 = vmul.f32 %v363_v23, %v352_v27  ;;  %v366_v36 = vmul.f32 %v359_v22, %v347_v28  ;;  %v367_v37 = vmul.f32 %v363_v23, %v348_v29 }
  0xa8   : > { %v345_v38 = vpop.permute.xlu1 %344  ;;  %v335_v39 = vpop.permute.xlu0 %334 }
  0xa9   : > { %378 = vst [vmem:[%s302_s20 + $0x20] sm:$0xff] %v370_v34  ;;  %379 = vst [vmem:[%s302_s20 + $0x28] sm:$0xff] %v371_v35  ;;  %v353_v40 = vmul.f32 %v345_v38, %v321_v30  ;;  %v354_v41 = vmul.f32 %v345_v38, %v322_v31  ;;  %v349_v42 = vmul.f32 %v335_v39, %v317_v32 }
  0xaa   : > { %374 = vst [vmem:[%s302_s20] sm:$0xff] %v366_v36  ;;  %375 = vst [vmem:[%s302_s20 + $0x8] sm:$0xff] %v367_v37  ;;  %v350_v43 = vmul.f32 %v335_v39, %v318_v33 }
  0xab   : > { %v372_v44 = vmul.f32 %v359_v22, %v353_v40  ;;  %v373_v45 = vmul.f32 %v363_v23, %v354_v41  ;;  %v368_v46 = vmul.f32 %v359_v22, %v349_v42 }
  0xac   : > { %v369_v47 = vmul.f32 %v363_v23, %v350_v43 }
  0xad   : > { %380 = vst [vmem:[%s302_s20 + $0x30] sm:$0xff] %v372_v44  ;;  %381 = vst [vmem:[%s302_s20 + $0x38] sm:$0xff] %v373_v45 }
  0xae   : > { %376 = vst [vmem:[%s302_s20 + $0x10] sm:$0xff] %v368_v46  ;;  %377 = vst [vmem:[%s302_s20 + $0x18] sm:$0xff] %v369_v47 }
  0xaf PF: > { %s15_s17 = sadd.s32 1, %s609_s17   ;;  %s715_s15 = smov %s605_s16 }
  0xb0   : > { %p12_p2 = scmp.ge.s32.totalorder %s15_s17, 4   ;;  %s716_s16 = smov %s718_s19 }
  0xb2   :  { %14 = sbr.rel (!%p12_p2) target bundleno = 2 (0x2), region = 77 }
  0xb9   :  { %412 = vsyncpa [#allocation3], 1 }
  0xba   :  { %414 = vsyncpa [#allocation3 + $0x1], 1 }

// kernel: cbam_forward.8
= control target key start
LH: loop header
LB: loop body
LE: loop exit
PB: predicated region body
PF: predicated region fallthrough
CT: control target
= control target key end

     0   :  { %7 = vsyncpa [#allocation3], 0  ;;  %s1716_s9 = smov 0   ;;  %s2309_s0 = inlined_call_operand.vmem [shape: f32[98], index: 0, kind: input, shape index: {}]   ;;  %s2310_s1 = inlined_call_operand.vmem [shape: f32[2,2,22,22], index: 1, kind: input, shape index: {}]   ;;  %s2311_s2 = inlined_call_operand.vmem [shape: f32[2,16,16], index: 2, kind: output, shape index: {}]  }
   0x1 LB: > { %s1517_s10 = sadd.s32 4294967295, %s1692_s9   ;;  %p1519_p0 = scmp.ge.s32.totalorder %s1692_s9, 1  ;;  %s1692_s9 = sphi %s1716_s9, %s13_s9  }
   0x2   : > { %p91_p1 = scmp.lt.s32.totalorder %s1692_s9, 3  ;;  %s104_s13 = sshll.u32 %s2309_s0, 4  ;;  %s105_s13 = int_to_ptr.vmem [resolvable:$true] %s104_s13 }
   0x3   : > { %p1650_p3 = scmp.eq.s32.totalorder %s1517_s10, 0  ;;  %s1667_s15 = scalar_lea.vmem %s105_s13, 16 }
   0x4   : > { %p1727_p2 = pnand %p1519_p0, %p91_p1  ;;  %p1668_p6 = scmp.ne.s32.totalorder %s105_s13, %s1667_s15 }
   0x5   : > { %p1675_p10 = scmp.lt.s32.totalorder %s105_s13, %s105_s13  ;;  %p1676_p11 = scmp.lt.s32.totalorder %s1667_s15, %s1667_s15 }
   0x6   : > { %p1646_p4 = pneg %p1727_p2 }
   0x7   : > { %p1677_p12 = por %p1676_p11, %p1675_p10 }
   0x8   : > { %p1647_p5 = pnand %p1650_p3, %p1646_p4 }
   0xa   : > { %p1669_p7 = pneg %p1647_p5 }
   0xc   : > { %p1670_p8 = pnand %p1669_p7, %p1668_p6 }
   0xe   : > { %p1671_p9 = pneg %p1670_p8 }
  0x10   : > { %p1678_p13 = pnand %p1677_p12, %p1671_p9 }
  0x12   : > { %1681 = shalt.err (!%p1678_p13)
}
  0x13   : > { %s1694_s16 = smov [#allocation2]   ;;  %125 = sbr.rel (%p1727_p2) target bundleno = 489 (0x1e9), region = 28 }
  0x14   : > { %1649 = dma.vmem_to_smem (!%p1647_p5), %s105_s13, 16, %s1694_s16, [#allocation3]  }
  0x1a   : > { %1687 = dma.done.wait (%p1650_p3), [#allocation3], 16  }
  0x1b   : > { %1689 = vsyncadd (%p1650_p3), [#allocation3], 4294967280 }
  0x1c   : > { %131 = sfence }
  0x1d   : > { %p148_p0 = scmp.lt.s32.totalorder %s1517_s10, 1  ;;  %s1528_s17 = sld [smem:[#allocation2 + $0x2]]  ;;  %vm1447_vm0 = vcmask 130048  }
  0x1e   : > { %s1527_s18 = sld [smem:[#allocation2 + $0x1]]  ;;  %s1529_s19 = sld [smem:[#allocation2 + $0x3]] }
  0x1f   : > { %s2314_s10 = smov (!%p148_p0, %s1517_s10), 1  ;;  %s1530_s24 = sld [smem:[#allocation2 + $0x4]] }
  0x20   : > { %s1641_s20 = smul.u32 48, %s2314_s10  ;;  %s1695_s25 = smov 126  }
  0x21   : > { %s1696_s26 = smov 127   ;;  %s1531_s27 = sld [smem:[#allocation2 + $0x5]] }
  0x22   : > { %s1744_s23 = scalar_lea.vmem %s2310_s1, %s1641_s20  ;;  %s1532_s28 = sld [smem:[#allocation2 + $0x6]] }
  0x23   : > { %v181_v0 = vstv %s1528_s17  ;;  %v1747_v1 = vld [vmem:[%s1744_s23] sm:$0xff]  ;;  %v1750_v2 = vld [vmem:[%s1744_s23 + $0x8] sm:$0xff]  ;;  %s1697_s29 = smov 125   ;;  %s1534_s30 = sld [smem:[#allocation2 + $0x8]] }
  0x24   : > { %v167_v3 = vstv %s1527_s18  ;;  %v182_v4 = vmul.f32 %v181_v0, %v1747_v1  ;;  %v183_v6 = vmul.f32 %v181_v0, %v1750_v2  ;;  %v195_v8 = vstv %s1529_s19  ;;  %s1698_s3 = smov 124   ;;  %s1535_s4 = sld [smem:[#allocation2 + $0x9]]  ;;  %v1775_v20 = vld [vmem:[%s1744_s23 + $0x9] sm:$0xff]  ;;  %v1778_v22 = vld [vmem:[%s1744_s23 + $0x1] sm:$0xff] }
  0x25   : > { %v168_v5 = vmul.f32 %v167_v3, %v1747_v1  ;;  %v169_v7 = vmul.f32 %v167_v3, %v1750_v2  ;;  %v197_v9 = vmul.f32 %v195_v8, %v1750_v2  ;;  %v196_v10 = vmul.f32 %v195_v8, %v1747_v1  ;;  %s1699_s5 = smov 123   ;;  %s1536_s6 = sld [smem:[#allocation2 + $0xa]]  ;;  %v1805_v40 = vld [vmem:[%s1744_s23 + $0xa] sm:$0xff]  ;;  %v1808_v42 = vld [vmem:[%s1744_s23 + $0x2] sm:$0xff] }
  0x26   : > { %186 = vrot.lane.b32.xlu1 %v182_v4, %s1695_s25  ;;  %v209_v11 = vstv %s1530_s24  ;;  %s1700_s7 = smov 122   ;;  %s1537_s8 = sld [smem:[#allocation2 + $0xb]]  ;;  %v1835_v60 = vld [vmem:[%s1744_s23 + $0xb] sm:$0xff]  ;;  %v1838_v62 = vld [vmem:[%s1744_s23 + $0x3] sm:$0xff] }
  0x27   : > { %172 = vrot.lane.b32.xlu0 %v168_v5, %s1696_s26  ;;  %v211_v12 = vmul.f32 %v209_v11, %v1750_v2  ;;  %v210_v13 = vmul.f32 %v209_v11, %v1747_v1  ;;  %v223_v14 = vstv %s1531_s27  ;;  %s1538_s11 = sld [smem:[#allocation2 + $0xc]]  ;;  %s1539_s12 = sld [smem:[#allocation2 + $0xd]] }
  0x28   : > { %v225_v15 = vmul.f32 %v223_v14, %v1750_v2  ;;  %v224_v16 = vmul.f32 %v223_v14, %v1747_v1  ;;  %v237_v17 = vstv %s1532_s28  ;;  %s1541_s13 = sld [smem:[#allocation2 + $0xf]]  ;;  %s1542_s14 = sld [smem:[#allocation2 + $0x10]] }
  0x29   : > { %v239_v18 = vmul.f32 %v237_v17, %v1750_v2  ;;  %v238_v19 = vmul.f32 %v237_v17, %v1747_v1  ;;  %v259_v21 = vstv %s1534_s30  ;;  %s1543_s15 = sld [smem:[#allocation2 + $0x11]]  ;;  %s1544_s16 = sld [smem:[#allocation2 + $0x12]] }
  0x2a   : > { %188 = vrot.lane.b32.xlu1 %v183_v6, %s1695_s25  ;;  %v261_v23 = vmul.f32 %v259_v21, %v1775_v20  ;;  %v260_v24 = vmul.f32 %v259_v21, %v1778_v22  ;;  %v273_v25 = vstv %s1535_s4  ;;  %s1545_s17 = sld [smem:[#allocation2 + $0x13]]  ;;  %s1546_s18 = sld [smem:[#allocation2 + $0x14]]  ;;  %v1868_v21 = vld [vmem:[%s1744_s23 + $0x4] sm:$0xff] }
  0x2b   : > { %174 = vrot.lane.b32.xlu0 %v169_v7, %s1696_s26  ;;  %v275_v26 = vmul.f32 %v273_v25, %v1775_v20  ;;  %v274_v27 = vmul.f32 %v273_v25, %v1778_v22  ;;  %v287_v28 = vstv %s1536_s6  ;;  %s1548_s19 = sld [smem:[#allocation2 + $0x16]]  ;;  %s1549_s20 = sld [smem:[#allocation2 + $0x17]] }
  0x2c   : > { %v289_v29 = vmul.f32 %v287_v28, %v1775_v20  ;;  %v288_v30 = vmul.f32 %v287_v28, %v1778_v22  ;;  %v301_v31 = vstv %s1537_s8  ;;  %s1550_s21 = sld [smem:[#allocation2 + $0x18]]  ;;  %s1551_s22 = sld [smem:[#allocation2 + $0x19]] }
  0x2d   : > { %v303_v32 = vmul.f32 %v301_v31, %v1775_v20  ;;  %v302_v33 = vmul.f32 %v301_v31, %v1778_v22  ;;  %v315_v34 = vstv %s1538_s11  ;;  %v329_v37 = vstv %s1539_s12  ;;  %s1552_s24 = sld [smem:[#allocation2 + $0x1a]]  ;;  %s1553_s27 = sld [smem:[#allocation2 + $0x1b]] }
  0x2e   : > { %202 = vrot.lane.b32.xlu1 %v197_v9, %s1697_s29  ;;  %v317_v35 = vmul.f32 %v315_v34, %v1775_v20  ;;  %v316_v36 = vmul.f32 %v315_v34, %v1778_v22  ;;  %v331_v38 = vmul.f32 %v329_v37, %v1775_v20  ;;  %v330_v39 = vmul.f32 %v329_v37, %v1778_v22  ;;  %s1555_s28 = sld [smem:[#allocation2 + $0x1d]]  ;;  %s1556_s30 = sld [smem:[#allocation2 + $0x1e]] }
  0x2f   : > { %200 = vrot.lane.b32.xlu0 %v196_v10, %s1697_s29  ;;  %v351_v41 = vstv %s1541_s13  ;;  %v365_v45 = vstv %s1542_s14  ;;  %v379_v48 = vstv %s1543_s15  ;;  %s1557_s4 = sld [smem:[#allocation2 + $0x1f]]  ;;  %s1558_s6 = sld [smem:[#allocation2 + $0x20]] }
  0x30   : > { %v353_v43 = vmul.f32 %v351_v41, %v1805_v40  ;;  %v352_v44 = vmul.f32 %v351_v41, %v1808_v42  ;;  %v367_v46 = vmul.f32 %v365_v45, %v1805_v40  ;;  %v366_v47 = vmul.f32 %v365_v45, %v1808_v42  ;;  %s1559_s8 = sld [smem:[#allocation2 + $0x21]]  ;;  %s1560_s11 = sld [smem:[#allocation2 + $0x22]]  ;;  %v1895_v41 = vld [vmem:[%s1744_s23 + $0xd] sm:$0xff] }
  0x31   : > { %v381_v49 = vmul.f32 %v379_v48, %v1805_v40  ;;  %v380_v50 = vmul.f32 %v379_v48, %v1808_v42  ;;  %v393_v51 = vstv %s1544_s16  ;;  %v407_v54 = vstv %s1545_s17  ;;  %s1562_s12 = sld [smem:[#allocation2 + $0x24]]  ;;  %s158_s13 = sld [smem:[#allocation2]] }
  0x32   : > { %216 = vrot.lane.b32.xlu1 %v211_v12, %s1698_s3  ;;  %v395_v52 = vmul.f32 %v393_v51, %v1805_v40  ;;  %v394_v53 = vmul.f32 %v393_v51, %v1808_v42  ;;  %v409_v55 = vmul.f32 %v407_v54, %v1805_v40  ;;  %v408_v56 = vmul.f32 %v407_v54, %v1808_v42  ;;  %s1563_s14 = sld [smem:[#allocation2 + $0x25]]  ;;  %s1564_s15 = sld [smem:[#allocation2 + $0x26]] }
  0x33   : > { %214 = vrot.lane.b32.xlu0 %v210_v13, %s1698_s3  ;;  %v421_v57 = vstv %s1546_s18  ;;  %v443_v61 = vstv %s1548_s19  ;;  %v457_v3 = vstv %s1549_s20  ;;  %s1565_s16 = sld [smem:[#allocation2 + $0x27]]  ;;  %s1912_s18 = sld [smem:[#allocation2 + $0x28]] }
  0x34   : > { %v423_v58 = vmul.f32 %v421_v57, %v1805_v40  ;;  %v422_v59 = vmul.f32 %v421_v57, %v1808_v42  ;;  %v445_v63 = vmul.f32 %v443_v61, %v1835_v60  ;;  %v444_v0 = vmul.f32 %v443_v61, %v1838_v62  ;;  %s1910_s17 = sld [smem:[#allocation2 + $0x7]]  ;;  %s1918_s19 = sld [smem:[#allocation2 + $0x29]] }
  0x35   : > { %v459_v4 = vmul.f32 %v457_v3, %v1835_v60  ;;  %v458_v5 = vmul.f32 %v457_v3, %v1838_v62  ;;  %v471_v6 = vstv %s1550_s21  ;;  %v485_v9 = vstv %s1551_s22  ;;  %s1926_s20 = sld [smem:[#allocation2 + $0x2b]]  ;;  %s1570_s21 = sld [smem:[#allocation2 + $0x2c]] }
  0x36   : > { %230 = vrot.lane.b32.xlu1 %v225_v15, %s1699_s5  ;;  %v473_v7 = vmul.f32 %v471_v6, %v1835_v60  ;;  %v472_v8 = vmul.f32 %v471_v6, %v1838_v62  ;;  %v487_v10 = vmul.f32 %v485_v9, %v1835_v60  ;;  %v486_v11 = vmul.f32 %v485_v9, %v1838_v62  ;;  %s1571_s22 = sld [smem:[#allocation2 + $0x2d]] }
  0x37   : > { %228 = vrot.lane.b32.xlu0 %v224_v16, %s1699_s5  ;;  %v499_v12 = vstv %s1552_s24  ;;  %v513_v15 = vstv %s1553_s27  ;;  %v549_v25 = vstv %s1556_s30  ;;  %s1572_s24 = sld [smem:[#allocation2 + $0x2e]]  ;;  %s1962_s30 = sld [smem:[#allocation2 + $0x30]] }
  0x38   : > { %v501_v13 = vmul.f32 %v499_v12, %v1835_v60  ;;  %v500_v14 = vmul.f32 %v499_v12, %v1838_v62  ;;  %v515_v16 = vmul.f32 %v513_v15, %v1835_v60  ;;  %v514_v17 = vmul.f32 %v513_v15, %v1838_v62  ;;  %s1954_s27 = sld [smem:[#allocation2 + $0xe]] }
  0x39   : > { %v563_v28 = vstv %s1557_s4  ;;  %v577_v31 = vstv %s1558_s6  ;;  %v591_v34 = vstv %s1559_s8  ;;  %v605_v37 = vstv %s1560_s11  ;;  %s1970_s4 = sld [smem:[#allocation2 + $0x32]]  ;;  %s1579_s6 = sld [smem:[#allocation2 + $0x33]] }
  0x3a   : > { %244 = vrot.lane.b32.xlu1 %v239_v18, %s1700_s7  ;;  %v1865_v18 = vld [vmem:[%s1744_s23 + $0xc] sm:$0xff]  ;;  %v641_v51 = vstv %s1563_s14  ;;  %v669_v3 = vstv %s1565_s16  ;;  %s1580_s8 = sld [smem:[#allocation2 + $0x34]]  ;;  %s1581_s11 = sld [smem:[#allocation2 + $0x35]] }
  0x3b   : > { %242 = vrot.lane.b32.xlu0 %v238_v19, %s1700_s7  ;;  %v535_v19 = vstv %s1555_s28  ;;  %v683_v12 = vstv %s1912_s18  ;;  %s1956_s28 = sld [smem:[#allocation2 + $0x2f]]  ;;  %s1588_s16 = sld [smem:[#allocation2 + $0x3a]] }
  0x3c   : > { %s2006_s14 = sld [smem:[#allocation2 + $0x37]]  ;;  %s1590_s18 = sld [smem:[#allocation2 + $0x3c]] }
  0x3e   : > { %266 = vrot.lane.b32.xlu1 %v261_v23, %s1696_s26  ;;  %v537_v23 = vmul.f32 %v535_v19, %v1865_v18 }
  0x3f   : > { %264 = vrot.lane.b32.xlu0 %v260_v24, %s1696_s26  ;;  %v536_v24 = vmul.f32 %v535_v19, %v1868_v21  ;;  %v685_v19 = vmul.f32 %v683_v12, %v1895_v41 }
  0x42   : > { %280 = vrot.lane.b32.xlu1 %v275_v26, %s1695_s25  ;;  %v551_v26 = vmul.f32 %v549_v25, %v1865_v18 }
  0x43   : > { %278 = vrot.lane.b32.xlu0 %v274_v27, %s1695_s25  ;;  %v550_v27 = vmul.f32 %v549_v25, %v1868_v21 }
  0x46   : > { %294 = vrot.lane.b32.xlu1 %v289_v29, %s1697_s29  ;;  %v565_v29 = vmul.f32 %v563_v28, %v1865_v18 }
  0x47   : > { %292 = vrot.lane.b32.xlu0 %v288_v30, %s1697_s29  ;;  %v564_v30 = vmul.f32 %v563_v28, %v1868_v21 }
  0x4a   : > { %308 = vrot.lane.b32.xlu1 %v303_v32, %s1698_s3  ;;  %v579_v32 = vmul.f32 %v577_v31, %v1865_v18 }
  0x4b   : > { %306 = vrot.lane.b32.xlu0 %v302_v33, %s1698_s3  ;;  %v578_v33 = vmul.f32 %v577_v31, %v1868_v21 }
  0x4e   : > { %322 = vrot.lane.b32.xlu1 %v317_v35, %s1699_s5  ;;  %v593_v35 = vmul.f32 %v591_v34, %v1865_v18 }
  0x4f   : > { %320 = vrot.lane.b32.xlu0 %v316_v36, %s1699_s5  ;;  %v592_v36 = vmul.f32 %v591_v34, %v1868_v21 }
  0x52   : > { %336 = vrot.lane.b32.xlu1 %v331_v38, %s1700_s7  ;;  %v607_v38 = vmul.f32 %v605_v37, %v1865_v18 }
  0x53   : > { %334 = vrot.lane.b32.xlu0 %v330_v39, %s1700_s7  ;;  %v606_v39 = vmul.f32 %v605_v37, %v1868_v21 }
  0x56   : > { %358 = vrot.lane.b32.xlu1 %v353_v43, %s1696_s26  ;;  %v627_v43 = vstv %s1562_s12  ;;  %s1998_s12 = sld [smem:[#allocation2 + $0x15]] }
  0x57   : > { %356 = vrot.lane.b32.xlu0 %v352_v44, %s1696_s26  ;;  %v1898_v44 = vld [vmem:[%s1744_s23 + $0x5] sm:$0xff]  ;;  %v629_v48 = vmul.f32 %v627_v43, %v1895_v41 }
  0x5a   : > { %372 = vrot.lane.b32.xlu1 %v367_v46, %s1695_s25 }
  0x5b   : > { %370 = vrot.lane.b32.xlu0 %v366_v47, %s1695_s25  ;;  %v161_v47 = vstv %s158_s13  ;;  %s2000_s13 = sld [smem:[#allocation2 + $0x36]] }
  0x5c   : > { %v162_v54 = vmul.f32 %v161_v47, %v1747_v1 }
  0x5e   : > { %386 = vrot.lane.b32.xlu1 %v381_v49, %s1697_s29  ;;  %v628_v49 = vmul.f32 %v627_v43, %v1898_v44 }
  0x5f   : > { %384 = vrot.lane.b32.xlu0 %v380_v50, %s1697_s29  ;;  %v163_v50 = vmul.f32 %v161_v47, %v1750_v2 }
  0x62   : > { %400 = vrot.lane.b32.xlu1 %v395_v52, %s1698_s3 }
  0x63   : > { %398 = vrot.lane.b32.xlu0 %v394_v53, %s1698_s3 }
  0x66   : > { %414 = vrot.lane.b32.xlu1 %v409_v55, %s1699_s5  ;;  %v643_v55 = vmul.f32 %v641_v51, %v1895_v41 }
  0x67   : > { %412 = vrot.lane.b32.xlu0 %v408_v56, %s1699_s5  ;;  %v642_v56 = vmul.f32 %v641_v51, %v1898_v44 }
  0x6a   : > { %428 = vrot.lane.b32.xlu1 %v423_v58, %s1700_s7  ;;  %v655_v58 = vstv %s1564_s15  ;;  %s2014_s15 = sld [smem:[#allocation2 + $0x39]] }
  0x6b   : > { %426 = vrot.lane.b32.xlu0 %v422_v59, %s1700_s7  ;;  %v657_v1 = vmul.f32 %v655_v58, %v1895_v41 }
  0x6e   : > { %450 = vrot.lane.b32.xlu1 %v445_v63, %s1696_s26  ;;  %v656_v63 = vmul.f32 %v655_v58, %v1898_v44 }
  0x6f   : > { %448 = vrot.lane.b32.xlu0 %v444_v0, %s1696_s26 }
  0x72   : > { %464 = vrot.lane.b32.xlu1 %v459_v4, %s1695_s25 }
  0x73   : > { %462 = vrot.lane.b32.xlu0 %v458_v5, %s1695_s25 }
  0x76   : > { %478 = vrot.lane.b32.xlu1 %v473_v7, %s1697_s29  ;;  %v671_v7 = vmul.f32 %v669_v3, %v1895_v41 }
  0x77   : > { %476 = vrot.lane.b32.xlu0 %v472_v8, %s1697_s29  ;;  %v670_v8 = vmul.f32 %v669_v3, %v1898_v44 }
  0x7a   : > { %492 = vrot.lane.b32.xlu1 %v487_v10, %s1698_s3 }
  0x7b   : > { %490 = vrot.lane.b32.xlu0 %v486_v11, %s1698_s3  ;;  %v253_v11 = vstv %s1910_s17  ;;  %s1589_s17 = sld [smem:[#allocation2 + $0x3b]] }
  0x7e   : > { %506 = vrot.lane.b32.xlu1 %v501_v13, %s1699_s5 }
  0x7f   : > { %504 = vrot.lane.b32.xlu0 %v500_v14, %s1699_s5 }
  0x82   : > { %520 = vrot.lane.b32.xlu1 %v515_v16, %s1700_s7 }
  0x83   : > { %518 = vrot.lane.b32.xlu0 %v514_v17, %s1700_s7  ;;  %v255_v17 = vmul.f32 %v253_v11, %v1775_v20 }
  0x86   : > { %542 = vrot.lane.b32.xlu1 %v537_v23, %s1696_s26  ;;  %v684_v23 = vmul.f32 %v683_v12, %v1898_v44 }
  0x87   : > { %540 = vrot.lane.b32.xlu0 %v536_v24, %s1696_s26 }
  0x8a   : > { %556 = vrot.lane.b32.xlu1 %v551_v26, %s1695_s25  ;;  %v254_v26 = vmul.f32 %v253_v11, %v1778_v22  ;;  %v1944_v22 = vld [vmem:[%s1744_s23 + $0x6] sm:$0xff] }
  0x8b   : > { %554 = vrot.lane.b32.xlu0 %v550_v27, %s1695_s25  ;;  %v697_v27 = vstv %s1918_s19  ;;  %s2042_s19 = sld [smem:[#allocation2 + $0x1c]] }
  0x8c   : > { %v699_v20 = vmul.f32 %v697_v27, %v1895_v41 }
  0x8e   : > { %570 = vrot.lane.b32.xlu1 %v565_v29, %s1697_s29 }
  0x8f   : > { %568 = vrot.lane.b32.xlu0 %v564_v30, %s1697_s29 }
  0x92   : > { %584 = vrot.lane.b32.xlu1 %v579_v32, %s1698_s3  ;;  %v698_v32 = vmul.f32 %v697_v27, %v1898_v44 }
  0x93   : > { %582 = vrot.lane.b32.xlu0 %v578_v33, %s1698_s3 }
  0x96   : > { %598 = vrot.lane.b32.xlu1 %v593_v35, %s1699_s5  ;;  %v1940_v35 = vld [vmem:[%s1744_s23 + $0xe] sm:$0xff] }
  0x97   : > { %596 = vrot.lane.b32.xlu0 %v592_v36, %s1699_s5  ;;  %v719_v36 = vstv %s1926_s20  ;;  %s2044_s20 = sld [smem:[#allocation2 + $0x3d]] }
  0x98   : > { %v187_v45 = vpop.permute.xlu1 %186  ;;  %v720_v43 = vmul.f32 %v719_v36, %v1944_v22 }
  0x99   : > { %v173_v46 = vpop.permute.xlu0 %172 }
  0x9a   : > { %612 = vrot.lane.b32.xlu1 %v607_v38, %s1700_s7  ;;  %v178_v61 = vadd.f32 %v173_v46, %v162_v54 }
  0x9b   : > { %610 = vrot.lane.b32.xlu0 %v606_v39, %s1700_s7  ;;  %v721_v39 = vmul.f32 %v719_v36, %v1940_v35 }
  0x9c   : > { %v189_v52 = vpop.permute.xlu1 %188  ;;  %v192_v6 = vadd.f32 %v187_v45, %v178_v61  ;;  %v733_v45 = vstv %s1570_s21  ;;  %s2050_s21 = sld [smem:[#allocation2 + $0x3e]] }
  0x9d   : > { %v175_v53 = vpop.permute.xlu0 %174 }
  0x9e   : > { %634 = vrot.lane.b32.xlu1 %v629_v48, %s1696_s26  ;;  %v179_v57 = vadd.f32 %v175_v53, %v163_v50  ;;  %v735_v48 = vmul.f32 %v733_v45, %v1940_v35  ;;  %v747_v50 = vstv %s1571_s22  ;;  %s2058_s22 = sld [smem:[#allocation2 + $0x40]] }
  0x9f   : > { %632 = vrot.lane.b32.xlu0 %v628_v49, %s1696_s26  ;;  %v734_v49 = vmul.f32 %v733_v45, %v1944_v22  ;;  %v749_v53 = vmul.f32 %v747_v50, %v1940_v35  ;;  %v748_v54 = vmul.f32 %v747_v50, %v1944_v22  ;;  %v854_v50 = vstv %s1581_s11  ;;  %s2102_s11 = sld [smem:[#allocation2 + $0x48]] }
  0xa0   : > { %v203_v2 = vpop.permute.xlu1 %202  ;;  %v193_v0 = vadd.f32 %v189_v52, %v179_v57  ;;  %v761_v57 = vstv %s1572_s24  ;;  %s1597_s24 = sld [smem:[#allocation2 + $0x41]] }
  0xa1   : > { %v201_v59 = vpop.permute.xlu0 %200 }
  0xa2   : > { %648 = vrot.lane.b32.xlu1 %v643_v55, %s1695_s25  ;;  %v207_v9 = vadd.f32 %v203_v2, %v193_v0  ;;  %v206_v10 = vadd.f32 %v201_v59, %v192_v6 }
  0xa3   : > { %646 = vrot.lane.b32.xlu0 %v642_v56, %s1695_s25 }
  0xa4   : > { %v217_v4 = vpop.permute.xlu1 %216 }
  0xa5   : > { %v215_v5 = vpop.permute.xlu0 %214  ;;  %v221_v15 = vadd.f32 %v217_v4, %v207_v9  ;;  %v345_v4 = vstv %s1954_s27  ;;  %s1598_s27 = sld [smem:[#allocation2 + $0x42]] }
  0xa6   : > { %662 = vrot.lane.b32.xlu1 %v657_v1, %s1697_s29  ;;  %v220_v16 = vadd.f32 %v215_v5, %v206_v10  ;;  %v763_v1 = vmul.f32 %v761_v57, %v1940_v35  ;;  %v775_v5 = vstv %s1956_s28  ;;  %v347_v10 = vmul.f32 %v345_v4, %v1805_v40  ;;  %s1599_s28 = sld [smem:[#allocation2 + $0x43]] }
  0xa7   : > { %660 = vrot.lane.b32.xlu0 %v656_v63, %s1697_s29  ;;  %v762_v63 = vmul.f32 %v761_v57, %v1944_v22  ;;  %v777_v11 = vmul.f32 %v775_v5, %v1940_v35  ;;  %v776_v12 = vmul.f32 %v775_v5, %v1944_v22 }
  0xa8   : > { %v231_v13 = vpop.permute.xlu1 %230 }
  0xa9   : > { %v229_v14 = vpop.permute.xlu0 %228  ;;  %v235_v24 = vadd.f32 %v231_v13, %v221_v15  ;;  %v346_v15 = vmul.f32 %v345_v4, %v1808_v42  ;;  %v1988_v42 = vld [vmem:[%s1744_s23 + $0x18] sm:$0xff] }
  0xaa   : > { %676 = vrot.lane.b32.xlu1 %v671_v7, %s1698_s3  ;;  %v234_v25 = vadd.f32 %v229_v14, %v220_v16  ;;  %v789_v16 = vstv %s1962_s30  ;;  %s1600_s30 = sld [smem:[#allocation2 + $0x44]] }
  0xab   : > { %674 = vrot.lane.b32.xlu0 %v670_v8, %s1698_s3  ;;  %v791_v40 = vmul.f32 %v789_v16, %v1940_v35 }
  0xac   : > { %v245_v28 = vpop.permute.xlu1 %244 }
  0xad   : > { %v243_v29 = vpop.permute.xlu0 %242  ;;  %v249_v30 = vadd.f32 %v245_v28, %v235_v24  ;;  %v1984_v28 = vld [vmem:[%s1744_s23 + $0x20] sm:$0xff] }
  0xae   : > { %v248_v31 = vadd.f32 %v243_v29, %v234_v25  ;;  %690 = vrot.lane.b32.xlu1 %v685_v19, %s1699_s5  ;;  %v790_v25 = vmul.f32 %v789_v16, %v1944_v22  ;;  %v812_v29 = vstv %s1970_s4  ;;  %s1601_s4 = sld [smem:[#allocation2 + $0x45]] }
  0xaf   : > { %688 = vrot.lane.b32.xlu0 %v684_v23, %s1699_s5  ;;  %v257_v33 = vadd.f32 %v255_v17, %v249_v30 }
  0xb0   : > { %v256_v34 = vadd.f32 %v254_v26, %v248_v31  ;;  %v267_v37 = vpop.permute.xlu1 %266 }
  0xb1   : > { %v265_v38 = vpop.permute.xlu0 %264  ;;  %v271_v55 = vadd.f32 %v267_v37, %v257_v33  ;;  %v826_v33 = vstv %s1579_s6  ;;  %s2094_s6 = sld [smem:[#allocation2 + $0x23]] }
  0xb2   : > { %704 = vrot.lane.b32.xlu1 %v699_v20, %s1700_s7  ;;  %v270_v56 = vadd.f32 %v265_v38, %v256_v34  ;;  %v814_v20 = vmul.f32 %v1984_v28, %v812_v29  ;;  %v828_v37 = vmul.f32 %v1984_v28, %v826_v33  ;;  %v827_v38 = vmul.f32 %v1988_v42, %v826_v33 }
  0xb3   : > { %702 = vrot.lane.b32.xlu0 %v698_v32, %s1700_s7  ;;  %v813_v32 = vmul.f32 %v1988_v42, %v812_v29 }
  0xb4   : > { %v281_v46 = vpop.permute.xlu1 %280 }
  0xb5   : > { %v279_v47 = vpop.permute.xlu0 %278  ;;  %v285_v59 = vadd.f32 %v281_v46, %v271_v55  ;;  %v856_v55 = vmul.f32 %v1984_v28, %v854_v50 }
  0xb6   : > { %726 = vrot.lane.b32.xlu1 %v721_v39, %s1696_s26  ;;  %v284_v61 = vadd.f32 %v279_v47, %v270_v56  ;;  %v840_v39 = vstv %s1580_s8  ;;  %v855_v56 = vmul.f32 %v1988_v42, %v854_v50  ;;  %s2096_s8 = sld [smem:[#allocation2 + $0x47]] }
  0xb7   : > { %724 = vrot.lane.b32.xlu0 %v720_v43, %s1696_s26  ;;  %v842_v46 = vmul.f32 %v1984_v28, %v840_v39  ;;  %v841_v47 = vmul.f32 %v1988_v42, %v840_v39  ;;  %v946_v39 = vstv %s1590_s18  ;;  %s2155_s18 = sld [smem:[#allocation2 + $0x4f]] }
  0xb8   : > { %v295_v51 = vpop.permute.xlu1 %294 }
  0xb9   : > { %v293_v52 = vpop.permute.xlu0 %292  ;;  %v299_v0 = vadd.f32 %v295_v51, %v285_v59  ;;  %v868_v59 = vstv %s2000_s13  ;;  %s1608_s13 = sld [smem:[#allocation2 + $0x4a]] }
  0xba   : > { %740 = vrot.lane.b32.xlu1 %v735_v48, %s1695_s25  ;;  %v298_v3 = vadd.f32 %v293_v52, %v284_v61  ;;  %v870_v4 = vmul.f32 %v1984_v28, %v868_v59  ;;  %v869_v5 = vmul.f32 %v1988_v42, %v868_v59 }
  0xbb   : > { %738 = vrot.lane.b32.xlu0 %v734_v49, %s1695_s25 }
  0xbc   : > { %v309_v58 = vpop.permute.xlu1 %308 }
  0xbd   : > { %v307_v2 = vpop.permute.xlu0 %306  ;;  %v313_v8 = vadd.f32 %v309_v58, %v299_v0 }
  0xbe   : > { %754 = vrot.lane.b32.xlu1 %v749_v53, %s1697_s29  ;;  %v312_v9 = vadd.f32 %v307_v2, %v298_v3  ;;  %v437_v2 = vstv %s1998_s12  ;;  %s2116_s12 = sld [smem:[#allocation2 + $0x49]] }
  0xbf   : > { %752 = vrot.lane.b32.xlu0 %v748_v54, %s1697_s29  ;;  %v439_v3 = vmul.f32 %v437_v2, %v1835_v60 }
  0xc0   : > { %v323_v6 = vpop.permute.xlu1 %322 }
  0xc1   : > { %v321_v7 = vpop.permute.xlu0 %320  ;;  %v327_v13 = vadd.f32 %v323_v6, %v313_v8  ;;  %v438_v8 = vmul.f32 %v437_v2, %v1838_v62  ;;  %v2032_v62 = vld [vmem:[%s1744_s23 + $0x19] sm:$0xff] }
  0xc2   : > { %768 = vrot.lane.b32.xlu1 %v763_v1, %s1698_s3  ;;  %v326_v14 = vadd.f32 %v321_v7, %v312_v9  ;;  %v882_v9 = vstv %s2006_s14  ;;  %s2130_s14 = sld [smem:[#allocation2 + $0x2a]] }
  0xc3   : > { %766 = vrot.lane.b32.xlu0 %v762_v63, %s1698_s3  ;;  %v884_v60 = vmul.f32 %v1984_v28, %v882_v9 }
  0xc4   : > { %v337_v17 = vpop.permute.xlu1 %336 }
  0xc5   : > { %v335_v19 = vpop.permute.xlu0 %334  ;;  %v341_v23 = vadd.f32 %v337_v17, %v327_v13  ;;  %v2028_v17 = vld [vmem:[%s1744_s23 + $0x21] sm:$0xff] }
  0xc6   : > { %v340_v24 = vadd.f32 %v335_v19, %v326_v14  ;;  %782 = vrot.lane.b32.xlu1 %v777_v11, %s1699_s5  ;;  %v883_v14 = vmul.f32 %v1988_v42, %v882_v9  ;;  %v904_v19 = vstv %s2014_s15  ;;  %s2132_s15 = sld [smem:[#allocation2 + $0x4b]] }
  0xc7   : > { %780 = vrot.lane.b32.xlu0 %v776_v12, %s1699_s5  ;;  %v349_v26 = vadd.f32 %v347_v10, %v341_v23 }
  0xc8   : > { %v348_v27 = vadd.f32 %v346_v15, %v340_v24  ;;  %v359_v30 = vpop.permute.xlu1 %358 }
  0xc9   : > { %v357_v31 = vpop.permute.xlu0 %356  ;;  %v363_v48 = vadd.f32 %v359_v30, %v349_v26  ;;  %v918_v26 = vstv %s1588_s16  ;;  %s2138_s16 = sld [smem:[#allocation2 + $0x4c]] }
  0xca   : > { %796 = vrot.lane.b32.xlu1 %v791_v40, %s1700_s7  ;;  %v362_v49 = vadd.f32 %v357_v31, %v348_v27  ;;  %v906_v40 = vmul.f32 %v2028_v17, %v904_v19  ;;  %v920_v30 = vmul.f32 %v2028_v17, %v918_v26  ;;  %v919_v31 = vmul.f32 %v2032_v62, %v918_v26 }
  0xcb   : > { %794 = vrot.lane.b32.xlu0 %v790_v25, %s1700_s7  ;;  %v905_v25 = vmul.f32 %v2032_v62, %v904_v19 }
  0xcc   : > { %v373_v34 = vpop.permute.xlu1 %372 }
  0xcd   : > { %v371_v36 = vpop.permute.xlu0 %370  ;;  %v377_v53 = vadd.f32 %v373_v34, %v363_v48  ;;  %v948_v48 = vmul.f32 %v2028_v17, %v946_v39 }
  0xce   : > { %819 = vrot.lane.b32.xlu1 %v814_v20, %s1696_s26  ;;  %v376_v54 = vadd.f32 %v371_v36, %v362_v49  ;;  %v932_v20 = vstv %s1589_s17  ;;  %v947_v49 = vmul.f32 %v2032_v62, %v946_v39  ;;  %s2146_s17 = sld [smem:[#allocation2 + $0x4e]] }
  0xcf   : > { %817 = vrot.lane.b32.xlu0 %v813_v32, %s1696_s26  ;;  %v934_v34 = vmul.f32 %v2028_v17, %v932_v20  ;;  %v933_v36 = vmul.f32 %v2032_v62, %v932_v20 }
  0xd0   : > { %v387_v43 = vpop.permute.xlu1 %386 }
  0xd1   : > { %v385_v45 = vpop.permute.xlu0 %384  ;;  %v391_v57 = vadd.f32 %v387_v43, %v377_v53  ;;  %v960_v53 = vstv %s2044_s20  ;;  %s1617_s20 = sld [smem:[#allocation2 + $0x51]] }
  0xd2   : > { %833 = vrot.lane.b32.xlu1 %v828_v37, %s1695_s25  ;;  %v390_v58 = vadd.f32 %v385_v45, %v376_v54  ;;  %v962_v2 = vmul.f32 %v2028_v17, %v960_v53  ;;  %v961_v59 = vmul.f32 %v2032_v62, %v960_v53 }
  0xd3   : > { %831 = vrot.lane.b32.xlu0 %v827_v38, %s1695_s25 }
  0xd4   : > { %v401_v51 = vpop.permute.xlu1 %400 }
  0xd5   : > { %v399_v52 = vpop.permute.xlu0 %398  ;;  %v405_v63 = vadd.f32 %v401_v51, %v391_v57 }
  0xd6   : > { %847 = vrot.lane.b32.xlu1 %v842_v46, %s1697_s29  ;;  %v404_v0 = vadd.f32 %v399_v52, %v390_v58  ;;  %v529_v52 = vstv %s2042_s19  ;;  %s1616_s19 = sld [smem:[#allocation2 + $0x50]] }
  0xd7   : > { %845 = vrot.lane.b32.xlu0 %v841_v47, %s1697_s29  ;;  %v531_v58 = vmul.f32 %v529_v52, %v1865_v18 }
  0xd8   : > { %v415_v61 = vpop.permute.xlu1 %414 }
  0xd9   : > { %v413_v1 = vpop.permute.xlu0 %412  ;;  %v419_v6 = vadd.f32 %v415_v61, %v405_v63  ;;  %v530_v63 = vmul.f32 %v529_v52, %v1868_v21  ;;  %v2076_v21 = vld [vmem:[%s1744_s23 + $0x1a] sm:$0xff] }
  0xda   : > { %861 = vrot.lane.b32.xlu1 %v856_v55, %s1698_s3  ;;  %v418_v7 = vadd.f32 %v413_v1, %v404_v0  ;;  %v974_v0 = vstv %s2050_s21  ;;  %s1618_s21 = sld [smem:[#allocation2 + $0x52]] }
  0xdb   : > { %859 = vrot.lane.b32.xlu0 %v855_v56, %s1698_s3  ;;  %v976_v18 = vmul.f32 %v2028_v17, %v974_v0 }
  0xdc   : > { %v429_v10 = vpop.permute.xlu1 %428 }
  0xdd   : > { %v427_v11 = vpop.permute.xlu0 %426  ;;  %v433_v12 = vadd.f32 %v429_v10, %v419_v6  ;;  %v2072_v10 = vld [vmem:[%s1744_s23 + $0x22] sm:$0xff] }
  0xde   : > { %v432_v13 = vadd.f32 %v427_v11, %v418_v7  ;;  %875 = vrot.lane.b32.xlu1 %v870_v4, %s1699_s5  ;;  %v975_v7 = vmul.f32 %v2032_v62, %v974_v0  ;;  %v996_v11 = vstv %s2058_s22  ;;  %s1575_s22 = sld [smem:[#allocation2 + $0x31]] }
  0xdf   : > { %873 = vrot.lane.b32.xlu0 %v869_v5, %s1699_s5  ;;  %v441_v15 = vadd.f32 %v439_v3, %v433_v12 }
  0xe0   : > { %v440_v16 = vadd.f32 %v438_v8, %v432_v13  ;;  %v451_v23 = vpop.permute.xlu1 %450 }
  0xe1   : > { %v449_v24 = vpop.permute.xlu0 %448  ;;  %v455_v37 = vadd.f32 %v451_v23, %v441_v15  ;;  %v1010_v15 = vstv %s1597_s24  ;;  %s2181_s24 = sld [smem:[#allocation2 + $0x53]] }
  0xe2   : > { %889 = vrot.lane.b32.xlu1 %v884_v60, %s1700_s7  ;;  %v454_v38 = vadd.f32 %v449_v24, %v440_v16  ;;  %v998_v60 = vmul.f32 %v2072_v10, %v996_v11  ;;  %v1012_v23 = vmul.f32 %v2072_v10, %v1010_v15  ;;  %v1011_v24 = vmul.f32 %v2076_v21, %v1010_v15 }
  0xe3   : > { %887 = vrot.lane.b32.xlu0 %v883_v14, %s1700_s7  ;;  %v997_v14 = vmul.f32 %v2076_v21, %v996_v11 }
  0xe4   : > { %v465_v27 = vpop.permute.xlu1 %464 }
  0xe5   : > { %v463_v29 = vpop.permute.xlu0 %462  ;;  %v469_v46 = vadd.f32 %v465_v27, %v455_v37 }
  0xe6   : > { %911 = vrot.lane.b32.xlu1 %v906_v40, %s1696_s26  ;;  %v468_v47 = vadd.f32 %v463_v29, %v454_v38  ;;  %v1024_v40 = vstv %s1598_s27  ;;  %s2187_s27 = sld [smem:[#allocation2 + $0x55]] }
  0xe7   : > { %909 = vrot.lane.b32.xlu0 %v905_v25, %s1696_s26  ;;  %v1026_v27 = vmul.f32 %v2072_v10, %v1024_v40  ;;  %v1025_v29 = vmul.f32 %v2076_v21, %v1024_v40  ;;  %v1130_v40 = vstv %s1608_s13  ;;  %s1634_s13 = sld [smem:[#allocation2 + $0x5e]] }
  0xe8   : > { %v479_v32 = vpop.permute.xlu1 %478 }
  0xe9   : > { %v477_v33 = vpop.permute.xlu0 %476  ;;  %v483_v50 = vadd.f32 %v479_v32, %v469_v46 }
  0xea   : > { %925 = vrot.lane.b32.xlu1 %v920_v30, %s1695_s25  ;;  %v482_v51 = vadd.f32 %v477_v33, %v468_v47  ;;  %v1038_v30 = vstv %s1599_s28  ;;  %s2196_s28 = sld [smem:[#allocation2 + $0x56]] }
  0xeb   : > { %923 = vrot.lane.b32.xlu0 %v919_v31, %s1695_s25  ;;  %v1040_v32 = vmul.f32 %v2072_v10, %v1038_v30  ;;  %v1039_v33 = vmul.f32 %v2076_v21, %v1038_v30 }
  0xec   : > { %v493_v43 = vpop.permute.xlu1 %492 }
  0xed   : > { %v491_v45 = vpop.permute.xlu0 %490  ;;  %v497_v56 = vadd.f32 %v493_v43, %v483_v50 }
  0xee   : > { %939 = vrot.lane.b32.xlu1 %v934_v34, %s1697_s29  ;;  %v496_v57 = vadd.f32 %v491_v45, %v482_v51  ;;  %v1052_v34 = vstv %s1600_s30  ;;  %s1625_s30 = sld [smem:[#allocation2 + $0x57]] }
  0xef   : > { %937 = vrot.lane.b32.xlu0 %v933_v36, %s1697_s29  ;;  %v1054_v43 = vmul.f32 %v2072_v10, %v1052_v34  ;;  %v1053_v45 = vmul.f32 %v2076_v21, %v1052_v34  ;;  %v1144_v34 = vstv %s2132_s15  ;;  %s1637_s15 = sld [smem:[#allocation2 + $0x61]] }
  0xf0   : > { %v507_v54 = vpop.permute.xlu1 %506 }
  0xf1   : > { %v505_v55 = vpop.permute.xlu0 %504  ;;  %v511_v61 = vadd.f32 %v507_v54, %v497_v56 }
  0xf2   : > { %953 = vrot.lane.b32.xlu1 %v948_v48, %s1698_s3  ;;  %v510_v1 = vadd.f32 %v505_v55, %v496_v57  ;;  %v1066_v48 = vstv %s1601_s4  ;;  %v621_v57 = vstv %s2094_s6  ;;  %s1626_s4 = sld [smem:[#allocation2 + $0x58]]  ;;  %s1627_s6 = sld [smem:[#allocation2 + $0x59]] }
  0xf3   : > { %951 = vrot.lane.b32.xlu0 %v947_v49, %s1698_s3  ;;  %v1068_v53 = vmul.f32 %v2072_v10, %v1066_v48  ;;  %v1067_v54 = vmul.f32 %v2076_v21, %v1066_v48 }
  0xf4   : > { %v521_v3 = vpop.permute.xlu1 %520 }
  0xf5   : > { %v519_v4 = vpop.permute.xlu0 %518  ;;  %v525_v5 = vadd.f32 %v521_v3, %v511_v61  ;;  %v623_v3 = vmul.f32 %v621_v57, %v1895_v41 }
  0xf6   : > { %v524_v6 = vadd.f32 %v519_v4, %v510_v1  ;;  %967 = vrot.lane.b32.xlu1 %v962_v2, %s1699_s5  ;;  %v1088_v2 = vstv %s2096_s8  ;;  %s1628_s8 = sld [smem:[#allocation2 + $0x5a]] }
  0xf7   : > { %965 = vrot.lane.b32.xlu0 %v961_v59, %s1699_s5  ;;  %v533_v8 = vadd.f32 %v531_v58, %v525_v5  ;;  %v2110_v58 = vld [vmem:[%s1744_s23 + $0x23] sm:$0xff]  ;;  %v2114_v59 = vld [vmem:[%s1744_s23 + $0x1b] sm:$0xff] }
  0xf8   : > { %v532_v9 = vadd.f32 %v530_v63, %v524_v6  ;;  %v543_v12 = vpop.permute.xlu1 %542  ;;  %v1090_v4 = vmul.f32 %v2110_v58, %v1088_v2  ;;  %v1089_v5 = vmul.f32 %v2114_v59, %v1088_v2  ;;  %v1132_v30 = vmul.f32 %v2110_v58, %v1130_v40  ;;  %v2162_v2 = vld [vmem:[%s1744_s23 + $0x24] sm:$0xff] }
  0xf9   : > { %v541_v13 = vpop.permute.xlu0 %540  ;;  %v547_v38 = vadd.f32 %v543_v12, %v533_v8  ;;  %v1102_v8 = vstv %s2102_s11  ;;  %s1632_s11 = sld [smem:[#allocation2 + $0x5c]] }
  0xfa   : > { %981 = vrot.lane.b32.xlu1 %v976_v18, %s1700_s7  ;;  %v546_v39 = vadd.f32 %v541_v13, %v532_v9  ;;  %v622_v18 = vmul.f32 %v621_v57, %v1898_v44  ;;  %v1104_v41 = vmul.f32 %v2110_v58, %v1102_v8  ;;  %v1103_v12 = vmul.f32 %v2114_v59, %v1102_v8 }
  0xfb   : > { %979 = vrot.lane.b32.xlu0 %v975_v7, %s1700_s7 }
  0xfc   : > { %v557_v16 = vpop.permute.xlu1 %556 }
  0xfd   : > { %v555_v19 = vpop.permute.xlu0 %554  ;;  %v561_v46 = vadd.f32 %v557_v16, %v547_v38 }
  0xfe   : > { %1003 = vrot.lane.b32.xlu1 %v998_v60, %s1696_s26  ;;  %v560_v47 = vadd.f32 %v555_v19, %v546_v39 }
  0xff   : > { %1001 = vrot.lane.b32.xlu0 %v997_v14, %s1696_s26  ;;  %v1116_v14 = vstv %s2116_s12  ;;  %s1633_s12 = sld [smem:[#allocation2 + $0x5d]] }
 0x100   : > { %v571_v25 = vpop.permute.xlu1 %570  ;;  %v1118_v16 = vmul.f32 %v2110_v58, %v1116_v14  ;;  %v1117_v19 = vmul.f32 %v2114_v59, %v1116_v14 }
 0x101   : > { %v569_v26 = vpop.permute.xlu0 %568  ;;  %v575_v51 = vadd.f32 %v571_v25, %v561_v46  ;;  %v1145_v46 = vmul.f32 %v2114_v59, %v1144_v34 }
 0x102   : > { %1017 = vrot.lane.b32.xlu1 %v1012_v23, %s1695_s25  ;;  %v574_v52 = vadd.f32 %v569_v26, %v560_v47 }
 0x103   : > { %1015 = vrot.lane.b32.xlu0 %v1011_v24, %s1695_s25 }
 0x104   : > { %v585_v31 = vpop.permute.xlu1 %584 }
 0x105   : > { %v583_v20 = vpop.permute.xlu0 %582  ;;  %v589_v55 = vadd.f32 %v585_v31, %v575_v51  ;;  %v1131_v31 = vmul.f32 %v2114_v59, %v1130_v40 }
 0x106   : > { %1031 = vrot.lane.b32.xlu1 %v1026_v27, %s1697_s29  ;;  %v588_v56 = vadd.f32 %v583_v20, %v574_v52 }
 0x107   : > { %1029 = vrot.lane.b32.xlu0 %v1025_v29, %s1697_s29 }
 0x108   : > { %v599_v36 = vpop.permute.xlu1 %598 }
 0x109   : > { %v597_v37 = vpop.permute.xlu0 %596  ;;  %v603_v63 = vadd.f32 %v599_v36, %v589_v55 }
 0x10a   : > { %1045 = vrot.lane.b32.xlu1 %v1040_v32, %s1698_s3  ;;  %v602_v0 = vadd.f32 %v597_v37, %v588_v56 }
 0x10b   : > { %1043 = vrot.lane.b32.xlu0 %v1039_v33, %s1698_s3  ;;  %v713_v33 = vstv %s2130_s14  ;;  %s1635_s14 = sld [smem:[#allocation2 + $0x5f]] }
 0x10c   : > { %v613_v49 = vpop.permute.xlu1 %612 }
 0x10d   : > { %v611_v50 = vpop.permute.xlu0 %610  ;;  %v617_v6 = vadd.f32 %v613_v49, %v603_v63  ;;  %v714_v49 = vmul.f32 %v713_v33, %v1944_v22  ;;  %v1180_v22 = vstv %s2146_s17 }
 0x10e   : > { %1059 = vrot.lane.b32.xlu1 %v1054_v43, %s1699_s5  ;;  %v616_v7 = vadd.f32 %v611_v50, %v602_v0  ;;  %v715_v43 = vmul.f32 %v713_v33, %v1940_v35  ;;  %v1158_v50 = vstv %s2138_s16  ;;  %s1640_s16 = sshll.u32 %s2314_s10, 4 }
 0x10f   : > { %1057 = vrot.lane.b32.xlu0 %v1053_v45, %s1699_s5  ;;  %v625_v13 = vadd.f32 %v623_v3, %v617_v6  ;;  %v1146_v45 = vmul.f32 %v2110_v58, %v1144_v34  ;;  %v1160_v35 = vmul.f32 %v2110_v58, %v1158_v50  ;;  %v1159_v55 = vmul.f32 %v2114_v59, %v1158_v50 }
 0x110   : > { %v635_v61 = vpop.permute.xlu1 %634  ;;  %v624_v60 = vadd.f32 %v622_v18, %v616_v7  ;;  %v1194_v6 = vstv %s2155_s18 }
 0x111   : > { %v633_v1 = vpop.permute.xlu0 %632  ;;  %v639_v23 = vadd.f32 %v635_v61, %v625_v13  ;;  %v2166_v61 = vld [vmem:[%s1744_s23 + $0x1c] sm:$0xff] }
 0x112   : > { %1073 = vrot.lane.b32.xlu1 %v1068_v53, %s1700_s7  ;;  %v638_v24 = vadd.f32 %v633_v1, %v624_v60 }
 0x113   : > { %1071 = vrot.lane.b32.xlu0 %v1067_v54, %s1700_s7 }
 0x114   : > { %v649_v9 = vpop.permute.xlu1 %648 }
 0x115   : > { %v647_v11 = vpop.permute.xlu0 %646  ;;  %v653_v27 = vadd.f32 %v649_v9, %v639_v23 }
 0x116   : > { %1095 = vrot.lane.b32.xlu1 %v1090_v4, %s1696_s26  ;;  %v652_v29 = vadd.f32 %v647_v11, %v638_v24  ;;  %v1182_v4 = vmul.f32 %v2162_v2, %v1180_v22  ;;  %v1196_v11 = vmul.f32 %v2162_v2, %v1194_v6 }
 0x117   : > { %1093 = vrot.lane.b32.xlu0 %v1089_v5, %s1696_s26  ;;  %v1181_v5 = vmul.f32 %v2166_v61, %v1180_v22  ;;  %v1286_v22 = vstv %s2196_s28 }
 0x118   : > { %v663_v44 = vpop.permute.xlu1 %662 }
 0x119   : > { %v661_v15 = vpop.permute.xlu0 %660  ;;  %v667_v20 = vadd.f32 %v663_v44, %v653_v27 }
 0x11a   : > { %1109 = vrot.lane.b32.xlu1 %v1104_v41, %s1695_s25  ;;  %v666_v32 = vadd.f32 %v661_v15, %v652_v29  ;;  %v1195_v41 = vmul.f32 %v2166_v61, %v1194_v6  ;;  %v1236_v29 = vstv %s1618_s21  ;;  %v1300_v6 = vstv %s1625_s30 }
 0x11b   : > { %1107 = vrot.lane.b32.xlu0 %v1103_v12, %s1695_s25  ;;  %v1208_v12 = vstv %s1616_s19  ;;  %v1238_v34 = vmul.f32 %v2162_v2, %v1236_v29  ;;  %s157_s19 = scalar_lea.vmem %s2311_s2, %s1640_s16 }
 0x11c   : > { %v677_v25 = vpop.permute.xlu1 %676  ;;  %v1210_v15 = vmul.f32 %v2162_v2, %v1208_v12 }
 0x11d   : > { %v675_v26 = vpop.permute.xlu0 %674  ;;  %v681_v38 = vadd.f32 %v677_v25, %v667_v20  ;;  %v806_v20 = vstv %s1575_s22 }
 0x11e   : > { %1123 = vrot.lane.b32.xlu1 %v1118_v16, %s1697_s29  ;;  %v680_v39 = vadd.f32 %v675_v26, %v666_v32  ;;  %v1209_v16 = vmul.f32 %v2166_v61, %v1208_v12  ;;  %v1314_v12 = vstv %s1626_s4 }
 0x11f   : > { %1121 = vrot.lane.b32.xlu0 %v1117_v19, %s1697_s29  ;;  %v1222_v19 = vstv %s1617_s20 }
 0x120   : > { %v691_v36 = vpop.permute.xlu1 %690  ;;  %v1224_v26 = vmul.f32 %v2162_v2, %v1222_v19  ;;  %v1223_v27 = vmul.f32 %v2166_v61, %v1222_v19  ;;  %v1328_v19 = vstv %s1627_s6 }
 0x121   : > { %v689_v37 = vpop.permute.xlu0 %688  ;;  %v695_v47 = vadd.f32 %v691_v36, %v681_v38  ;;  %v1237_v36 = vmul.f32 %v2166_v61, %v1236_v29  ;;  %v807_v38 = vmul.f32 %v1988_v42, %v806_v20  ;;  %v1272_v42 = vstv %s2187_s27 }
 0x122   : > { %1137 = vrot.lane.b32.xlu1 %v1132_v30, %s1698_s3  ;;  %v694_v48 = vadd.f32 %v689_v37, %v680_v39  ;;  %v808_v37 = vmul.f32 %v1984_v28, %v806_v20  ;;  %v1250_v39 = vstv %s2181_s24  ;;  %v2247_v20 = vld [vmem:[%s1744_s23 + $0x26] sm:$0xff] }
 0x123   : > { %1135 = vrot.lane.b32.xlu0 %v1131_v31, %s1698_s3 }
 0x124   : > { %v705_v51 = vpop.permute.xlu1 %704 }
 0x125   : > { %v703_v52 = vpop.permute.xlu0 %702  ;;  %v709_v53 = vadd.f32 %v705_v51, %v695_v47  ;;  %v2203_v51 = vld [vmem:[%s1744_s23 + $0x25] sm:$0xff] }
 0x126   : > { %v708_v54 = vadd.f32 %v703_v52, %v694_v48  ;;  %1151 = vrot.lane.b32.xlu1 %v1146_v45, %s1699_s5  ;;  %v1252_v48 = vmul.f32 %v2162_v2, %v1250_v39  ;;  %v2207_v52 = vld [vmem:[%s1744_s23 + $0x1d] sm:$0xff] }
 0x127   : > { %1149 = vrot.lane.b32.xlu0 %v1145_v46, %s1699_s5  ;;  %v717_v56 = vadd.f32 %v715_v43, %v709_v53 }
 0x128   : > { %v716_v57 = vadd.f32 %v714_v49, %v708_v54  ;;  %v727_v1 = vpop.permute.xlu1 %726  ;;  %v1251_v49 = vmul.f32 %v2166_v61, %v1250_v39  ;;  %v1378_v39 = vstv %s1633_s12 }
 0x129   : > { %v725_v63 = vpop.permute.xlu0 %724  ;;  %v731_v0 = vadd.f32 %v727_v1, %v717_v56  ;;  %v1274_v56 = vmul.f32 %v2203_v51, %v1272_v42 }
 0x12a   : > { %v730_v3 = vadd.f32 %v725_v63, %v716_v57  ;;  %1165 = vrot.lane.b32.xlu1 %v1160_v35, %s1700_s7  ;;  %v1273_v57 = vmul.f32 %v2207_v52, %v1272_v42 }
 0x12b   : > { %1163 = vrot.lane.b32.xlu0 %v1159_v55, %s1700_s7 }
 0x12c   : > { %v741_v18 = vpop.permute.xlu1 %740 }
 0x12d   : > { %v739_v7 = vpop.permute.xlu0 %738  ;;  %v745_v8 = vadd.f32 %v741_v18, %v731_v0 }
 0x12e   : > { %v744_v9 = vadd.f32 %v739_v7, %v730_v3  ;;  %1187 = vrot.lane.b32.xlu1 %v1182_v4, %s1696_s26  ;;  %v1288_v4 = vmul.f32 %v2203_v51, %v1286_v22 }
 0x12f   : > { %1185 = vrot.lane.b32.xlu0 %v1181_v5, %s1696_s26  ;;  %v1287_v5 = vmul.f32 %v2207_v52, %v1286_v22 }
 0x130   : > { %v755_v13 = vpop.permute.xlu1 %754 }
 0x131   : > { %v753_v60 = vpop.permute.xlu0 %752  ;;  %v759_v14 = vadd.f32 %v755_v13, %v745_v8 }
 0x132   : > { %v758_v44 = vadd.f32 %v753_v60, %v744_v9  ;;  %1201 = vrot.lane.b32.xlu1 %v1196_v11, %s1695_s25  ;;  %v1302_v11 = vmul.f32 %v2203_v51, %v1300_v6 }
 0x133   : > { %1199 = vrot.lane.b32.xlu0 %v1195_v41, %s1695_s25  ;;  %v1301_v41 = vmul.f32 %v2207_v52, %v1300_v6 }
 0x134   : > { %v769_v23 = vpop.permute.xlu1 %768 }
 0x135   : > { %v767_v24 = vpop.permute.xlu0 %766  ;;  %v773_v40 = vadd.f32 %v769_v23, %v759_v14 }
 0x136   : > { %v772_v25 = vadd.f32 %v767_v24, %v758_v44  ;;  %1215 = vrot.lane.b32.xlu1 %v1210_v15, %s1697_s29  ;;  %v1316_v15 = vmul.f32 %v2203_v51, %v1314_v12 }
 0x137   : > { %1213 = vrot.lane.b32.xlu0 %v1209_v16, %s1697_s29  ;;  %v1315_v16 = vmul.f32 %v2207_v52, %v1314_v12 }
 0x138   : > { %v783_v30 = vpop.permute.xlu1 %782 }
 0x139   : > { %v781_v31 = vpop.permute.xlu0 %780  ;;  %v787_v32 = vadd.f32 %v783_v30, %v773_v40  ;;  %v1330_v40 = vmul.f32 %v2203_v51, %v1328_v19 }
 0x13a   : > { %v786_v33 = vadd.f32 %v781_v31, %v772_v25  ;;  %1229 = vrot.lane.b32.xlu1 %v1224_v26, %s1698_s3  ;;  %v1329_v25 = vmul.f32 %v2207_v52, %v1328_v19  ;;  %v1342_v26 = vstv %s1628_s8 }
 0x13b   : > { %1227 = vrot.lane.b32.xlu0 %v1223_v27, %s1698_s3  ;;  %v1344_v30 = vmul.f32 %v2203_v51, %v1342_v26  ;;  %v1343_v31 = vmul.f32 %v2207_v52, %v1342_v26 }
 0x13c   : > { %v797_v43 = vpop.permute.xlu1 %796 }
 0x13d   : > { %v795_v45 = vpop.permute.xlu0 %794  ;;  %v801_v46 = vadd.f32 %v797_v43, %v787_v32  ;;  %v1364_v32 = vstv %s1632_s11 }
 0x13e   : > { %v800_v47 = vadd.f32 %v795_v45, %v786_v33  ;;  %1243 = vrot.lane.b32.xlu1 %v1238_v34, %s1699_s5  ;;  %v2250_v33 = vld [vmem:[%s1744_s23 + $0x1e] sm:$0xff]  ;;  %s1636_s23 = sld [smem:[#allocation2 + $0x60]] }
 0x13f   : > { %1241 = vrot.lane.b32.xlu0 %v1237_v36, %s1699_s5  ;;  %v810_v28 = vadd.f32 %v808_v37, %v801_v46  ;;  %v1366_v37 = vmul.f32 %v2247_v20, %v1364_v32  ;;  %v1380_v46 = vmul.f32 %v2247_v20, %v1378_v39 }
 0x140   : > { %v809_v50 = vadd.f32 %v807_v38, %v800_v47  ;;  %v820_v53 = vpop.permute.xlu1 %819  ;;  %v1365_v38 = vmul.f32 %v2250_v33, %v1364_v32  ;;  %v1379_v47 = vmul.f32 %v2250_v33, %v1378_v39 }
 0x141   : > { %v818_v54 = vpop.permute.xlu0 %817  ;;  %v824_v35 = vadd.f32 %v820_v53, %v810_v28  ;;  %v1406_v53 = vstv %s1635_s14 }
 0x142   : > { %v823_v55 = vadd.f32 %v818_v54, %v809_v50  ;;  %1257 = vrot.lane.b32.xlu1 %v1252_v48, %s1700_s7  ;;  %v1392_v48 = vstv %s1634_s13 }
 0x143   : > { %1255 = vrot.lane.b32.xlu0 %v1251_v49, %s1700_s7  ;;  %v1394_v50 = vmul.f32 %v2247_v20, %v1392_v48  ;;  %v1393_v42 = vmul.f32 %v2250_v33, %v1392_v48 }
 0x144   : > { %v834_v1 = vpop.permute.xlu1 %833 }
 0x145   : > { %v832_v63 = vpop.permute.xlu0 %831  ;;  %v838_v0 = vadd.f32 %v834_v1, %v824_v35 }
 0x146   : > { %v837_v3 = vadd.f32 %v832_v63, %v823_v55  ;;  %1279 = vrot.lane.b32.xlu1 %v1274_v56, %s1696_s26  ;;  %v1408_v55 = vmul.f32 %v2247_v20, %v1406_v53  ;;  %v1407_v56 = vmul.f32 %v2250_v33, %v1406_v53 }
 0x147   : > { %1277 = vrot.lane.b32.xlu0 %v1273_v57, %s1696_s26  ;;  %v1420_v57 = vstv %s1636_s23 }
 0x148   : > { %v848_v18 = vpop.permute.xlu1 %847  ;;  %v1422_v63 = vmul.f32 %v2247_v20, %v1420_v57 }
 0x149   : > { %v846_v7 = vpop.permute.xlu0 %845  ;;  %v852_v8 = vadd.f32 %v848_v18, %v838_v0  ;;  %v1421_v0 = vmul.f32 %v2250_v33, %v1420_v57 }
 0x14a   : > { %v851_v9 = vadd.f32 %v846_v7, %v837_v3  ;;  %1293 = vrot.lane.b32.xlu1 %v1288_v4, %s1695_s25  ;;  %v1434_v3 = vstv %s1637_s15 }
 0x14b   : > { %1291 = vrot.lane.b32.xlu0 %v1287_v5, %s1695_s25  ;;  %v1436_v6 = vmul.f32 %v2247_v20, %v1434_v3  ;;  %v1435_v18 = vmul.f32 %v2250_v33, %v1434_v3 }
 0x14c   : > { %v862_v13 = vpop.permute.xlu1 %861 }
 0x14d   : > { %v860_v60 = vpop.permute.xlu0 %859  ;;  %v2222_v14 = vadd.f32 %v862_v13, %v852_v8 }
 0x14e   : > { %v2224_v44 = vadd.f32 %v860_v60, %v851_v9  ;;  %1307 = vrot.lane.b32.xlu1 %v1302_v11, %s1697_s29 }
 0x14f   : > { %1305 = vrot.lane.b32.xlu0 %v1301_v41, %s1697_s29 }
 0x150   : > { %v2230_v23 = vpop.permute.xlu1 %875 }
 0x151   : > { %v2232_v24 = vpop.permute.xlu0 %873  ;;  %v880_v12 = vadd.f32 %v2230_v23, %v2222_v14 }
 0x152   : > { %1321 = vrot.lane.b32.xlu1 %v1316_v15, %s1698_s3  ;;  %v879_v13 = vadd.f32 %v2232_v24, %v2224_v44 }
 0x153   : > { %1319 = vrot.lane.b32.xlu0 %v1315_v16, %s1698_s3 }
 0x154   : > { %v2238_v27 = vpop.permute.xlu1 %889 }
 0x155   : > { %v2240_v29 = vpop.permute.xlu0 %887  ;;  %v894_v19 = vadd.f32 %v2238_v27, %v880_v12 }
 0x156   : > { %1335 = vrot.lane.b32.xlu1 %v1330_v40, %s1699_s5 }
 0x157   : > { %1333 = vrot.lane.b32.xlu0 %v1329_v25, %s1699_s5  ;;  %v893_v25 = vadd.f32 %v2240_v29, %v879_v13 }
 0x158   : > { %v2252_v34 = vpop.permute.xlu1 %911 }
 0x159   : > { %v2254_v36 = vpop.permute.xlu0 %909 }
 0x15a   : > { %1349 = vrot.lane.b32.xlu1 %v1344_v30, %s1700_s7 }
 0x15b   : > { %1347 = vrot.lane.b32.xlu0 %v1343_v31, %s1700_s7 }
 0x15c   : > { %v926_v43 = vpop.permute.xlu1 %925 }
 0x15d   : > { %v924_v45 = vpop.permute.xlu0 %923 }
 0x15e   : > { %1371 = vrot.lane.b32.xlu1 %v1366_v37, %s1696_s26 }
 0x15f   : > { %1369 = vrot.lane.b32.xlu0 %v1365_v38, %s1696_s26  ;;  %s1593_s26 = sld [smem:[#allocation2 + $0x3f]] }
 0x160   : > { %v940_v49 = vpop.permute.xlu1 %939 }
 0x161   : > { %v938_v28 = vpop.permute.xlu0 %937 }
 0x162   : > { %1385 = vrot.lane.b32.xlu1 %v1380_v46, %s1695_s25 }
 0x163   : > { %1383 = vrot.lane.b32.xlu0 %v1379_v47, %s1695_s25  ;;  %s1584_s25 = sld [smem:[#allocation2 + $0x38]] }
 0x164   : > { %v954_v54 = vpop.permute.xlu1 %953 }
 0x165   : > { %v952_v35 = vpop.permute.xlu0 %951  ;;  %v990_v29 = vstv %s1593_s26 }
 0x166   : > { %1399 = vrot.lane.b32.xlu1 %v1394_v50, %s1697_s29  ;;  %v992_v57 = vmul.f32 %v2072_v10, %v990_v29 }
 0x167   : > { %1397 = vrot.lane.b32.xlu0 %v1393_v42, %s1697_s29  ;;  %s1602_s29 = sld [smem:[#allocation2 + $0x46]] }
 0x168   : > { %v968_v22 = vpop.permute.xlu1 %967 }
 0x169   : > { %v966_v1 = vpop.permute.xlu0 %965  ;;  %v898_v41 = vstv %s1584_s25 }
 0x16a   : > { %1413 = vrot.lane.b32.xlu1 %v1408_v55, %s1698_s3  ;;  %v900_v16 = vmul.f32 %v2028_v17, %v898_v41  ;;  %v899_v40 = vmul.f32 %v2032_v62, %v898_v41 }
 0x16b   : > { %1411 = vrot.lane.b32.xlu0 %v1407_v56, %s1698_s3  ;;  %s1611_s3 = sld [smem:[#allocation2 + $0x4d]] }
 0x16c   : > { %v982_v4 = vpop.permute.xlu1 %981  ;;  %v902_v31 = vadd.f32 %v900_v16, %v894_v19  ;;  %v901_v32 = vadd.f32 %v899_v40, %v893_v25 }
 0x16d   : > { %v980_v5 = vpop.permute.xlu0 %979 }
 0x16e   : > { %1427 = vrot.lane.b32.xlu1 %v1422_v63, %s1699_s5  ;;  %v916_v23 = vadd.f32 %v2252_v34, %v902_v31  ;;  %v915_v44 = vadd.f32 %v2254_v36, %v901_v32  ;;  %v991_v34 = vmul.f32 %v2076_v21, %v990_v29  ;;  %v1082_v21 = vstv %s1602_s29 }
 0x16f   : > { %1425 = vrot.lane.b32.xlu0 %v1421_v0, %s1699_s5  ;;  %s1620_s5 = sld [smem:[#allocation2 + $0x54]] }
 0x170   : > { %v1004_v7 = vpop.permute.xlu1 %1003  ;;  %v930_v24 = vadd.f32 %v926_v43, %v916_v23  ;;  %v929_v38 = vadd.f32 %v924_v45, %v915_v44 }
 0x171   : > { %v1002_v8 = vpop.permute.xlu0 %1001 }
 0x172   : > { %1441 = vrot.lane.b32.xlu1 %v1436_v6, %s1700_s7  ;;  %v944_v27 = vadd.f32 %v940_v49, %v930_v24  ;;  %v943_v46 = vadd.f32 %v938_v28, %v929_v38 }
 0x173   : > { %1439 = vrot.lane.b32.xlu0 %v1435_v18, %s1700_s7  ;;  %s1629_s7 = sld [smem:[#allocation2 + $0x5b]] }
 0x174   : > { %v1018_v9 = vpop.permute.xlu1 %1017  ;;  %v958_v62 = vadd.f32 %v954_v54, %v944_v27  ;;  %v957_v47 = vadd.f32 %v952_v35, %v943_v46 }
 0x175   : > { %v1016_v11 = vpop.permute.xlu0 %1015 }
 0x176   : > { %v972_v42 = vadd.f32 %v968_v22, %v958_v62  ;;  %v971_v53 = vadd.f32 %v966_v1, %v957_v47 }
 0x178   : > { %v1032_v60 = vpop.permute.xlu1 %1031  ;;  %v986_v55 = vadd.f32 %v982_v4, %v972_v42  ;;  %v985_v56 = vadd.f32 %v980_v5, %v971_v53 }
 0x179   : > { %v1030_v15 = vpop.permute.xlu0 %1029 }
 0x17a   : > { %v994_v45 = vadd.f32 %v992_v57, %v986_v55  ;;  %v993_v63 = vadd.f32 %v991_v34, %v985_v56 }
 0x17c   : > { %v1046_v26 = vpop.permute.xlu1 %1045  ;;  %v1008_v28 = vadd.f32 %v1004_v7, %v994_v45  ;;  %v1007_v54 = vadd.f32 %v1002_v8, %v993_v63  ;;  %v1084_v7 = vmul.f32 %v2110_v58, %v1082_v21  ;;  %v1083_v8 = vmul.f32 %v2114_v59, %v1082_v21 }
 0x17d   : > { %v1044_v30 = vpop.permute.xlu0 %1043  ;;  %v1174_v58 = vstv %s1611_s3 }
 0x17e   : > { %v1022_v6 = vadd.f32 %v1018_v9, %v1008_v28  ;;  %v1021_v22 = vadd.f32 %v1016_v11, %v1007_v54  ;;  %v1176_v42 = vmul.f32 %v2162_v2, %v1174_v58 }
 0x180   : > { %v1060_v37 = vpop.permute.xlu1 %1059  ;;  %v1036_v1 = vadd.f32 %v1032_v60, %v1022_v6  ;;  %v1035_v4 = vadd.f32 %v1030_v15, %v1021_v22 }
 0x181   : > { %v1058_v14 = vpop.permute.xlu0 %1057 }
 0x182   : > { %v1050_v10 = vadd.f32 %v1046_v26, %v1036_v1  ;;  %v1049_v41 = vadd.f32 %v1044_v30, %v1035_v4 }
 0x184   : > { %v1074_v17 = vpop.permute.xlu1 %1073  ;;  %v1064_v12 = vadd.f32 %v1060_v37, %v1050_v10  ;;  %v1063_v13 = vadd.f32 %v1058_v14, %v1049_v41 }
 0x185   : > { %v1072_v39 = vpop.permute.xlu0 %1071 }
 0x186   : > { %v1078_v40 = vadd.f32 %v1074_v17, %v1064_v12  ;;  %v1077_v25 = vadd.f32 %v1072_v39, %v1063_v13 }
 0x188   : > { %v1096_v48 = vpop.permute.xlu1 %1095  ;;  %v1086_v11 = vadd.f32 %v1084_v7, %v1078_v40  ;;  %v1085_v60 = vadd.f32 %v1083_v8, %v1077_v25 }
 0x189   : > { %v1094_v50 = vpop.permute.xlu0 %1093 }
 0x18a   : > { %v1100_v26 = vadd.f32 %v1096_v48, %v1086_v11  ;;  %v1099_v30 = vadd.f32 %v1094_v50, %v1085_v60  ;;  %v1175_v48 = vmul.f32 %v2166_v61, %v1174_v58  ;;  %v1266_v61 = vstv %s1620_s5 }
 0x18b   : > { %v1268_v41 = vmul.f32 %v2203_v51, %v1266_v61  ;;  %v1267_v21 = vmul.f32 %v2207_v52, %v1266_v61  ;;  %v1358_v51 = vstv %s1629_s7 }
 0x18c   : > { %v1110_v36 = vpop.permute.xlu1 %1109 }
 0x18d   : > { %v1108_v43 = vpop.permute.xlu0 %1107  ;;  %v1114_v23 = vadd.f32 %v1110_v36, %v1100_v26 }
 0x18e   : > { %v1113_v37 = vadd.f32 %v1108_v43, %v1099_v30 }
 0x190   : > { %v1124_v0 = vpop.permute.xlu1 %1123 }
 0x191   : > { %v1122_v49 = vpop.permute.xlu0 %1121  ;;  %v1128_v24 = vadd.f32 %v1124_v0, %v1114_v23 }
 0x192   : > { %v1127_v38 = vadd.f32 %v1122_v49, %v1113_v37 }
 0x194   : > { %v1138_v35 = vpop.permute.xlu1 %1137 }
 0x195   : > { %v1136_v3 = vpop.permute.xlu0 %1135  ;;  %v1142_v17 = vadd.f32 %v1138_v35, %v1128_v24 }
 0x196   : > { %v1141_v39 = vadd.f32 %v1136_v3, %v1127_v38  ;;  %v1360_v38 = vmul.f32 %v2247_v20, %v1358_v51 }
 0x198   : > { %v1152_v5 = vpop.permute.xlu1 %1151 }
 0x199   : > { %v1150_v18 = vpop.permute.xlu0 %1149  ;;  %v1156_v46 = vadd.f32 %v1152_v5, %v1142_v17  ;;  %v1359_v17 = vmul.f32 %v2250_v33, %v1358_v51 }
 0x19a   : > { %v1155_v62 = vadd.f32 %v1150_v18, %v1141_v39 }
 0x19c   : > { %v1166_v16 = vpop.permute.xlu1 %1165 }
 0x19d   : > { %v1164_v19 = vpop.permute.xlu0 %1163  ;;  %v1170_v47 = vadd.f32 %v1166_v16, %v1156_v46 }
 0x19e   : > { %v1169_v29 = vadd.f32 %v1164_v19, %v1155_v62 }
 0x19f   : > { %v1178_v55 = vadd.f32 %v1176_v42, %v1170_v47 }
 0x1a0   : > { %v1188_v31 = vpop.permute.xlu1 %1187  ;;  %v1177_v56 = vadd.f32 %v1175_v48, %v1169_v29 }
 0x1a1   : > { %v1186_v9 = vpop.permute.xlu0 %1185  ;;  %v1192_v36 = vadd.f32 %v1188_v31, %v1178_v55 }
 0x1a2   : > { %v1191_v43 = vadd.f32 %v1186_v9, %v1177_v56 }
 0x1a4   : > { %v1202_v15 = vpop.permute.xlu1 %1201 }
 0x1a5   : > { %v1200_v32 = vpop.permute.xlu0 %1199  ;;  %v1206_v0 = vadd.f32 %v1202_v15, %v1192_v36 }
 0x1a6   : > { %v1205_v49 = vadd.f32 %v1200_v32, %v1191_v43 }
 0x1a8   : > { %v1216_v14 = vpop.permute.xlu1 %1215 }
 0x1a9   : > { %v1214_v44 = vpop.permute.xlu0 %1213  ;;  %v1220_v28 = vadd.f32 %v1216_v14, %v1206_v0 }
 0x1aa   : > { %v1219_v54 = vadd.f32 %v1214_v44, %v1205_v49 }
 0x1ac   : > { %v1230_v27 = vpop.permute.xlu1 %1229 }
 0x1ad   : > { %v1228_v59 = vpop.permute.xlu0 %1227  ;;  %v1234_v2 = vadd.f32 %v1230_v27, %v1220_v28 }
 0x1ae   : > { %v1233_v6 = vadd.f32 %v1228_v59, %v1219_v54 }
 0x1b0   : > { %v1244_v50 = vpop.permute.xlu1 %1243 }
 0x1b1   : > { %v1242_v53 = vpop.permute.xlu0 %1241  ;;  %v1248_v22 = vadd.f32 %v1244_v50, %v1234_v2 }
 0x1b2   : > { %v1247_v1 = vadd.f32 %v1242_v53, %v1233_v6 }
 0x1b4   : > { %v1258_v57 = vpop.permute.xlu1 %1257 }
 0x1b5   : > { %v1256_v34 = vpop.permute.xlu0 %1255  ;;  %v1262_v18 = vadd.f32 %v1258_v57, %v1248_v22 }
 0x1b6   : > { %v1261_v10 = vadd.f32 %v1256_v34, %v1247_v1 }
 0x1b7   : > { %v1270_v16 = vadd.f32 %v1268_v41, %v1262_v18 }
 0x1b8   : > { %v1280_v45 = vpop.permute.xlu1 %1279  ;;  %v1269_v19 = vadd.f32 %v1267_v21, %v1261_v10 }
 0x1b9   : > { %v1278_v63 = vpop.permute.xlu0 %1277  ;;  %v1284_v7 = vadd.f32 %v1280_v45, %v1270_v16 }
 0x1ba   : > { %v1283_v8 = vadd.f32 %v1278_v63, %v1269_v19 }
 0x1bc   : > { %v1294_v35 = vpop.permute.xlu1 %1293 }
 0x1bd   : > { %v1292_v3 = vpop.permute.xlu0 %1291  ;;  %v1298_v31 = vadd.f32 %v1294_v35, %v1284_v7 }
 0x1be   : > { %v1297_v9 = vadd.f32 %v1292_v3, %v1283_v8 }
 0x1c0   : > { %v1308_v4 = vpop.permute.xlu1 %1307 }
 0x1c1   : > { %v1306_v5 = vpop.permute.xlu0 %1305  ;;  %v1312_v15 = vadd.f32 %v1308_v4, %v1298_v31 }
 0x1c2   : > { %v1311_v32 = vadd.f32 %v1306_v5, %v1297_v9 }
 0x1c4   : > { %v1322_v12 = vpop.permute.xlu1 %1321 }
 0x1c5   : > { %v1320_v13 = vpop.permute.xlu0 %1319  ;;  %v1326_v26 = vadd.f32 %v1322_v12, %v1312_v15 }
 0x1c6   : > { %v1325_v30 = vadd.f32 %v1320_v13, %v1311_v32 }
 0x1c8   : > { %v1336_v40 = vpop.permute.xlu1 %1335 }
 0x1c9   : > { %v1334_v25 = vpop.permute.xlu0 %1333  ;;  %v1340_v37 = vadd.f32 %v1336_v40, %v1326_v26 }
 0x1ca   : > { %v1339_v14 = vadd.f32 %v1334_v25, %v1325_v30 }
 0x1cc   : > { %v1350_v11 = vpop.permute.xlu1 %1349 }
 0x1cd   : > { %v1348_v60 = vpop.permute.xlu0 %1347  ;;  %v1354_v44 = vadd.f32 %v1350_v11, %v1340_v37 }
 0x1ce   : > { %v1353_v24 = vadd.f32 %v1348_v60, %v1339_v14 }
 0x1cf   : > { %v1362_v27 = vadd.f32 %v1360_v38, %v1354_v44 }
 0x1d0   : > { %v1372_v23 = vpop.permute.xlu1 %1371  ;;  %v1361_v59 = vadd.f32 %v1359_v17, %v1353_v24 }
 0x1d1   : > { %v1370_v52 = vpop.permute.xlu0 %1369  ;;  %v1376_v47 = vadd.f32 %v1372_v23, %v1362_v27 }
 0x1d2   : > { %v1375_v29 = vadd.f32 %v1370_v52, %v1361_v59 }
 0x1d4   : > { %v1386_v39 = vpop.permute.xlu1 %1385 }
 0x1d5   : > { %v1384_v58 = vpop.permute.xlu0 %1383  ;;  %v1390_v50 = vadd.f32 %v1386_v39, %v1376_v47 }
 0x1d6   : > { %v1389_v53 = vadd.f32 %v1384_v58, %v1375_v29 }
 0x1d8   : > { %v1400_v46 = vpop.permute.xlu1 %1399 }
 0x1d9   : > { %v1398_v62 = vpop.permute.xlu0 %1397  ;;  %v1404_v55 = vadd.f32 %v1400_v46, %v1390_v50 }
 0x1da   : > { %v1403_v56 = vadd.f32 %v1398_v62, %v1389_v53 }
 0x1dc   : > { %v1414_v42 = vpop.permute.xlu1 %1413 }
 0x1dd   : > { %v1412_v48 = vpop.permute.xlu0 %1411  ;;  %v1418_v20 = vadd.f32 %v1414_v42, %v1404_v55 }
 0x1de   : > { %v1417_v36 = vadd.f32 %v1412_v48, %v1403_v56 }
 0x1e0   : > { %v1428_v57 = vpop.permute.xlu1 %1427 }
 0x1e1   : > { %v1426_v34 = vpop.permute.xlu0 %1425  ;;  %v1432_v33 = vadd.f32 %v1428_v57, %v1418_v20 }
 0x1e2   : > { %v1431_v43 = vadd.f32 %v1426_v34, %v1417_v36 }
 0x1e4   : > { %v1442_v45 = vpop.permute.xlu1 %1441 }
 0x1e5   : > { %v1440_v63 = vpop.permute.xlu0 %1439  ;;  %v1446_v0 = vadd.f32 %v1442_v45, %v1432_v33 }
 0x1e6   : > { %v1445_v49 = vadd.f32 %v1440_v63, %v1431_v43 }
 0x1e7   : > { %1449 = vst.msk [vmem:[%s157_s19 + $0x8] sm:$0xff] %vm1447_vm0, %v1446_v0 }
 0x1e8   : > { %1448 = vst.msk [vmem:[%s157_s19] sm:$0xff] %vm1447_vm0, %v1445_v49 }
 0x1e9 PF: > { %s13_s9 = sadd.s32 1, %s1692_s9  }
 0x1ea   : > { %p10_p1 = scmp.ge.s32.totalorder %s13_s9, 4  }
 0x1ec   :  { %12 = sbr.rel (!%p10_p1) target bundleno = 1 (0x1), region = 64 }
 0x1f3   :  { %1471 = vsyncpa [#allocation3], 1 }
 0x1f4   :  { %1473 = vsyncpa [#allocation3 + $0x1], 1 }

</bundles_post_ra>
